<compile_context>
chip_gen: v6e
topology: v6e:2x2x1
jax: 0.10.0
libtpu: 0.0.40
codegen_flags: <defaults>
</compile_context>

<pallas_src>
import functools

import jax
import jax.numpy as jnp
from jax.experimental import pallas as pl
from jax.experimental.pallas import tpu as pltpu


def _round_up(x, m):
    return (x + m - 1) // m * m


# Label sentinel for padded rows/columns.  Padded columns are excluded from the
# softmax denominator and can never be positives because no real int32 label
# equals this value in practice (documented limitation).
_PAD_LABEL = -(2 ** 31)


def _supcon_kernel(labq_ref, labk_ref, q_ref, kt_ref, out_ref,
                   m_scr, l_scr, s_scr, c_scr, *, temperature, has_padding):
    """One (TQ, TK) tile of the anchor x contrast similarity matrix.

    labq_ref: (TQ, 1)   int32 row (anchor) labels, padded rows carry _PAD_LABEL
    labk_ref: (1, TK)   int32 column (contrast) labels
    q_ref:    (TQ, D)   bf16 anchor tile, already scaled by 1/temperature
    kt_ref:   (D, TK)   bf16 contrast tile (pre-transposed in the wrapper)
    out_ref:  (TQ, 1)   f32 per-anchor loss (-T * mean_log_prob_pos)
    scratch:  running row-max m, exp-sum l, sum(mask*logits) s, sum(mask) c
    """
    ki = pl.program_id(1)

    @pl.when(ki == 0)
    def _init():
        m_scr[...] = jnp.full_like(m_scr, -jnp.inf)
        l_scr[...] = jnp.zeros_like(l_scr)
        s_scr[...] = jnp.zeros_like(s_scr)
        c_scr[...] = jnp.zeros_like(c_scr)

    tq = q_ref.shape[0]
    tk = kt_ref.shape[1]

    # bf16 x bf16 -> f32 on the MXU.  1/T is already folded into q.
    sims = jnp.dot(q_ref[...], kt_ref[...],
                   preferred_element_type=jnp.float32)          # (TQ, TK)

    # Self-exclusion mask rebuilt per tile from iota.  Padded columns have zero
    # features (sims == 0) and the sentinel label, so:
    #   - they may only RAISE the running max (harmless: logsumexp is
    #     offset-invariant, and a finite max means no -inf/NaN hazard),
    #   - they are excluded from the exp-sum via the (1,TK) sentinel compare,
    #   - they never match a real label, so they never count as positives.
    row_ids = pl.program_id(0) * tq + jax.lax.broadcasted_iota(jnp.int32, (tq, 1), 0)
    col_ids = ki * tk + jax.lax.broadcasted_iota(jnp.int32, (1, tk), 1)
    not_self = row_ids != col_ids
    if has_padding:
        keep = jnp.logical_and(not_self, labk_ref[...] != _PAD_LABEL)
    else:
        keep = not_self

    # Online softmax statistics.  NOTE: the running max intentionally includes
    # the self-similarity column (and padded zero columns); the exp-sum does
    # not.  This matches the PyTorch reference up to the (cancelling) offset.
    m_prev = m_scr[...]
    m_new = jnp.maximum(m_prev, jnp.max(sims, axis=1, keepdims=True))
    alpha = jnp.exp(m_prev - m_new)
    p = jnp.where(keep, jnp.exp(sims - m_new), 0.0)
    l_scr[...] = alpha * l_scr[...] + jnp.sum(p, axis=1, keepdims=True)
    m_scr[...] = m_new

    # Linear (max-independent) accumulators for the positive terms.
    pos = jnp.logical_and(labq_ref[...] == labk_ref[...], not_self)
    posf = pos.astype(jnp.float32)
    s_scr[...] += jnp.sum(posf * sims, axis=1, keepdims=True)
    c_scr[...] += jnp.sum(posf, axis=1, keepdims=True)

    @pl.when(ki == pl.num_programs(1) - 1)
    def _finalize():
        log_denom = m_scr[...] + jnp.log(l_scr[...])   # logsumexp over non-self cols
        cnt = c_scr[...]
        # clamp avoids NaN for anchors without positives (n_views==1 / singleton
        # class); unpatched PyTorch would return NaN in that case.
        mean_log_prob_pos = (s_scr[...] - cnt * log_denom) / jnp.maximum(cnt, 1.0)
        out_ref[...] = (-temperature) * mean_log_prob_pos


def supcon_loss(features, labels=None, mask=None, temperature=0.2, contrast_mode="all"):
    """JAX/Pallas equivalent of SupConLoss.forward (contrast_mode='all')."""
    if features.ndim < 3:
        raise ValueError("`features` needs to be [bsz, n_views, ...]")
    if features.ndim > 3:
        features = features.reshape(features.shape[0], features.shape[1], -1)
    bsz, n_views, d = features.shape

    if labels is not None and mask is not None:
        raise ValueError("Cannot define both `labels` and `mask`")
    if mask is not None:
        # TODO(synk): arbitrary (possibly asymmetric) bsz x bsz mask input is not
        # supported by the label-based in-kernel mask reconstruction.
        raise NotImplementedError("explicit `mask` not supported; pass `labels` or None")
    if contrast_mode != "all":
        # TODO(synk): contrast_mode='one' not implemented in this kernel wrapper.
        raise ValueError("only contrast_mode='all' is implemented")

    if labels is None:
        base_labels = jnp.arange(bsz, dtype=jnp.int32)       # SimCLR: positive == same sample
    else:
        labels = jnp.asarray(labels).reshape(-1)
        if labels.shape[0] != bsz:
            raise ValueError("Num of labels does not match num of features")
        base_labels = labels.astype(jnp.int32)

    N = n_views * bsz
    # contrast_feature = cat(unbind(features, dim=1)) -> [N, D], row = view*bsz + sample
    feat = jnp.transpose(features, (1, 0, 2)).reshape(N, d).astype(jnp.float32)
    row_labels = jnp.tile(base_labels, n_views)               # (N,)

    inv_t = 1.0 / float(temperature)

    # ---- Tiling geometry: pick tiles first, pad N to them. -----------------
    d_pad = max(128, _round_up(d, 128))
    tq = 256                                                  # keeps n_pad//tq >= 2 for real
                                                              # batches -> both v7x TCs get work
    n_pad_min = _round_up(N, tq)
    # Resident-K path: whole (D_pad, N_pad) contrast matrix stays in VMEM and
    # is DMA'd once (constant block index), provided the double-buffered bf16
    # copy fits an 8 MiB budget and the (TQ, N_pad) f32 temporaries stay small.
    resident = (n_pad_min <= 1024) and (2 * n_pad_min * d_pad * 2 <= (8 << 20))
    if resident:
        n_pad = n_pad_min
        tk = n_pad
    else:
        tk = 512                                              # streaming fallback
        n_pad = _round_up(N, tk)                              # multiple of tq too

    # ---- Padded operands (bf16 for the MXU, 1/T folded into the anchors). --
    feat_p = jnp.zeros((n_pad, d_pad), jnp.float32).at[:N, :d].set(feat)
    q_bf16 = (feat_p * inv_t).astype(jnp.bfloat16)            # (N_pad, D_pad)
    kt_bf16 = jnp.transpose(feat_p).astype(jnp.bfloat16)      # (D_pad, N_pad), NT avoided in-kernel
    lab_p = jnp.full((n_pad,), _PAD_LABEL, dtype=jnp.int32).at[:N].set(row_labels)
    lab_row = lab_p.reshape(n_pad, 1)
    lab_col = lab_p.reshape(1, n_pad)

    kernel = functools.partial(_supcon_kernel,
                               temperature=float(temperature),
                               has_padding=(N < n_pad))

    per_anchor = pl.pallas_call(
        kernel,
        out_shape=jax.ShapeDtypeStruct((n_pad, 1), jnp.float32),
        grid_spec=pltpu.PrefetchScalarGridSpec(
            num_scalar_prefetch=0,
            grid=(n_pad // tq, n_pad // tk),
            in_specs=[
                pl.BlockSpec((tq, 1), lambda qi, ki: (qi, 0)),        # row labels
                pl.BlockSpec((1, tk), lambda qi, ki: (0, ki)),        # col labels
                pl.BlockSpec((tq, d_pad), lambda qi, ki: (qi, 0)),    # anchor tile (bf16, /T)
                pl.BlockSpec((d_pad, tk), lambda qi, ki: (0, ki)),    # contrast tile (bf16, pre-T)
            ],
            out_specs=pl.BlockSpec((tq, 1), lambda qi, ki: (qi, 0)),
            scratch_shapes=[
                pltpu.VMEM((tq, 1), jnp.float32),   # running row max
                pltpu.VMEM((tq, 1), jnp.float32),   # running exp-sum
                pltpu.VMEM((tq, 1), jnp.float32),   # sum(mask * logits)
                pltpu.VMEM((tq, 1), jnp.float32),   # sum(mask)
            ],
        ),
        compiler_params=pltpu.CompilerParams(
            dimension_semantics=("parallel", "arbitrary"),
            vmem_limit_bytes=32 * 1024 * 1024,      # explicit: safe on v5e/v6e/v7x
        ),
    )(lab_row, lab_col, q_bf16, kt_bf16)

    # loss.view(anchor_count, batch_size).mean() == mean over the N real anchors.
    return jnp.mean(per_anchor[:N, 0])


def _supcon_loss_ref(features, labels=None, temperature=0.2, cast_bf16=False):
    """Pure-JAX reference mirroring the PyTorch forward (contrast_mode='all').

    With cast_bf16=True the similarity matmul mirrors the kernel's bf16-input /
    f32-accumulate MXU path (for a tight numerical check)."""
    bsz, n_views, d = features.shape
    N = n_views * bsz
    feat = jnp.transpose(features, (1, 0, 2)).reshape(N, d).astype(jnp.float32)
    if labels is None:
        base = jnp.eye(bsz, dtype=jnp.float32)
    else:
        labels = jnp.asarray(labels).reshape(-1, 1)
        base = (labels == labels.T).astype(jnp.float32)
    mask = jnp.tile(base, (n_views, n_views))
    lmask = 1.0 - jnp.eye(N, dtype=jnp.float32)
    mask = mask * lmask
    if cast_bf16:
        qb = (feat / temperature).astype(jnp.bfloat16)
        kb = feat.astype(jnp.bfloat16)
        sims = jnp.dot(qb, kb.T, preferred_element_type=jnp.float32)
    else:
        sims = jnp.dot(feat, feat.T, precision=jax.lax.Precision.HIGHEST) / temperature
    logits = sims - jnp.max(sims, axis=1, keepdims=True)
    exp_logits = jnp.exp(logits) * lmask
    log_prob = logits - jnp.log(jnp.sum(exp_logits, axis=1, keepdims=True))
    mean_log_prob_pos = jnp.sum(mask * log_prob, axis=1) / jnp.sum(mask, axis=1)
    return -temperature * jnp.mean(mean_log_prob_pos)


if __name__ == "__main__":
    key = jax.random.PRNGKey(0)
    bsz, n_views, d = 4, 2, 32
    feats = jax.random.normal(key, (bsz, n_views, d), dtype=jnp.float32)
    feats = feats / jnp.linalg.norm(feats, axis=-1, keepdims=True)

    # SimCLR (labels=None) case
    loss = jax.block_until_ready(supcon_loss(feats, temperature=0.2))
    ref_f32 = _supcon_loss_ref(feats, labels=None, temperature=0.2)
    ref_b16 = _supcon_loss_ref(feats, labels=None, temperature=0.2, cast_bf16=True)
    assert jnp.allclose(loss, ref_f32, atol=5e-2, rtol=5e-2), (loss, ref_f32)
    assert jnp.allclose(loss, ref_b16, atol=2e-3, rtol=2e-3), (loss, ref_b16)

    # Supervised (labels) case
    lbls = jnp.array([0, 1, 0, 1], dtype=jnp.int32)
    loss2 = jax.block_until_ready(supcon_loss(feats, labels=lbls, temperature=0.2))
    ref2_f32 = _supcon_loss_ref(feats, labels=lbls, temperature=0.2)
    ref2_b16 = _supcon_loss_ref(feats, labels=lbls, temperature=0.2, cast_bf16=True)
    assert jnp.allclose(loss2, ref2_f32, atol=5e-2, rtol=5e-2), (loss2, ref2_f32)
    assert jnp.allclose(loss2, ref2_b16, atol=2e-3, rtol=2e-3), (loss2, ref2_b16)

    print("KERNEL_OK")
</pallas_src>

<mosaic_0001>
module attributes {stable_mosaic.version = 11 : i64} {
  func.func @_supcon_kernel(%arg0: i32, %arg1: i32, %arg2: memref<256x1xi32, #tpu.memory_space<vmem>>, %arg3: memref<1x256xi32, #tpu.memory_space<vmem>>, %arg4: memref<256x128xbf16, #tpu.memory_space<vmem>>, %arg5: memref<128x256xbf16, #tpu.memory_space<vmem>>, %arg6: memref<256x1xf32, #tpu.memory_space<vmem>>, %arg7: memref<256x1xf32, #tpu.memory_space<vmem>>, %arg8: memref<256x1xf32, #tpu.memory_space<vmem>>, %arg9: memref<256x1xf32, #tpu.memory_space<vmem>>, %arg10: memref<256x1xf32, #tpu.memory_space<vmem>>) attributes {dimension_semantics = [#tpu.dimension_semantics<parallel>, #tpu.dimension_semantics<arbitrary>], iteration_bounds = array<i64: 1, 1>, scalar_prefetch = 0 : i64, scratch_operands = 4 : i64, tpu.core_type = #tpu.core_type<tc>, window_params = [{transform_indices = @transform_0, window_bounds = array<i64: 256, 1>}, {transform_indices = @transform_1, window_bounds = array<i64: 1, 256>}, {transform_indices = @transform_2, window_bounds = array<i64: 256, 128>}, {transform_indices = @transform_3, window_bounds = array<i64: 128, 256>}, {transform_indices = @transform_4, window_bounds = array<i64: 256, 1>}]} {
    %c0_i32 = arith.constant 0 : i32
    %0 = arith.cmpi eq, %arg1, %c0_i32 : i32
    %1 = arith.extui %0 : i1 to i32
    %c0_i32_0 = arith.constant 0 : i32
    %2 = arith.cmpi ne, %1, %c0_i32_0 : i32
    scf.if %2 {
      %cst_34 = arith.constant 0xFF800000 : f32
      %62 = vector.broadcast %cst_34 : f32 to vector<256x1xf32>
      %c0_35 = arith.constant 0 : index
      %c0_36 = arith.constant 0 : index
      %63 = vector.load %arg7[%c0_35, %c0_36] : memref<256x1xf32, #tpu.memory_space<vmem>>, vector<256x1xf32>
      tpu.vector_store %arg7[%c0_35, %c0_36], %62 {strides = array<i32>} : memref<256x1xf32, #tpu.memory_space<vmem>>, vector<256x1xf32>,
      %cst_37 = arith.constant 0.000000e+00 : f32
      %64 = vector.broadcast %cst_37 : f32 to vector<256x1xf32>
      %c0_38 = arith.constant 0 : index
      %c0_39 = arith.constant 0 : index
      %65 = vector.load %arg8[%c0_38, %c0_39] : memref<256x1xf32, #tpu.memory_space<vmem>>, vector<256x1xf32>
      tpu.vector_store %arg8[%c0_38, %c0_39], %64 {strides = array<i32>} : memref<256x1xf32, #tpu.memory_space<vmem>>, vector<256x1xf32>,
      %cst_40 = arith.constant 0.000000e+00 : f32
      %66 = vector.broadcast %cst_40 : f32 to vector<256x1xf32>
      %c0_41 = arith.constant 0 : index
      %c0_42 = arith.constant 0 : index
      %67 = vector.load %arg9[%c0_41, %c0_42] : memref<256x1xf32, #tpu.memory_space<vmem>>, vector<256x1xf32>
      tpu.vector_store %arg9[%c0_41, %c0_42], %66 {strides = array<i32>} : memref<256x1xf32, #tpu.memory_space<vmem>>, vector<256x1xf32>,
      %cst_43 = arith.constant 0.000000e+00 : f32
      %68 = vector.broadcast %cst_43 : f32 to vector<256x1xf32>
      %c0_44 = arith.constant 0 : index
      %c0_45 = arith.constant 0 : index
      %69 = vector.load %arg10[%c0_44, %c0_45] : memref<256x1xf32, #tpu.memory_space<vmem>>, vector<256x1xf32>
      tpu.vector_store %arg10[%c0_44, %c0_45], %68 {strides = array<i32>} : memref<256x1xf32, #tpu.memory_space<vmem>>, vector<256x1xf32>,
    } else {
    }
    %c0 = arith.constant 0 : index
    %c0_1 = arith.constant 0 : index
    %3 = vector.load %arg4[%c0, %c0_1] : memref<256x128xbf16, #tpu.memory_space<vmem>>, vector<256x128xbf16>
    %c0_2 = arith.constant 0 : index
    %c0_3 = arith.constant 0 : index
    %4 = vector.load %arg5[%c0_2, %c0_3] : memref<128x256xbf16, #tpu.memory_space<vmem>>, vector<128x256xbf16>
    %cst = arith.constant dense<0.000000e+00> : vector<256x256xf32>
    %5 = tpu.matmul %3, %4, %cst {dimension_numbers = #tpu.dot_dimension_numbers<[1], [0], [0], [1], [0, 0, 1, 1], [], []>} : vector<256x128xbf16>, vector<128x256xbf16>, vector<256x256xf32> -> vector<256x256xf32>
    %c256_i32 = arith.constant 256 : i32
    %6 = arith.muli %arg0, %c256_i32 : i32
    %7 = tpu.iota {dimensions = array<i32: 0>} : vector<256x1xi32>
    %8 = vector.broadcast %6 : i32 to vector<256x1xi32>
    %9 = arith.addi %8, %7 : vector<256x1xi32>
    %c256_i32_4 = arith.constant 256 : i32
    %10 = arith.muli %arg1, %c256_i32_4 : i32
    %11 = tpu.iota {dimensions = array<i32: 1>} : vector<1x256xi32>
    %12 = vector.broadcast %10 : i32 to vector<1x256xi32>
    %13 = arith.addi %12, %11 : vector<1x256xi32>
    %14 = vector.broadcast %9 : vector<256x1xi32> to vector<256x256xi32>
    %15 = vector.broadcast %13 : vector<1x256xi32> to vector<256x256xi32>
    %16 = arith.cmpi ne, %14, %15 : vector<256x256xi32>
    %c0_5 = arith.constant 0 : index
    %c0_6 = arith.constant 0 : index
    %17 = vector.load %arg3[%c0_5, %c0_6] : memref<1x256xi32, #tpu.memory_space<vmem>>, vector<1x256xi32>
    %c-2147483648_i32 = arith.constant -2147483648 : i32
    %18 = vector.broadcast %c-2147483648_i32 : i32 to vector<1x256xi32>
    %19 = arith.cmpi ne, %17, %18 : vector<1x256xi32>
    %20 = vector.broadcast %19 : vector<1x256xi1> to vector<256x256xi1>
    %21 = arith.andi %16, %20 : vector<256x256xi1>
    %c0_7 = arith.constant 0 : index
    %c0_8 = arith.constant 0 : index
    %22 = vector.load %arg7[%c0_7, %c0_8] : memref<256x1xf32, #tpu.memory_space<vmem>>, vector<256x1xf32>
    %cst_9 = arith.constant dense<0xFF800000> : vector<256xf32>
    %23 = vector.multi_reduction <maximumf>, %5, %cst_9 [1] : vector<256x256xf32> to vector<256xf32>
    %24 = vector.shape_cast %23 : vector<256xf32> to vector<256x1xf32>
    %25 = arith.maximumf %22, %24 : vector<256x1xf32>
    %26 = arith.subf %22, %25 : vector<256x1xf32>
    %27 = math.exp %26 : vector<256x1xf32>
    %28 = vector.broadcast %25 : vector<256x1xf32> to vector<256x256xf32>
    %29 = arith.subf %5, %28 : vector<256x256xf32>
    %30 = math.exp %29 : vector<256x256xf32>
    %cst_10 = arith.constant 0.000000e+00 : f32
    %31 = vector.broadcast %cst_10 : f32 to vector<256x256xf32>
    %32 = arith.select %21, %30, %31 : vector<256x256xi1>, vector<256x256xf32>
    %c0_11 = arith.constant 0 : index
    %c0_12 = arith.constant 0 : index
    %33 = vector.load %arg8[%c0_11, %c0_12] : memref<256x1xf32, #tpu.memory_space<vmem>>, vector<256x1xf32>
    %34 = arith.mulf %27, %33 : vector<256x1xf32>
    %cst_13 = arith.constant dense<0.000000e+00> : vector<256xf32>
    %35 = vector.multi_reduction <add>, %32, %cst_13 [1] : vector<256x256xf32> to vector<256xf32>
    %36 = vector.shape_cast %35 : vector<256xf32> to vector<256x1xf32>
    %37 = arith.addf %34, %36 : vector<256x1xf32>
    %c0_14 = arith.constant 0 : index
    %c0_15 = arith.constant 0 : index
    %38 = vector.load %arg8[%c0_14, %c0_15] : memref<256x1xf32, #tpu.memory_space<vmem>>, vector<256x1xf32>
    tpu.vector_store %arg8[%c0_14, %c0_15], %37 {strides = array<i32>} : memref<256x1xf32, #tpu.memory_space<vmem>>, vector<256x1xf32>,
    %c0_16 = arith.constant 0 : index
    %c0_17 = arith.constant 0 : index
    %39 = vector.load %arg7[%c0_16, %c0_17] : memref<256x1xf32, #tpu.memory_space<vmem>>, vector<256x1xf32>
    tpu.vector_store %arg7[%c0_16, %c0_17], %25 {strides = array<i32>} : memref<256x1xf32, #tpu.memory_space<vmem>>, vector<256x1xf32>,
    %c0_18 = arith.constant 0 : index
    %c0_19 = arith.constant 0 : index
    %40 = vector.load %arg2[%c0_18, %c0_19] : memref<256x1xi32, #tpu.memory_space<vmem>>, vector<256x1xi32>
    %c0_20 = arith.constant 0 : index
    %c0_21 = arith.constant 0 : index
    %41 = vector.load %arg3[%c0_20, %c0_21] : memref<1x256xi32, #tpu.memory_space<vmem>>, vector<1x256xi32>
    %42 = vector.broadcast %40 : vector<256x1xi32> to vector<256x256xi32>
    %43 = vector.broadcast %41 : vector<1x256xi32> to vector<256x256xi32>
    %44 = arith.cmpi eq, %42, %43 : vector<256x256xi32>
    %45 = arith.andi %44, %16 : vector<256x256xi1>
    %46 = arith.extui %45 : vector<256x256xi1> to vector<256x256xi32>
    %47 = arith.sitofp %46 : vector<256x256xi32> to vector<256x256xf32>
    %c0_22 = arith.constant 0 : index
    %c0_23 = arith.constant 0 : index
    %48 = vector.load %arg9[%c0_22, %c0_23] : memref<256x1xf32, #tpu.memory_space<vmem>>, vector<256x1xf32>
    %49 = arith.mulf %47, %5 : vector<256x256xf32>
    %cst_24 = arith.constant dense<0.000000e+00> : vector<256xf32>
    %50 = vector.multi_reduction <add>, %49, %cst_24 [1] : vector<256x256xf32> to vector<256xf32>
    %51 = vector.shape_cast %50 : vector<256xf32> to vector<256x1xf32>
    %52 = arith.addf %48, %51 : vector<256x1xf32>
    %c0_25 = arith.constant 0 : index
    %c0_26 = arith.constant 0 : index
    %53 = vector.load %arg9[%c0_25, %c0_26] : memref<256x1xf32, #tpu.memory_space<vmem>>, vector<256x1xf32>
    tpu.vector_store %arg9[%c0_25, %c0_26], %52 {strides = array<i32>} : memref<256x1xf32, #tpu.memory_space<vmem>>, vector<256x1xf32>,
    %c0_27 = arith.constant 0 : index
    %c0_28 = arith.constant 0 : index
    %54 = vector.load %arg10[%c0_27, %c0_28] : memref<256x1xf32, #tpu.memory_space<vmem>>, vector<256x1xf32>
    %cst_29 = arith.constant dense<0.000000e+00> : vector<256xf32>
    %55 = vector.multi_reduction <add>, %47, %cst_29 [1] : vector<256x256xf32> to vector<256xf32>
    %56 = vector.shape_cast %55 : vector<256xf32> to vector<256x1xf32>
    %57 = arith.addf %54, %56 : vector<256x1xf32>
    %c0_30 = arith.constant 0 : index
    %c0_31 = arith.constant 0 : index
    %58 = vector.load %arg10[%c0_30, %c0_31] : memref<256x1xf32, #tpu.memory_space<vmem>>, vector<256x1xf32>
    tpu.vector_store %arg10[%c0_30, %c0_31], %57 {strides = array<i32>} : memref<256x1xf32, #tpu.memory_space<vmem>>, vector<256x1xf32>,
    %c0_i32_32 = arith.constant 0 : i32
    %59 = arith.cmpi eq, %arg1, %c0_i32_32 : i32
    %60 = arith.extui %59 : i1 to i32
    %c0_i32_33 = arith.constant 0 : i32
    %61 = arith.cmpi ne, %60, %c0_i32_33 : i32
    scf.if %61 {
      %c0_34 = arith.constant 0 : index
      %c0_35 = arith.constant 0 : index
      %62 = vector.load %arg7[%c0_34, %c0_35] : memref<256x1xf32, #tpu.memory_space<vmem>>, vector<256x1xf32>
      %c0_36 = arith.constant 0 : index
      %c0_37 = arith.constant 0 : index
      %63 = vector.load %arg8[%c0_36, %c0_37] : memref<256x1xf32, #tpu.memory_space<vmem>>, vector<256x1xf32>
      %64 = math.log %63 : vector<256x1xf32>
      %65 = arith.addf %62, %64 : vector<256x1xf32>
      %c0_38 = arith.constant 0 : index
      %c0_39 = arith.constant 0 : index
      %66 = vector.load %arg10[%c0_38, %c0_39] : memref<256x1xf32, #tpu.memory_space<vmem>>, vector<256x1xf32>
      %c0_40 = arith.constant 0 : index
      %c0_41 = arith.constant 0 : index
      %67 = vector.load %arg9[%c0_40, %c0_41] : memref<256x1xf32, #tpu.memory_space<vmem>>, vector<256x1xf32>
      %68 = arith.mulf %66, %65 : vector<256x1xf32>
      %69 = arith.subf %67, %68 : vector<256x1xf32>
      %cst_42 = arith.constant 1.000000e+00 : f32
      %70 = vector.broadcast %cst_42 : f32 to vector<256x1xf32>
      %71 = arith.maximumf %66, %70 : vector<256x1xf32>
      %72 = arith.divf %69, %71 : vector<256x1xf32>
      %cst_43 = arith.constant -2.000000e-01 : f32
      %73 = vector.broadcast %cst_43 : f32 to vector<256x1xf32>
      %74 = arith.mulf %73, %72 : vector<256x1xf32>
      %c0_44 = arith.constant 0 : index
      %c0_45 = arith.constant 0 : index
      %75 = vector.load %arg6[%c0_44, %c0_45] : memref<256x1xf32, #tpu.memory_space<vmem>>, vector<256x1xf32>
      tpu.vector_store %arg6[%c0_44, %c0_45], %74 {strides = array<i32>} : memref<256x1xf32, #tpu.memory_space<vmem>>, vector<256x1xf32>,
    } else {
    }
    return
  }
  func.func @transform_0(%arg0: i32, %arg1: i32) -> (i32, i32) {
    %c0_i32 = arith.constant 0 : i32
    %c0_i32_0 = arith.constant 0 : i32
    return %arg0, %c0_i32 : i32, i32
  }
  func.func @transform_1(%arg0: i32, %arg1: i32) -> (i32, i32) {
    %c0_i32 = arith.constant 0 : i32
    %c0_i32_0 = arith.constant 0 : i32
    return %c0_i32, %arg1 : i32, i32
  }
  func.func @transform_2(%arg0: i32, %arg1: i32) -> (i32, i32) {
    %c0_i32 = arith.constant 0 : i32
    %c0_i32_0 = arith.constant 0 : i32
    return %arg0, %c0_i32 : i32, i32
  }
  func.func @transform_3(%arg0: i32, %arg1: i32) -> (i32, i32) {
    %c0_i32 = arith.constant 0 : i32
    %c0_i32_0 = arith.constant 0 : i32
    return %c0_i32, %arg1 : i32, i32
  }
  func.func @transform_4(%arg0: i32, %arg1: i32) -> (i32, i32) {
    %c0_i32 = arith.constant 0 : i32
    %c0_i32_0 = arith.constant 0 : i32
    return %arg0, %c0_i32 : i32, i32
  }
}

</mosaic_0001>

<bundles_post_ra>
// kernel: tpu_custom_call.1
= control target key start
LH: loop header
LB: loop body
LE: loop exit
PB: predicated region body
PF: predicated region fallthrough
CT: control target
= control target key end

     0   :  { %v569_v0 = vlaneseq  ;;  %v3485_v1 = vmov 0   ;;  %s6127_s1 = inlined_call_operand.vmem [shape: s32[1,256], index: 1, kind: input, shape index: {}]   ;;  %s6128_s0 = inlined_call_operand.vmem [shape: s32[256,1], index: 0, kind: input, shape index: {}]   ;;  %s6129_s3 = inlined_call_operand.vmem [shape: bf16[128,256], index: 3, kind: input, shape index: {}]   ;;  %s6130_s2 = inlined_call_operand.vmem [shape: bf16[256,128], index: 2, kind: input, shape index: {}]   ;;  %s6131_s4 = inlined_call_operand.vmem [shape: f32[256,1], index: 4, kind: output, shape index: {}]  }
   0x1   :  { %3124 = vset.pattern.permute.xlu1 %v3485_v1  ;;  %v706_v2 = vld [vmem:[%s6127_s1] sm:$0x3]  ;;  %3123 = vset.pattern.permute.xlu0 %v3485_v1  ;;  %v1713_v3 = vld [vmem:[%s6128_s0 + $0x8] sm:$0xff]  ;;  %v3125_v7 = vld [vmem:[%s6129_s3 + $0x74] ss:$8 sps:$4 sm:$0xff]  }
   0x2   :  { %v3522_v4 = vshrl.u32 %v569_v0, 7  ;;  %vm707_vm0 = vcmp.ne.s32.totalorder %v706_v2, 2147483648  ;;  %1749 = vperm.xlu1 %3124, %v1713_v3   ;;  %v1712_v5 = vld [vmem:[%s6128_s0] sm:$0xff]  ;;  %407 = vmatprep.mubr.bf16.mxu0 %v3485_v1  ;;  %v3127_v8 = vld [vmem:[%s6129_s3 + $0x70] ss:$8 sps:$4 sm:$0xff]   ;;  %v1717_v19 = vld [vmem:[%s6128_s0 + $0x28] sm:$0xff] }
   0x3   :  { %v708_v6 = vsel %vm707_vm0, 1, %v3485_v1  ;;  %1746 = vperm.xlu0 %3123, %v1712_v5   ;;  %487 = vmatprep.mubr.bf16.mxu1 %v3485_v1  ;;  %v1714_v11 = vld [vmem:[%s6128_s0 + $0x10] sm:$0xff]  ;;  %v1715_v12 = vld [vmem:[%s6128_s0 + $0x18] sm:$0xff]  ;;  %v3128_v13 = vld [vmem:[%s6129_s3 + $0x64] ss:$8 sps:$4 sm:$0xff]  }
   0x4   :  { %6318 = vst [vmem:[#allocation6_spill] sm:$0xff] %v3522_v4  ;;  %v711_v9 = vsub.s32 0, %v3522_v4  ;;  %v715_v10 = vsub.s32 1, %v3522_v4  ;;  %375 = vmatprep.subr.bf16.mxu0 %v3125_v7  ;;  %3104 = vmatprep.subr.bf16.mxu1 %v3125_v7  ;;  %v3130_v16 = vld [vmem:[%s6129_s3 + $0x60] ss:$8 sps:$4 sm:$0xff]   ;;  %v1718_v21 = vld [vmem:[%s6128_s0 + $0x30] sm:$0xff] }
   0x5   :  { %376 = vmatpush1.bf16.msra.mxu0 %v3127_v8  ;;  %3112 = vmatpush1.bf16.msra.mxu1 %v3127_v8  ;;  %v1716_v17 = vld [vmem:[%s6128_s0 + $0x20] sm:$0xff]  ;;  %v3131_v18 = vld [vmem:[%s6129_s3 + $0x54] ss:$8 sps:$4 sm:$0xff]   ;;  %v3133_v20 = vld [vmem:[%s6129_s3 + $0x50] ss:$8 sps:$4 sm:$0xff]  }
   0x6   :  { %v3549_v14 = vrot.slane %v708_v6, %v711_v9  ;;  %v3553_v15 = vrot.slane %v708_v6, %v715_v10  ;;  %1752 = vperm.xlu1 %3124, %v1714_v11   ;;  %377 = vmatprep.subr.bf16.mxu0 %v3128_v13  ;;  %v3134_v22 = vld [vmem:[%s6129_s3 + $0x44] ss:$8 sps:$4 sm:$0xff]   ;;  %v1719_v23 = vld [vmem:[%s6128_s0 + $0x38] sm:$0xff]  ;;  %v3136_v24 = vld [vmem:[%s6129_s3 + $0x40] ss:$8 sps:$4 sm:$0xff]  }
   0x7   :  { %1755 = vperm.xlu0 %3123, %v1715_v12   ;;  %3105 = vmatprep.subr.bf16.mxu1 %v3128_v13  ;;  %v1720_v25 = vld [vmem:[%s6128_s0 + $0x40] sm:$0xff]  ;;  %v3137_v26 = vld [vmem:[%s6129_s3 + $0x34] ss:$8 sps:$4 sm:$0xff]   ;;  %v1721_v27 = vld [vmem:[%s6128_s0 + $0x48] sm:$0xff] }
   0x8   :  { %6319 = vst [vmem:[#allocation7_spill] sm:$0xff] %v3549_v14  ;;  %6320 = vst [vmem:[#allocation8_spill] sm:$0xff] %v3553_v15  ;;  %v3139_v28 = vld [vmem:[%s6129_s3 + $0x30] ss:$8 sps:$4 sm:$0xff]   ;;  %v3140_v30 = vld [vmem:[%s6129_s3 + $0x24] ss:$8 sps:$4 sm:$0xff]  }
   0x9   :  { %378 = vmatpush1.bf16.msra.mxu0 %v3130_v16  ;;  %3113 = vmatpush1.bf16.msra.mxu1 %v3130_v16  ;;  %v1722_v29 = vld [vmem:[%s6128_s0 + $0x50] sm:$0xff]  ;;  %v1723_v31 = vld [vmem:[%s6128_s0 + $0x58] sm:$0xff]  ;;  %v3142_v32 = vld [vmem:[%s6129_s3 + $0x20] ss:$8 sps:$4 sm:$0xff]  }
   0xa   :  { %1758 = vperm.xlu1 %3124, %v1716_v17   ;;  %379 = vmatprep.subr.bf16.mxu0 %v3131_v18  ;;  %v1724_v33 = vld [vmem:[%s6128_s0 + $0x60] sm:$0xff]  ;;  %v3143_v34 = vld [vmem:[%s6129_s3 + $0x14] ss:$8 sps:$4 sm:$0xff]   ;;  %v1725_v35 = vld [vmem:[%s6128_s0 + $0x68] sm:$0xff]  ;;  %v3744_v17 = vadd.s32 8, %v3522_v4 }
   0xb   :  { %1761 = vperm.xlu0 %3123, %v1717_v19   ;;  %3106 = vmatprep.subr.bf16.mxu1 %v3131_v18  ;;  %v3145_v36 = vld [vmem:[%s6129_s3 + $0x10] ss:$8 sps:$4 sm:$0xff]   ;;  %v3146_v38 = vld [vmem:[%s6129_s3 + $0x4] ss:$8 sps:$4 sm:$0xff]   ;;  %v3148_v40 = vld [vmem:[%s6129_s3] ss:$8 sps:$4 sm:$0xff]  }
   0xc   :  { %v1726_v37 = vld [vmem:[%s6128_s0 + $0x70] sm:$0xff]  ;;  %v1727_v39 = vld [vmem:[%s6128_s0 + $0x78] sm:$0xff]  ;;  %v1728_v41 = vld [vmem:[%s6128_s0 + $0x80] sm:$0xff]  ;;  %6321 = vst [vmem:[#allocation9_spill] sm:$0xff] %v3744_v17  ;;  %v3747_v18 = vand.u32 127, %v569_v0 }
   0xd   :  { %380 = vmatpush1.bf16.msra.mxu0 %v3133_v20  ;;  %3114 = vmatpush1.bf16.msra.mxu1 %v3133_v20  ;;  %v1729_v42 = vld [vmem:[%s6128_s0 + $0x88] sm:$0xff]  ;;  %v3149_v43 = vld [vmem:[%s6130_s2] sm:$0xff]   ;;  %v1730_v45 = vld [vmem:[%s6128_s0 + $0x90] sm:$0xff] }
   0xe   :  { %1764 = vperm.xlu1 %3124, %v1718_v21   ;;  %381 = vmatprep.subr.bf16.mxu0 %v3134_v22  ;;  %v3150_v44 = vld [vmem:[%s6130_s2 + $0x40] sm:$0xff]   ;;  %v1731_v46 = vld [vmem:[%s6128_s0 + $0x98] sm:$0xff]  ;;  %v1733_v48 = vld [vmem:[%s6128_s0 + $0xa8] sm:$0xff]  ;;  %6322 = vst [vmem:[#allocation10_spill] sm:$0xff] %v3747_v18  ;;  %vm644_vm1 = vcmp.ne.s32.totalorder %v3744_v17, %v3747_v18  ;;  %vm642_vm2 = vcmp.ne.s32.totalorder %v3522_v4, %v3747_v18  ;;  %v3762_v21 = vadd.s32 16, %v3522_v4 }
   0xf   :  { %1767 = vperm.xlu0 %3123, %v1719_v23   ;;  %3107 = vmatprep.subr.bf16.mxu1 %v3134_v22  ;;  %v1732_v47 = vld [vmem:[%s6128_s0 + $0xa0] sm:$0xff]  ;;  %v3151_v49 = vld [vmem:[%s6130_s2 + $0x8] sm:$0xff]   ;;  %v1734_v51 = vld [vmem:[%s6128_s0 + $0xb0] sm:$0xff] }
  0x10   :  { %v3152_v50 = vld [vmem:[%s6130_s2 + $0x48] sm:$0xff]   ;;  %v1735_v52 = vld [vmem:[%s6128_s0 + $0xb8] sm:$0xff]  ;;  %v1736_v53 = vld [vmem:[%s6128_s0 + $0xc0] sm:$0xff]  ;;  %6323 = vst [vmem:[#allocation11_spill] sm:$0xff] %v3762_v21  ;;  %vm6158_vm9 = vcmp.ne.s32.totalorder %v3762_v21, %v3747_v18 }
  0x11   :  { %382 = vmatpush1.bf16.msra.mxu0 %v3136_v24  ;;  %3115 = vmatpush1.bf16.msra.mxu1 %v3136_v24  ;;  %v1737_v54 = vld [vmem:[%s6128_s0 + $0xc8] sm:$0xff]  ;;  %v3153_v55 = vld [vmem:[%s6130_s2 + $0x10] sm:$0xff]   ;;  %v1739_v58 = vld [vmem:[%s6128_s0 + $0xd8] sm:$0xff] }
  0x12   :  { %1770 = vperm.xlu1 %3124, %v1720_v25   ;;  %383 = vmatprep.subr.bf16.mxu0 %v3137_v26  ;;  %v3154_v56 = vld [vmem:[%s6130_s2 + $0x50] sm:$0xff]   ;;  %v1740_v59 = vld [vmem:[%s6128_s0 + $0xe0] sm:$0xff]  ;;  %v1741_v60 = vld [vmem:[%s6128_s0 + $0xe8] sm:$0xff] }
  0x13   :  { %1773 = vperm.xlu0 %3123, %v1721_v27   ;;  %3108 = vmatprep.subr.bf16.mxu1 %v3137_v26  ;;  %v1738_v57 = vld [vmem:[%s6128_s0 + $0xd0] sm:$0xff]  ;;  %v3155_v61 = vld [vmem:[%s6130_s2 + $0x18] sm:$0xff]   ;;  %v3157_v3 = vld [vmem:[%s6130_s2 + $0x20] sm:$0xff]   ;;  %v3794_v27 = vadd.s32 32, %v3522_v4 }
  0x14   :  { %v3156_v62 = vld [vmem:[%s6130_s2 + $0x58] sm:$0xff]   ;;  %v1742_v63 = vld [vmem:[%s6128_s0 + $0xf0] sm:$0xff]  ;;  %v3158_v5 = vld [vmem:[%s6130_s2 + $0x60] sm:$0xff]  }
  0x15   :  { %384 = vmatpush1.bf16.msra.mxu0 %v3139_v28  ;;  %3116 = vmatpush1.bf16.msra.mxu1 %v3139_v28  ;;  %v1743_v2 = vld [vmem:[%s6128_s0 + $0xf8] sm:$0xff]  ;;  %v3159_v6 = vld [vmem:[%s6130_s2 + $0x28] sm:$0xff]   ;;  %v3161_v8 = vld [vmem:[%s6130_s2 + $0x30] sm:$0xff]   ;;  %6325 = vst [vmem:[#allocation13_spill] sm:$0xff] %v3794_v27 }
  0x16   :  { %1776 = vperm.xlu1 %3124, %v1722_v29   ;;  %385 = vmatprep.subr.bf16.mxu0 %v3140_v30  ;;  %v3160_v7 = vld [vmem:[%s6130_s2 + $0x68] sm:$0xff]   ;;  %v3162_v11 = vld [vmem:[%s6130_s2 + $0x70] sm:$0xff]   ;;  %v3163_v12 = vld [vmem:[%s6130_s2 + $0x38] sm:$0xff]  }
  0x17   :  { %1779 = vperm.xlu0 %3123, %v1723_v31   ;;  %3109 = vmatprep.subr.bf16.mxu1 %v3140_v30  ;;  %v3164_v13 = vld [vmem:[%s6130_s2 + $0x78] sm:$0xff]   ;;  %v1744_v16 = vld [vmem:[%s6127_s1] sm:$0x3]  ;;  %v3801_v30 = vadd.s32 40, %v3522_v4 }
  0x18   :  { %v3755_v19 = vrot.slane %v1744_v16, %v715_v10  ;;  %v3486_v10 = vmov 0.0  }
  0x19   :  { %386 = vmatpush1.bf16.msra.mxu0 %v3142_v32  ;;  %3117 = vmatpush1.bf16.msra.mxu1 %v3142_v32  ;;  %6326 = vst [vmem:[#allocation14_spill] sm:$0xff] %v3801_v30 }
  0x1a   :  { %1782 = vperm.xlu1 %3124, %v1724_v33   ;;  %387 = vmatprep.subr.bf16.mxu0 %v3143_v34 }
  0x1b   :  { %1785 = vperm.xlu0 %3123, %v1725_v35   ;;  %3110 = vmatprep.subr.bf16.mxu1 %v3143_v34  ;;  %v3825_v35 = vadd.s32 48, %v3522_v4 }
  0x1d   :  { %388 = vmatpush1.bf16.msra.mxu0 %v3145_v36  ;;  %3118 = vmatpush1.bf16.msra.mxu1 %v3145_v36  ;;  %6327 = vst [vmem:[#allocation15_spill] sm:$0xff] %v3825_v35 }
  0x1e   :  { %1788 = vperm.xlu1 %3124, %v1726_v37   ;;  %389 = vmatprep.subr.bf16.mxu0 %v3146_v38 }
  0x1f   :  { %1791 = vperm.xlu0 %3123, %v1727_v39   ;;  %3111 = vmatprep.subr.bf16.mxu1 %v3146_v38  ;;  %v3835_v39 = vadd.s32 56, %v3522_v4 }
  0x21   :  { %390 = vmatpush1.bf16.msra.mxu0 %v3148_v40  ;;  %3119 = vmatpush1.bf16.msra.mxu1 %v3148_v40  ;;  %6328 = vst [vmem:[#allocation16_spill] sm:$0xff] %v3835_v39 }
  0x22   :  { %1794 = vperm.xlu1 %3124, %v1728_v41  }
  0x23   :  { %1797 = vperm.xlu0 %3123, %v1729_v42  }
  0x24   :  { %408 = vmatmul.mubr.bf16.vlgmr.msra.gmra.mxu0 %v3149_v43  ;;  %488 = vmatmul.mubr.bf16.vlgmr.msra.gmra.mxu1 %v3150_v44 }
  0x25   :  { %417 = vmatprep.mubr.bf16.mxu0 %v3485_v1  ;;  %497 = vmatprep.mubr.bf16.mxu1 %v3485_v1 }
  0x26   :  { %1800 = vperm.xlu1 %3124, %v1730_v45   ;;  %v3861_v45 = vadd.s32 64, %v3522_v4 }
  0x27   :  { %1803 = vperm.xlu0 %3123, %v1731_v46  }
  0x28   :  { %6329 = vst [vmem:[#allocation17_spill] sm:$0xff] %v3861_v45 }
  0x2a   :  { %1806 = vperm.xlu1 %3124, %v1732_v47  }
  0x2b   :  { %1809 = vperm.xlu0 %3123, %v1733_v48  }
  0x2c   :  { %418 = vmatmul.mubr.bf16.gmra.mxu0 %v3151_v49  ;;  %498 = vmatmul.mubr.bf16.gmra.mxu1 %v3152_v50  ;;  %v3871_v49 = vadd.s32 72, %v3522_v4 }
  0x2d   :  { %427 = vmatprep.mubr.bf16.mxu0 %v3485_v1  ;;  %507 = vmatprep.mubr.bf16.mxu1 %v3485_v1 }
  0x2e   :  { %1812 = vperm.xlu1 %3124, %v1734_v51   ;;  %6330 = vst [vmem:[#allocation18_spill] sm:$0xff] %v3871_v49 }
  0x2f   :  { %1815 = vperm.xlu0 %3123, %v1735_v52  }
  0x32   :  { %1818 = vperm.xlu1 %3124, %v1736_v53  }
  0x33   :  { %1821 = vperm.xlu0 %3123, %v1737_v54  }
  0x34   :  { %428 = vmatmul.mubr.bf16.gmra.mxu0 %v3153_v55  ;;  %508 = vmatmul.mubr.bf16.gmra.mxu1 %v3154_v56  ;;  %v3897_v55 = vadd.s32 80, %v3522_v4 }
  0x35   :  { %437 = vmatprep.mubr.bf16.mxu0 %v3485_v1  ;;  %517 = vmatprep.mubr.bf16.mxu1 %v3485_v1 }
  0x36   :  { %1824 = vperm.xlu1 %3124, %v1738_v57   ;;  %6331 = vst [vmem:[#allocation19_spill] sm:$0xff] %v3897_v55 }
  0x37   :  { %1827 = vperm.xlu0 %3123, %v1739_v58  }
  0x3a   :  { %1830 = vperm.xlu1 %3124, %v1740_v59   ;;  %v3907_v59 = vadd.s32 88, %v3522_v4 }
  0x3b   :  { %1833 = vperm.xlu0 %3123, %v1741_v60  }
  0x3c   :  { %438 = vmatmul.mubr.bf16.gmra.mxu0 %v3155_v61  ;;  %518 = vmatmul.mubr.bf16.gmra.mxu1 %v3156_v62  ;;  %6332 = vst [vmem:[#allocation20_spill] sm:$0xff] %v3907_v59 }
  0x3d   :  { %447 = vmatprep.mubr.bf16.mxu0 %v3485_v1  ;;  %527 = vmatprep.mubr.bf16.mxu1 %v3485_v1 }
  0x3e   :  { %1836 = vperm.xlu1 %3124, %v1742_v63  }
  0x3f   :  { %1839 = vperm.xlu0 %3123, %v1743_v2  }
  0x44   :  { %448 = vmatmul.mubr.bf16.gmra.mxu0 %v3157_v3  ;;  %528 = vmatmul.mubr.bf16.gmra.mxu1 %v3158_v5  ;;  %v4144_v5 = vadd.s32 96, %v3522_v4 }
  0x45   :  { %457 = vmatprep.mubr.bf16.mxu0 %v3485_v1  ;;  %537 = vmatprep.mubr.bf16.mxu1 %v3485_v1 }
  0x46   :  { %6335 = vst [vmem:[#allocation21_spill] sm:$0xff] %v4144_v5 }
  0x4c   :  { %458 = vmatmul.mubr.bf16.gmra.mxu0 %v3159_v6  ;;  %538 = vmatmul.mubr.bf16.gmra.mxu1 %v3160_v7 }
  0x4d   :  { %467 = vmatprep.mubr.bf16.mxu0 %v3485_v1  ;;  %547 = vmatprep.mubr.bf16.mxu1 %v3485_v1 }
  0x54   :  { %468 = vmatmul.mubr.bf16.gmra.mxu0 %v3161_v8  ;;  %548 = vmatmul.mubr.bf16.gmra.mxu1 %v3162_v11  ;;  %v4154_v11 = vadd.s32 104, %v3522_v4 }
  0x55   :  { %477 = vmatprep.mubr.bf16.mxu0 %v3485_v1  ;;  %557 = vmatprep.mubr.bf16.mxu1 %v3485_v1  ;;  %v3751_v1 = vrot.slane %v1744_v16, %v711_v9  ;;  %v3767_v9 = vadd.s32 24, %v3522_v4 }
  0x56   :  { %6336 = vst [vmem:[#allocation22_spill] sm:$0xff] %v4154_v11 }
  0x57   :  { %6324 = vst [vmem:[#allocation12_spill] sm:$0xff] %v3767_v9  ;;  %vm648_vm10 = vcmp.ne.s32.totalorder %v3767_v9, %v3747_v18 }
  0x5c   :  { %478 = vmatmul.mubr.bf16.gmra.mxu0 %v3163_v12  ;;  %558 = vmatmul.mubr.bf16.gmra.mxu1 %v3164_v13 }
  0x7d   :  { %v1750_v20 = vpop.permute.xlu1 %1749 }
  0x7e   :  { %vm1851_vm3 = vcmp.eq.s32.totalorder %v1750_v20, %v3751_v1  ;;  %v1747_v0 = vpop.permute.xlu0 %1746  ;;  %vm1852_vm4 = vcmp.eq.s32.totalorder %v1750_v20, %v3755_v19  ;;  %v4169_v20 = vadd.s32 112, %v3522_v4 }
  0x7f   :  { %vm1849_vm5 = vcmp.eq.s32.totalorder %v1747_v0, %v3751_v1  ;;  %vm1915_vm6 = vmand %vm1851_vm3, %vm644_vm1  ;;  %v3774_v22 = vsel %vm1852_vm4, 1.0, %v3486_v10  ;;  %vm1850_vm7 = vcmp.eq.s32.totalorder %v1747_v0, %v3755_v19  ;;  %vm6150_vm3 = vcmp.ne.s32.totalorder %v3794_v27, %v3747_v18 }
  0x80   :  { %v3778_v23 = vsel %vm1915_vm6, 1.0, %v3486_v10  ;;  %vm1913_vm8 = vmand %vm1849_vm5, %vm642_vm2  ;;  %v3784_v24 = vsel %vm1850_vm7, 1.0, %v3486_v10  ;;  %vm6149_vm4 = vcmp.ne.s32.totalorder %v3801_v30, %v3747_v18  ;;  %6337 = vst [vmem:[#allocation23_spill] sm:$0xff] %v4169_v20 }
  0x81   :  { %v2396_v25 = vadd.f32 %v3774_v22, %v3778_v23  ;;  %v3789_v26 = vsel %vm1913_vm8, 1.0, %v3486_v10  ;;  %v1753_v28 = vpop.permute.xlu1 %1752 }
  0x82   :  { %v2393_v29 = vadd.f32 %v3784_v24, %v3789_v26  ;;  %vm1853_vm11 = vcmp.eq.s32.totalorder %v1753_v28, %v3751_v1  ;;  %v1756_v31 = vpop.permute.xlu0 %1755  ;;  %vm1854_vm12 = vcmp.eq.s32.totalorder %v1753_v28, %v3755_v19 }
  0x83   :  { %2397 = vadd.xlane.f32.xlu1 %v2396_v25  ;;  %vm1855_vm13 = vcmp.eq.s32.totalorder %v1756_v31, %v3751_v1  ;;  %vm1917_vm14 = vmand %vm1853_vm11, %vm6158_vm9  ;;  %v3810_v32 = vsel %vm1854_vm12, 1.0, %v3486_v10  ;;  %vm1856_vm15 = vcmp.eq.s32.totalorder %v1756_v31, %v3755_v19 }
  0x84   :  { %2394 = vadd.xlane.f32.xlu0 %v2393_v29  ;;  %v3814_v33 = vsel %vm1917_vm14, 1.0, %v3486_v10  ;;  %vm1919_vm0 = vmand %vm1855_vm13, %vm648_vm10  ;;  %v3820_v34 = vsel %vm1856_vm15, 1.0, %v3486_v10  ;;  %vm6137_vm13 = vcmp.ne.s32.totalorder %v3825_v35, %v3747_v18  ;;  %vm6134_vm14 = vcmp.ne.s32.totalorder %v3835_v39, %v3747_v18 }
  0x85   :  { %v1759_v36 = vpop.permute.xlu1 %1758  ;;  %v2399_v37 = vadd.f32 %v3810_v32, %v3814_v33  ;;  %v3830_v38 = vsel %vm1919_vm0, 1.0, %v3486_v10  ;;  %v4337_v39 = vadd.s32 184, %v3522_v4 }
  0x86   :  { %vm1857_vm5 = vcmp.eq.s32.totalorder %v1759_v36, %v3751_v1  ;;  %v1762_v40 = vpop.permute.xlu0 %1761  ;;  %v2402_v41 = vadd.f32 %v3820_v34, %v3830_v38  ;;  %vm1858_vm6 = vcmp.eq.s32.totalorder %v1759_v36, %v3755_v19  ;;  %v4190_v36 = vadd.s32 120, %v3522_v4 }
  0x87   :  { %vm1859_vm7 = vcmp.eq.s32.totalorder %v1762_v40, %v3751_v1  ;;  %vm1921_vm8 = vmand %vm1857_vm5, %vm6150_vm3  ;;  %v3846_v42 = vsel %vm1858_vm6, 1.0, %v3486_v10  ;;  %vm1860_vm11 = vcmp.eq.s32.totalorder %v1762_v40, %v3755_v19  ;;  %6347 = vst [vmem:[#allocation33_spill] sm:$0xff] %v4337_v39 }
  0x88   :  { %2400 = vadd.xlane.f32.xlu0 %v2399_v37  ;;  %2403 = vadd.xlane.f32.xlu1 %v2402_v41  ;;  %v3850_v43 = vsel %vm1921_vm8, 1.0, %v3486_v10  ;;  %vm1923_vm12 = vmand %vm1859_vm7, %vm6149_vm4  ;;  %v3856_v44 = vsel %vm1860_vm11, 1.0, %v3486_v10  ;;  %vm6133_vm11 = vcmp.ne.s32.totalorder %v3861_v45, %v3747_v18  ;;  %6338 = vst [vmem:[#allocation24_spill] sm:$0xff] %v4190_v36 }
  0x89   :  { %v1765_v46 = vpop.permute.xlu1 %1764  ;;  %v2405_v47 = vadd.f32 %v3846_v42, %v3850_v43  ;;  %v3866_v48 = vsel %vm1923_vm12, 1.0, %v3486_v10  ;;  %vm6132_vm12 = vcmp.ne.s32.totalorder %v3871_v49, %v3747_v18 }
  0x8a   :  { %vm1861_vm15 = vcmp.eq.s32.totalorder %v1765_v46, %v3751_v1  ;;  %v1768_v50 = vpop.permute.xlu0 %1767  ;;  %v2408_v51 = vadd.f32 %v3856_v44, %v3866_v48  ;;  %vm1862_vm0 = vcmp.eq.s32.totalorder %v1765_v46, %v3755_v19 }
  0x8b   :  { %vm1863_vm5 = vcmp.eq.s32.totalorder %v1768_v50, %v3751_v1  ;;  %vm1925_vm6 = vmand %vm1861_vm15, %vm6137_vm13  ;;  %v3882_v52 = vsel %vm1862_vm0, 1.0, %v3486_v10  ;;  %vm1864_vm7 = vcmp.eq.s32.totalorder %v1768_v50, %v3755_v19  ;;  %v4216_v50 = vadd.s32 128, %v3522_v4 }
  0x8c   :  { %2406 = vadd.xlane.f32.xlu0 %v2405_v47  ;;  %2409 = vadd.xlane.f32.xlu1 %v2408_v51  ;;  %v3886_v53 = vsel %vm1925_vm6, 1.0, %v3486_v10  ;;  %vm1927_vm8 = vmand %vm1863_vm5, %vm6134_vm14  ;;  %v3892_v54 = vsel %vm1864_vm7, 1.0, %v3486_v10  ;;  %vm22_vm5 = vcmask 7168   ;;  %v4219_v51 = vadd.s32 128, %v3747_v18 }
  0x8d   :  { %v1771_v56 = vpop.permute.xlu1 %1770  ;;  %v2411_v57 = vadd.f32 %v3882_v52, %v3886_v53  ;;  %v3902_v58 = vsel %vm1927_vm8, 1.0, %v3486_v10  ;;  %120 = vst.msk [vmem:[#allocation5 + $0x8] sm:$0xff] %vm22_vm5, %v3486_v10  ;;  %55 = vst.msk [vmem:[#allocation3] sm:$0xff] %vm22_vm5, %v3486_v10 }
  0x8e   :  { %vm1865_vm15 = vcmp.eq.s32.totalorder %v1771_v56, %v3751_v1  ;;  %v3910_v60 = vpop.permute.xlu0 %1773  ;;  %v3914_v61 = vadd.f32 %v3892_v54, %v3902_v58  ;;  %vm1866_vm0 = vcmp.eq.s32.totalorder %v1771_v56, %v3755_v19  ;;  %56 = vst.msk [vmem:[#allocation3 + $0x8] sm:$0xff] %vm22_vm5, %v3486_v10  ;;  %57 = vst.msk [vmem:[#allocation3 + $0x10] sm:$0xff] %vm22_vm5, %v3486_v10 }
  0x8f   :  { %vm1867_vm6 = vcmp.eq.s32.totalorder %v3910_v60, %v3751_v1  ;;  %vm3922_vm7 = vmand %vm1865_vm15, %vm6133_vm11  ;;  %v3927_v63 = vsel %vm1866_vm0, 1.0, %v3486_v10  ;;  %vm1868_vm8 = vcmp.eq.s32.totalorder %v3910_v60, %v3755_v19  ;;  %58 = vst.msk [vmem:[#allocation3 + $0x18] sm:$0xff] %vm22_vm5, %v3486_v10  ;;  %vm6135_vm0 = vcmp.ne.s32.totalorder %v3897_v55, %v3747_v18 }
  0x90   :  { %2412 = vadd.xlane.f32.xlu0 %v2411_v57  ;;  %59 = vst.msk [vmem:[#allocation3 + $0x20] sm:$0xff] %vm22_vm5, %v3486_v10  ;;  %60 = vst.msk [vmem:[#allocation3 + $0x28] sm:$0xff] %vm22_vm5, %v3486_v10  ;;  %2415 = vadd.xlane.f32.xlu1 %v3914_v61  ;;  %v4127_v2 = vsel %vm3922_vm7, 1.0, %v3486_v10  ;;  %v4139_v3 = vsel %vm1868_vm8, 1.0, %v3486_v10  ;;  %v4229_v61 = vadd.s32 136, %v3522_v4 }
  0x91   :  { %61 = vst.msk [vmem:[#allocation3 + $0x30] sm:$0xff] %vm22_vm5, %v3486_v10  ;;  %62 = vst.msk [vmem:[#allocation3 + $0x38] sm:$0xff] %vm22_vm5, %v3486_v10  ;;  %v1777_v6 = vpop.permute.xlu1 %1776  ;;  %v2417_v7 = vadd.f32 %v3927_v63, %v4127_v2 }
  0x92   :  { %63 = vst.msk [vmem:[#allocation3 + $0x40] sm:$0xff] %vm22_vm5, %v3486_v10  ;;  %64 = vst.msk [vmem:[#allocation3 + $0x48] sm:$0xff] %vm22_vm5, %v3486_v10  ;;  %vm1869_vm7 = vcmp.eq.s32.totalorder %v1777_v6, %v3751_v1  ;;  %v1780_v12 = vpop.permute.xlu0 %1779  ;;  %vm1870_vm8 = vcmp.eq.s32.totalorder %v1777_v6, %v3755_v19 }
  0x93   :  { %65 = vst.msk [vmem:[#allocation3 + $0x50] sm:$0xff] %vm22_vm5, %v3486_v10  ;;  %66 = vst.msk [vmem:[#allocation3 + $0x58] sm:$0xff] %vm22_vm5, %v3486_v10  ;;  %v4165_v16 = vsel %vm1870_vm8, 1.0, %v3486_v10  ;;  %vm1872_vm11 = vcmp.eq.s32.totalorder %v1780_v12, %v3755_v19  ;;  %vm6139_vm8 = vcmp.ne.s32.totalorder %v4154_v11, %v3747_v18 }
  0x94   :  { %67 = vst.msk [vmem:[#allocation3 + $0x60] sm:$0xff] %vm22_vm5, %v3486_v10  ;;  %68 = vst.msk [vmem:[#allocation3 + $0x68] sm:$0xff] %vm22_vm5, %v3486_v10  ;;  %2418 = vadd.xlane.f32.xlu0 %v2417_v7  ;;  %v4178_v25 = vsel %vm1872_vm11, 1.0, %v3486_v10 }
  0x95   :  { %69 = vst.msk [vmem:[#allocation3 + $0x70] sm:$0xff] %vm22_vm5, %v3486_v10  ;;  %70 = vst.msk [vmem:[#allocation3 + $0x78] sm:$0xff] %vm22_vm5, %v3486_v10  ;;  %v1783_v28 = vpop.permute.xlu1 %1782 }
  0x96   :  { %71 = vst.msk [vmem:[#allocation3 + $0x80] sm:$0xff] %vm22_vm5, %v3486_v10  ;;  %72 = vst.msk [vmem:[#allocation3 + $0x88] sm:$0xff] %vm22_vm5, %v3486_v10  ;;  %v1786_v37 = vpop.permute.xlu0 %1785  ;;  %vm1874_vm11 = vcmp.eq.s32.totalorder %v1783_v28, %v3755_v19 }
  0x97   :  { %73 = vst.msk [vmem:[#allocation3 + $0x90] sm:$0xff] %vm22_vm5, %v3486_v10  ;;  %74 = vst.msk [vmem:[#allocation3 + $0x98] sm:$0xff] %vm22_vm5, %v3486_v10  ;;  %v4201_v41 = vsel %vm1874_vm11, 1.0, %v3486_v10 }
  0x98   :  { %75 = vst.msk [vmem:[#allocation3 + $0xa0] sm:$0xff] %vm22_vm5, %v3486_v10  ;;  %76 = vst.msk [vmem:[#allocation3 + $0xa8] sm:$0xff] %vm22_vm5, %v3486_v10 }
  0x99   :  { %77 = vst.msk [vmem:[#allocation3 + $0xb0] sm:$0xff] %vm22_vm5, %v3486_v10  ;;  %78 = vst.msk [vmem:[#allocation3 + $0xb8] sm:$0xff] %vm22_vm5, %v3486_v10  ;;  %v1789_v56 = vpop.permute.xlu1 %1788 }
  0x9a   :  { %79 = vst.msk [vmem:[#allocation3 + $0xc0] sm:$0xff] %vm22_vm5, %v3486_v10  ;;  %80 = vst.msk [vmem:[#allocation3 + $0xc8] sm:$0xff] %vm22_vm5, %v3486_v10  ;;  %v1792_v62 = vpop.permute.xlu0 %1791  ;;  %vm1878_vm11 = vcmp.eq.s32.totalorder %v1789_v56, %v3755_v19 }
  0x9b   :  { %81 = vst.msk [vmem:[#allocation3 + $0xd0] sm:$0xff] %vm22_vm5, %v3486_v10  ;;  %82 = vst.msk [vmem:[#allocation3 + $0xd8] sm:$0xff] %vm22_vm5, %v3486_v10  ;;  %v4240_v7 = vsel %vm1878_vm11, 1.0, %v3486_v10 }
  0x9c   :  { %83 = vst.msk [vmem:[#allocation3 + $0xe0] sm:$0xff] %vm22_vm5, %v3486_v10  ;;  %84 = vst.msk [vmem:[#allocation3 + $0xe8] sm:$0xff] %vm22_vm5, %v3486_v10 }
  0x9d   :  { %85 = vst.msk [vmem:[#allocation3 + $0xf0] sm:$0xff] %vm22_vm5, %v3486_v10  ;;  %86 = vst.msk [vmem:[#allocation3 + $0xf8] sm:$0xff] %vm22_vm5, %v3486_v10 }
  0x9e   :  { %87 = vst.msk [vmem:[#allocation4] sm:$0xff] %vm22_vm5, %v3486_v10  ;;  %88 = vst.msk [vmem:[#allocation4 + $0x8] sm:$0xff] %vm22_vm5, %v3486_v10 }
  0x9f   :  { %89 = vst.msk [vmem:[#allocation4 + $0x10] sm:$0xff] %vm22_vm5, %v3486_v10  ;;  %90 = vst.msk [vmem:[#allocation4 + $0x18] sm:$0xff] %vm22_vm5, %v3486_v10 }
  0xa0   :  { %91 = vst.msk [vmem:[#allocation4 + $0x20] sm:$0xff] %vm22_vm5, %v3486_v10  ;;  %92 = vst.msk [vmem:[#allocation4 + $0x28] sm:$0xff] %vm22_vm5, %v3486_v10 }
  0xa1   :  { %93 = vst.msk [vmem:[#allocation4 + $0x30] sm:$0xff] %vm22_vm5, %v3486_v10  ;;  %94 = vst.msk [vmem:[#allocation4 + $0x38] sm:$0xff] %vm22_vm5, %v3486_v10 }
  0xa2   :  { %95 = vst.msk [vmem:[#allocation4 + $0x40] sm:$0xff] %vm22_vm5, %v3486_v10  ;;  %96 = vst.msk [vmem:[#allocation4 + $0x48] sm:$0xff] %vm22_vm5, %v3486_v10 }
  0xa3   :  { %97 = vst.msk [vmem:[#allocation4 + $0x50] sm:$0xff] %vm22_vm5, %v3486_v10  ;;  %98 = vst.msk [vmem:[#allocation4 + $0x58] sm:$0xff] %vm22_vm5, %v3486_v10 }
  0xa4   :  { %99 = vst.msk [vmem:[#allocation4 + $0x60] sm:$0xff] %vm22_vm5, %v3486_v10  ;;  %100 = vst.msk [vmem:[#allocation4 + $0x68] sm:$0xff] %vm22_vm5, %v3486_v10 }
  0xa5   :  { %101 = vst.msk [vmem:[#allocation4 + $0x70] sm:$0xff] %vm22_vm5, %v3486_v10  ;;  %102 = vst.msk [vmem:[#allocation4 + $0x78] sm:$0xff] %vm22_vm5, %v3486_v10 }
  0xa6   :  { %103 = vst.msk [vmem:[#allocation4 + $0x80] sm:$0xff] %vm22_vm5, %v3486_v10  ;;  %104 = vst.msk [vmem:[#allocation4 + $0x88] sm:$0xff] %vm22_vm5, %v3486_v10 }
  0xa7   :  { %105 = vst.msk [vmem:[#allocation4 + $0x90] sm:$0xff] %vm22_vm5, %v3486_v10  ;;  %106 = vst.msk [vmem:[#allocation4 + $0x98] sm:$0xff] %vm22_vm5, %v3486_v10 }
  0xa8   :  { %107 = vst.msk [vmem:[#allocation4 + $0xa0] sm:$0xff] %vm22_vm5, %v3486_v10  ;;  %108 = vst.msk [vmem:[#allocation4 + $0xa8] sm:$0xff] %vm22_vm5, %v3486_v10 }
  0xa9   :  { %109 = vst.msk [vmem:[#allocation4 + $0xb0] sm:$0xff] %vm22_vm5, %v3486_v10  ;;  %110 = vst.msk [vmem:[#allocation4 + $0xb8] sm:$0xff] %vm22_vm5, %v3486_v10 }
  0xaa   :  { %111 = vst.msk [vmem:[#allocation4 + $0xc0] sm:$0xff] %vm22_vm5, %v3486_v10  ;;  %112 = vst.msk [vmem:[#allocation4 + $0xc8] sm:$0xff] %vm22_vm5, %v3486_v10 }
  0xab   :  { %113 = vst.msk [vmem:[#allocation4 + $0xd0] sm:$0xff] %vm22_vm5, %v3486_v10  ;;  %114 = vst.msk [vmem:[#allocation4 + $0xd8] sm:$0xff] %vm22_vm5, %v3486_v10 }
  0xac   :  { %115 = vst.msk [vmem:[#allocation4 + $0xe0] sm:$0xff] %vm22_vm5, %v3486_v10  ;;  %116 = vst.msk [vmem:[#allocation4 + $0xe8] sm:$0xff] %vm22_vm5, %v3486_v10 }
  0xad   :  { %117 = vst.msk [vmem:[#allocation4 + $0xf0] sm:$0xff] %vm22_vm5, %v3486_v10  ;;  %118 = vst.msk [vmem:[#allocation4 + $0xf8] sm:$0xff] %vm22_vm5, %v3486_v10 }
  0xae   :  { %119 = vst.msk [vmem:[#allocation5] sm:$0xff] %vm22_vm5, %v3486_v10  ;;  %121 = vst.msk [vmem:[#allocation5 + $0x10] sm:$0xff] %vm22_vm5, %v3486_v10 }
  0xaf   :  { %122 = vst.msk [vmem:[#allocation5 + $0x18] sm:$0xff] %vm22_vm5, %v3486_v10  ;;  %123 = vst.msk [vmem:[#allocation5 + $0x20] sm:$0xff] %vm22_vm5, %v3486_v10 }
  0xb0   :  { %124 = vst.msk [vmem:[#allocation5 + $0x28] sm:$0xff] %vm22_vm5, %v3486_v10  ;;  %125 = vst.msk [vmem:[#allocation5 + $0x30] sm:$0xff] %vm22_vm5, %v3486_v10 }
  0xb1   :  { %126 = vst.msk [vmem:[#allocation5 + $0x38] sm:$0xff] %vm22_vm5, %v3486_v10  ;;  %127 = vst.msk [vmem:[#allocation5 + $0x40] sm:$0xff] %vm22_vm5, %v3486_v10 }
  0xb2   :  { %128 = vst.msk [vmem:[#allocation5 + $0x48] sm:$0xff] %vm22_vm5, %v3486_v10  ;;  %129 = vst.msk [vmem:[#allocation5 + $0x50] sm:$0xff] %vm22_vm5, %v3486_v10 }
  0xb3   :  { %130 = vst.msk [vmem:[#allocation5 + $0x58] sm:$0xff] %vm22_vm5, %v3486_v10  ;;  %131 = vst.msk [vmem:[#allocation5 + $0x60] sm:$0xff] %vm22_vm5, %v3486_v10 }
  0xb4   :  { %132 = vst.msk [vmem:[#allocation5 + $0x68] sm:$0xff] %vm22_vm5, %v3486_v10  ;;  %133 = vst.msk [vmem:[#allocation5 + $0x70] sm:$0xff] %vm22_vm5, %v3486_v10 }
  0xb5   :  { %134 = vst.msk [vmem:[#allocation5 + $0x78] sm:$0xff] %vm22_vm5, %v3486_v10  ;;  %135 = vst.msk [vmem:[#allocation5 + $0x80] sm:$0xff] %vm22_vm5, %v3486_v10 }
  0xb6   :  { %136 = vst.msk [vmem:[#allocation5 + $0x88] sm:$0xff] %vm22_vm5, %v3486_v10  ;;  %137 = vst.msk [vmem:[#allocation5 + $0x90] sm:$0xff] %vm22_vm5, %v3486_v10 }
  0xb7   :  { %138 = vst.msk [vmem:[#allocation5 + $0x98] sm:$0xff] %vm22_vm5, %v3486_v10  ;;  %139 = vst.msk [vmem:[#allocation5 + $0xa0] sm:$0xff] %vm22_vm5, %v3486_v10 }
  0xb8   :  { %140 = vst.msk [vmem:[#allocation5 + $0xa8] sm:$0xff] %vm22_vm5, %v3486_v10  ;;  %141 = vst.msk [vmem:[#allocation5 + $0xb0] sm:$0xff] %vm22_vm5, %v3486_v10 }
  0xb9   :  { %142 = vst.msk [vmem:[#allocation5 + $0xb8] sm:$0xff] %vm22_vm5, %v3486_v10  ;;  %143 = vst.msk [vmem:[#allocation5 + $0xc0] sm:$0xff] %vm22_vm5, %v3486_v10 }
  0xba   :  { %144 = vst.msk [vmem:[#allocation5 + $0xc8] sm:$0xff] %vm22_vm5, %v3486_v10  ;;  %145 = vst.msk [vmem:[#allocation5 + $0xd0] sm:$0xff] %vm22_vm5, %v3486_v10 }
  0xbb   :  { %146 = vst.msk [vmem:[#allocation5 + $0xd8] sm:$0xff] %vm22_vm5, %v3486_v10  ;;  %147 = vst.msk [vmem:[#allocation5 + $0xe0] sm:$0xff] %vm22_vm5, %v3486_v10 }
  0xbc   :  { %148 = vst.msk [vmem:[#allocation5 + $0xe8] sm:$0xff] %vm22_vm5, %v3486_v10  ;;  %149 = vst.msk [vmem:[#allocation5 + $0xf0] sm:$0xff] %vm22_vm5, %v3486_v10 }
  0xbd   :  { %150 = vst.msk [vmem:[#allocation5 + $0xf8] sm:$0xff] %vm22_vm5, %v3486_v10  ;;  %vm1931_vm15 = vmand %vm1867_vm6, %vm6132_vm12  ;;  %vm6136_vm6 = vcmp.ne.s32.totalorder %v3907_v59, %v3747_v18  ;;  %vm1871_vm12 = vcmp.eq.s32.totalorder %v1780_v12, %v3751_v1 }
  0xbe   :  { %v4149_v8 = vsel %vm1931_vm15, 1.0, %v3486_v10  ;;  %vm1933_vm15 = vmand %vm1869_vm7, %vm6135_vm0  ;;  %vm6138_vm7 = vcmp.ne.s32.totalorder %v4144_v5, %v3747_v18  ;;  %vm1876_vm0 = vcmp.eq.s32.totalorder %v1786_v37, %v3755_v19  ;;  %6339 = vst [vmem:[#allocation25_spill] sm:$0xff] %v4216_v50  ;;  %v4301_v5 = vadd.s32 168, %v3522_v4 }
  0xbf   :  { %v2420_v13 = vadd.f32 %v4139_v3, %v4149_v8  ;;  %v4172_v0 = vsel %vm1933_vm15, 1.0, %v3486_v10  ;;  %vm1935_vm14 = vmand %vm1871_vm12, %vm6136_vm6  ;;  %vm1873_vm12 = vcmp.eq.s32.totalorder %v1783_v28, %v3751_v1  ;;  %vm1875_vm15 = vcmp.eq.s32.totalorder %v1786_v37, %v3751_v1  ;;  %6340 = vst [vmem:[#allocation26_spill] sm:$0xff] %v4219_v51 }
  0xc0   :  { %v2423_v29 = vadd.f32 %v4165_v16, %v4172_v0  ;;  %v4185_v31 = vsel %vm1935_vm14, 1.0, %v3486_v10  ;;  %vm1937_vm14 = vmand %vm1873_vm12, %vm6138_vm7  ;;  %vm6142_vm6 = vcmp.ne.s32.totalorder %v4169_v20, %v3747_v18  ;;  %v4213_v47 = vsel %vm1876_vm0, 1.0, %v3486_v10  ;;  %6341 = vst [vmem:[#allocation27_spill] sm:$0xff] %v4229_v61 }
  0xc1   :  { %2421 = vadd.xlane.f32.xlu1 %v2420_v13  ;;  %v2426_v40 = vadd.f32 %v4178_v25, %v4185_v31  ;;  %v4207_v46 = vsel %vm1937_vm14, 1.0, %v3486_v10  ;;  %vm1939_vm13 = vmand %vm1875_vm15, %vm6139_vm8  ;;  %vm6141_vm12 = vcmp.ne.s32.totalorder %v4190_v36, %v3747_v18  ;;  %vm1877_vm0 = vcmp.eq.s32.totalorder %v1789_v56, %v3751_v1  ;;  %6345 = vst [vmem:[#allocation31_spill] sm:$0xff] %v4301_v5 }
  0xc2   :  { %2424 = vadd.xlane.f32.xlu0 %v2423_v29  ;;  %v2429_v57 = vadd.f32 %v4201_v41, %v4207_v46  ;;  %v4224_v60 = vsel %vm1939_vm13, 1.0, %v3486_v10  ;;  %vm1879_vm15 = vcmp.eq.s32.totalorder %v1792_v62, %v3751_v1  ;;  %vm1941_vm13 = vmand %vm1877_vm0, %vm6142_vm6  ;;  %vm1880_vm14 = vcmp.eq.s32.totalorder %v1792_v62, %v3755_v19  ;;  %v1795_v29 = vpop.permute.xlu1 %1794 }
  0xc3   :  { %v2432_v6 = vadd.f32 %v4213_v47, %v4224_v60  ;;  %v4244_v12 = vsel %vm1941_vm13, 1.0, %v3486_v10  ;;  %vm1943_vm7 = vmand %vm1879_vm15, %vm6141_vm12  ;;  %v4250_v13 = vsel %vm1880_vm14, 1.0, %v3486_v10  ;;  %vm675_vm8 = vcmp.ne.s32.totalorder %v4216_v50, %v4219_v51 }
  0xc4   :  { %v4255_v28 = vadd.s32 144, %v3522_v4  ;;  %v2435_v37 = vadd.f32 %v4240_v7, %v4244_v12  ;;  %vm677_vm0 = vcmp.ne.s32.totalorder %v4229_v61, %v4219_v51  ;;  %v4265_v56 = vadd.s32 152, %v3522_v4 }
  0xc5   :  { %2427 = vadd.xlane.f32.xlu1 %v2426_v40  ;;  %v4260_v40 = vsel %vm1943_vm7, 1.0, %v3486_v10  ;;  %vm1882_vm11 = vcmp.eq.s32.totalorder %v1795_v29, %v3755_v19  ;;  %vm1881_vm15 = vcmp.eq.s32.totalorder %v1795_v29, %v3751_v1 }
  0xc6   :  { %2430 = vadd.xlane.f32.xlu0 %v2429_v57  ;;  %6342 = vst [vmem:[#allocation28_spill] sm:$0xff] %v4255_v28  ;;  %6343 = vst [vmem:[#allocation29_spill] sm:$0xff] %v4265_v56  ;;  %v1798_v57 = vpop.permute.xlu0 %1797  ;;  %v2438_v62 = vadd.f32 %v4250_v13, %v4260_v40  ;;  %vm6157_vm6 = vcmp.ne.s32.totalorder %v4255_v28, %v4219_v51  ;;  %v1801_v20 = vpop.permute.xlu1 %1800 }
  0xc7   :  { %vm1884_vm13 = vcmp.eq.s32.totalorder %v1798_v57, %v3755_v19  ;;  %vm1946_vm7 = vmand %vm1882_vm11, %vm675_vm8  ;;  %vm1883_vm14 = vcmp.eq.s32.totalorder %v1798_v57, %v3751_v1  ;;  %vm681_vm11 = vcmp.ne.s32.totalorder %v4265_v56, %v4219_v51 }
  0xc8   :  { %v4280_v36 = vsel %vm1946_vm7, 1.0, %v3486_v10  ;;  %vm1948_vm12 = vmand %vm1884_vm13, %vm677_vm0  ;;  %v4286_v29 = vsel %vm1883_vm14, 1.0, %v3486_v10  ;;  %vm1885_vm13 = vcmp.eq.s32.totalorder %v1801_v20, %v3751_v1 }
  0xc9   :  { %2433 = vadd.xlane.f32.xlu1 %v2432_v6  ;;  %v4276_v6 = vsel %vm1881_vm15, 1.0, %v3486_v10  ;;  %vm1886_vm15 = vcmp.eq.s32.totalorder %v1801_v20, %v3755_v19  ;;  %v4312_v59 = vsel %vm1885_vm13, 1.0, %v3486_v10 }
  0xca   :  { %2436 = vadd.xlane.f32.xlu0 %v2435_v37  ;;  %v4291_v37 = vadd.s32 160, %v3522_v4  ;;  %v2441_v57 = vadd.f32 %v4280_v36, %v4276_v6  ;;  %v1804_v11 = vpop.permute.xlu0 %1803  ;;  %v1807_v45 = vpop.permute.xlu1 %1806 }
  0xcb   :  { %vm1888_vm7 = vcmp.eq.s32.totalorder %v1804_v11, %v3755_v19  ;;  %vm1887_vm14 = vcmp.eq.s32.totalorder %v1804_v11, %v3751_v1  ;;  %vm1890_vm13 = vcmp.eq.s32.totalorder %v1807_v45, %v3755_v19 }
  0xcc   :  { %6344 = vst [vmem:[#allocation30_spill] sm:$0xff] %v4291_v37  ;;  %vm1952_vm4 = vmand %vm1888_vm7, %vm681_vm11  ;;  %v4322_v20 = vsel %vm1887_vm14, 1.0, %v3486_v10  ;;  %vm6166_vm3 = vcmp.ne.s32.totalorder %v4291_v37, %v4219_v51  ;;  %vm1889_vm7 = vcmp.eq.s32.totalorder %v1807_v45, %v3751_v1 }
  0xcd   :  { %2439 = vadd.xlane.f32.xlu1 %v2438_v62  ;;  %v4296_v62 = vsel %vm1948_vm12, 1.0, %v3486_v10  ;;  %vm1950_vm12 = vmand %vm1886_vm15, %vm6157_vm6  ;;  %v4332_v11 = vsel %vm1952_vm4, 1.0, %v3486_v10  ;;  %vm6165_vm15 = vcmp.ne.s32.totalorder %v4301_v5, %v4219_v51  ;;  %v4348_v27 = vsel %vm1889_vm7, 1.0, %v3486_v10 }
  0xce   :  { %v2444_v55 = vadd.f32 %v4296_v62, %v4286_v29  ;;  %2442 = vadd.xlane.f32.xlu0 %v2441_v57  ;;  %v4316_v49 = vsel %vm1950_vm12, 1.0, %v3486_v10  ;;  %v4327_v57 = vadd.s32 176, %v3522_v4  ;;  %v1810_v35 = vpop.permute.xlu0 %1809  ;;  %v2450_v30 = vadd.f32 %v4332_v11, %v4322_v20  ;;  %vm1954_vm4 = vmand %vm1890_vm13, %vm6166_vm3  ;;  %v1813_v37 = vpop.permute.xlu1 %1812 }
  0xcf   :  { %vm1892_vm12 = vcmp.eq.s32.totalorder %v1810_v35, %v3755_v19  ;;  %vm1891_vm14 = vcmp.eq.s32.totalorder %v1810_v35, %v3751_v1  ;;  %v4352_v28 = vsel %vm1954_vm4, 1.0, %v3486_v10  ;;  %vm6173_vm13 = vcmp.ne.s32.totalorder %v4337_v39, %v4219_v51 }
  0xd0   :  { %6346 = vst [vmem:[#allocation32_spill] sm:$0xff] %v4327_v57  ;;  %vm1956_vm6 = vmand %vm1892_vm12, %vm6165_vm15  ;;  %v4358_v45 = vsel %vm1891_vm14, 1.0, %v3486_v10  ;;  %vm6174_vm9 = vcmp.ne.s32.totalorder %v4327_v57, %v4219_v51  ;;  %v4373_v5 = vadd.s32 200, %v3522_v4  ;;  %vm1894_vm7 = vcmp.eq.s32.totalorder %v1813_v37, %v3755_v19 }
  0xd1   :  { %2445 = vadd.xlane.f32.xlu1 %v2444_v55  ;;  %v2447_v55 = vadd.f32 %v4316_v49, %v4312_v59  ;;  %6348 = vst [vmem:[#allocation34_spill] sm:$0xff] %v4358_v45  ;;  %v4368_v35 = vsel %vm1956_vm6, 1.0, %v3486_v10  ;;  %vm1893_vm12 = vcmp.eq.s32.totalorder %v1813_v37, %v3751_v1  ;;  %vm1958_vm6 = vmand %vm1894_vm7, %vm6174_vm9  ;;  %v4409_v39 = vadd.s32 216, %v3522_v4 }
  0xd2   :  { %6350 = vst [vmem:[#allocation36_spill] sm:$0xff] %v4368_v35  ;;  %6351 = vst [vmem:[#allocation37_spill] sm:$0xff] %v4373_v5  ;;  %v1816_v21 = vpop.permute.xlu0 %1815  ;;  %v2456_v56 = vadd.f32 %v4368_v35, %v4358_v45  ;;  %v4384_v17 = vsel %vm1893_vm12, 1.0, %v3486_v10  ;;  %v4388_v9 = vsel %vm1958_vm6, 1.0, %v3486_v10  ;;  %v1819_v57 = vpop.permute.xlu1 %1818  ;;  %vm6181_vm7 = vcmp.ne.s32.totalorder %v4373_v5, %v4219_v51 }
  0xd3   :  { %2448 = vadd.xlane.f32.xlu0 %v2447_v55  ;;  %v4363_v55 = vadd.s32 192, %v3522_v4  ;;  %vm1896_vm4 = vcmp.eq.s32.totalorder %v1816_v21, %v3755_v19  ;;  %6352 = vst [vmem:[#allocation38_spill] sm:$0xff] %v4384_v17  ;;  %vm1895_vm14 = vcmp.eq.s32.totalorder %v1816_v21, %v3751_v1  ;;  %6353 = vst [vmem:[#allocation39_spill] sm:$0xff] %v4388_v9 }
  0xd4   :  { %vm1960_vm15 = vmand %vm1896_vm4, %vm6173_vm13  ;;  %v4394_v37 = vsel %vm1895_vm14, 1.0, %v3486_v10  ;;  %v2459_v21 = vadd.f32 %v4388_v9, %v4384_v17  ;;  %6357 = vst [vmem:[#allocation43_spill] sm:$0xff] %v4409_v39  ;;  %vm1898_vm12 = vcmp.eq.s32.totalorder %v1819_v57, %v3755_v19  ;;  %vm1897_vm4 = vcmp.eq.s32.totalorder %v1819_v57, %v3751_v1 }
  0xd5   :  { %2451 = vadd.xlane.f32.xlu1 %v2450_v30  ;;  %6349 = vst [vmem:[#allocation35_spill] sm:$0xff] %v4363_v55  ;;  %v2453_v30 = vadd.f32 %v4352_v28, %v4348_v27  ;;  %6354 = vst [vmem:[#allocation40_spill] sm:$0xff] %v4394_v37  ;;  %vm6182_vm3 = vcmp.ne.s32.totalorder %v4363_v55, %v4219_v51  ;;  %v4420_v17 = vsel %vm1897_vm4, 1.0, %v3486_v10 }
  0xd6   :  { %v1822_v50 = vpop.permute.xlu0 %1821  ;;  %6358 = vst [vmem:[#allocation44_spill] sm:$0xff] %v4420_v17 }
  0xd7   :  { %2454 = vadd.xlane.f32.xlu0 %v2453_v30  ;;  %v4399_v30 = vadd.s32 208, %v3522_v4  ;;  %vm1900_vm6 = vcmp.eq.s32.totalorder %v1822_v50, %v3755_v19  ;;  %vm1899_vm14 = vcmp.eq.s32.totalorder %v1822_v50, %v3751_v1 }
  0xd8   :  { %vm1964_vm13 = vmand %vm1900_vm6, %vm6181_vm7  ;;  %v4430_v57 = vsel %vm1899_vm14, 1.0, %v3486_v10 }
  0xd9   :  { %2457 = vadd.xlane.f32.xlu1 %v2456_v56  ;;  %6355 = vst [vmem:[#allocation41_spill] sm:$0xff] %v4399_v30  ;;  %v4404_v56 = vsel %vm1960_vm15, 1.0, %v3486_v10  ;;  %vm1962_vm15 = vmand %vm1898_vm12, %vm6182_vm3  ;;  %vm6189_vm9 = vcmp.ne.s32.totalorder %v4399_v30, %v4219_v51  ;;  %vm6190_vm12 = vcmp.ne.s32.totalorder %v4409_v39, %v4219_v51 }
  0xda   :  { %6356 = vst [vmem:[#allocation42_spill] sm:$0xff] %v4404_v56  ;;  %v2462_v61 = vadd.f32 %v4404_v56, %v4394_v37  ;;  %v4424_v9 = vsel %vm1962_vm15, 1.0, %v3486_v10  ;;  %6360 = vst [vmem:[#allocation46_spill] sm:$0xff] %v4430_v57  ;;  %v1825_v37 = vpop.permute.xlu1 %1824  ;;  %v4445_v56 = vadd.s32 232, %v3522_v4  ;;  %v1828_v5 = vpop.permute.xlu0 %1827 }
  0xdb   :  { %2460 = vadd.xlane.f32.xlu0 %v2459_v21  ;;  %6359 = vst [vmem:[#allocation45_spill] sm:$0xff] %v4424_v9  ;;  %v4435_v21 = vadd.s32 224, %v3522_v4  ;;  %v2465_v50 = vadd.f32 %v4424_v9, %v4420_v17  ;;  %vm1902_vm4 = vcmp.eq.s32.totalorder %v1825_v37, %v3755_v19  ;;  %vm1901_vm6 = vcmp.eq.s32.totalorder %v1825_v37, %v3751_v1 }
  0xdc   :  { %6363 = vst [vmem:[#allocation49_spill] sm:$0xff] %v4445_v56  ;;  %vm1904_vm15 = vcmp.eq.s32.totalorder %v1828_v5, %v3755_v19  ;;  %v4456_v17 = vsel %vm1901_vm6, 1.0, %v3486_v10  ;;  %vm1903_vm14 = vcmp.eq.s32.totalorder %v1828_v5, %v3751_v1 }
  0xdd   :  { %2463 = vadd.xlane.f32.xlu1 %v2462_v61  ;;  %6361 = vst [vmem:[#allocation47_spill] sm:$0xff] %v4435_v21  ;;  %v4440_v61 = vsel %vm1964_vm13, 1.0, %v3486_v10  ;;  %vm1966_vm13 = vmand %vm1902_vm4, %vm6189_vm9  ;;  %v4466_v37 = vsel %vm1903_vm14, 1.0, %v3486_v10  ;;  %vm6195_vm3 = vcmp.ne.s32.totalorder %v4435_v21, %v4219_v51  ;;  %vm701_vm4 = vcmp.ne.s32.totalorder %v4445_v56, %v4219_v51 }
  0xde   :  { %6362 = vst [vmem:[#allocation48_spill] sm:$0xff] %v4440_v61  ;;  %v2468_v55 = vadd.f32 %v4440_v61, %v4430_v57  ;;  %6364 = vst [vmem:[#allocation50_spill] sm:$0xff] %v4456_v17  ;;  %v4460_v9 = vsel %vm1966_vm13, 1.0, %v3486_v10  ;;  %v1831_v57 = vpop.permute.xlu1 %1830  ;;  %v4481_v61 = vadd.s32 248, %v3522_v4  ;;  %v1834_v30 = vpop.permute.xlu0 %1833 }
  0xdf   :  { %2466 = vadd.xlane.f32.xlu0 %v2465_v50  ;;  %6365 = vst [vmem:[#allocation51_spill] sm:$0xff] %v4460_v9  ;;  %vm1968_vm7 = vmand %vm1904_vm15, %vm6190_vm12  ;;  %v4471_v50 = vadd.s32 240, %v3522_v4  ;;  %v2471_v5 = vadd.f32 %v4460_v9, %v4456_v17  ;;  %vm1906_vm6 = vcmp.eq.s32.totalorder %v1831_v57, %v3755_v19  ;;  %vm1905_vm15 = vcmp.eq.s32.totalorder %v1831_v57, %v3751_v1 }
  0xe0   :  { %6366 = vst [vmem:[#allocation52_spill] sm:$0xff] %v4466_v37  ;;  %6369 = vst [vmem:[#allocation55_spill] sm:$0xff] %v4481_v61  ;;  %vm1908_vm13 = vcmp.eq.s32.totalorder %v1834_v30, %v3755_v19  ;;  %v4492_v17 = vsel %vm1905_vm15, 1.0, %v3486_v10  ;;  %vm1907_vm14 = vcmp.eq.s32.totalorder %v1834_v30, %v3751_v1 }
  0xe1   :  { %2469 = vadd.xlane.f32.xlu1 %v2468_v55  ;;  %6367 = vst [vmem:[#allocation53_spill] sm:$0xff] %v4471_v50  ;;  %v4476_v55 = vsel %vm1968_vm7, 1.0, %v3486_v10  ;;  %vm1970_vm7 = vmand %vm1906_vm6, %vm6195_vm3  ;;  %v4502_v57 = vsel %vm1907_vm14, 1.0, %v3486_v10  ;;  %vm703_vm12 = vcmp.ne.s32.totalorder %v4471_v50, %v4219_v51  ;;  %vm705_vm6 = vcmp.ne.s32.totalorder %v4481_v61, %v4219_v51 }
  0xe2   :  { %6368 = vst [vmem:[#allocation54_spill] sm:$0xff] %v4476_v55  ;;  %v2474_v39 = vadd.f32 %v4476_v55, %v4466_v37  ;;  %6370 = vst [vmem:[#allocation56_spill] sm:$0xff] %v4492_v17  ;;  %v4496_v9 = vsel %vm1970_vm7, 1.0, %v3486_v10 }
  0xe3   :  { %2472 = vadd.xlane.f32.xlu0 %v2471_v5  ;;  %6371 = vst [vmem:[#allocation57_spill] sm:$0xff] %v4496_v9  ;;  %vm1972_vm9 = vmand %vm1908_vm13, %vm701_vm4  ;;  %v1837_v5 = vpop.permute.xlu1 %1836  ;;  %v2477_v37 = vadd.f32 %v4496_v9, %v4492_v17 }
  0xe4   :  { %6372 = vst [vmem:[#allocation58_spill] sm:$0xff] %v4502_v57  ;;  %v4509_v30 = vsel %vm1972_vm9, 1.0, %v3486_v10  ;;  %vm1910_vm15 = vcmp.eq.s32.totalorder %v1837_v5, %v3755_v19  ;;  %vm1909_vm13 = vcmp.eq.s32.totalorder %v1837_v5, %v3751_v1 }
  0xe5   :  { %2475 = vadd.xlane.f32.xlu1 %v2474_v39  ;;  %6373 = vst [vmem:[#allocation59_spill] sm:$0xff] %v4509_v30  ;;  %v1840_v39 = vpop.permute.xlu0 %1839  ;;  %v2480_v55 = vadd.f32 %v4509_v30, %v4502_v57  ;;  %vm1974_vm14 = vmand %vm1910_vm15, %vm703_vm12  ;;  %v4522_v17 = vsel %vm1909_vm13, 1.0, %v3486_v10 }
  0xe6   :  { %vm1912_vm7 = vcmp.eq.s32.totalorder %v1840_v39, %v3755_v19  ;;  %6374 = vst [vmem:[#allocation60_spill] sm:$0xff] %v4522_v17  ;;  %vm1911_vm9 = vcmp.eq.s32.totalorder %v1840_v39, %v3751_v1  ;;  %v4526_v9 = vsel %vm1974_vm14, 1.0, %v3486_v10  ;;  %v4575_v39 = vpop.f32.mrf.mxu1 }
  0xe7   :  { %2478 = vadd.xlane.f32.xlu0 %v2477_v37  ;;  %6375 = vst [vmem:[#allocation61_spill] sm:$0xff] %v4526_v9  ;;  %vm1976_vm3 = vmand %vm1912_vm7, %vm705_vm6  ;;  %v4532_v19 = vsel %vm1911_vm9, 1.0, %v3486_v10  ;;  %v2483_v37 = vadd.f32 %v4526_v9, %v4522_v17 }
  0xe8   :  { %6376 = vst [vmem:[#allocation62_spill] sm:$0xff] %v4532_v19  ;;  %v4537_v5 = vsel %vm1976_vm3, 1.0, %v3486_v10  ;;  %v4573_v10 = vpop.f32.mrf.mxu0  ;;  %6378 = vst [vmem:[#allocation64_spill] sm:$0xff] %v4575_v39 }
  0xe9   :  { %2481 = vadd.xlane.f32.xlu1 %v2480_v55  ;;  %6377 = vst [vmem:[#allocation63_spill] sm:$0xff] %v4537_v5  ;;  %v2486_v1 = vadd.f32 %v4537_v5, %v4532_v19  ;;  %v3487_v55 = vmov -inf   ;;  %v2137_v5 = vmul.f32 %v3789_v26, %v4573_v10 }
  0xea   :  { %23 = vst.msk [vmem:[#allocation2] sm:$0xff] %vm22_vm5, %v3487_v55  ;;  %24 = vst.msk [vmem:[#allocation2 + $0x8] sm:$0xff] %vm22_vm5, %v3487_v55 }
  0xeb   :  { %2484 = vadd.xlane.f32.xlu0 %v2483_v37  ;;  %25 = vst.msk [vmem:[#allocation2 + $0x10] sm:$0xff] %vm22_vm5, %v3487_v55  ;;  %26 = vst.msk [vmem:[#allocation2 + $0x18] sm:$0xff] %vm22_vm5, %v3487_v55  ;;  %v4577_v37 = vpop.f32.mrf.mxu0 }
  0xec   :  { %27 = vst.msk [vmem:[#allocation2 + $0x20] sm:$0xff] %vm22_vm5, %v3487_v55  ;;  %28 = vst.msk [vmem:[#allocation2 + $0x28] sm:$0xff] %vm22_vm5, %v3487_v55  ;;  %v815_v19 = vmax.f32 %v4573_v10, %v4577_v37  ;;  %v2138_v57 = vmul.f32 %v3784_v24, %v4577_v37 }
  0xed   :  { %2487 = vadd.xlane.f32.xlu1 %v2486_v1  ;;  %29 = vst.msk [vmem:[#allocation2 + $0x30] sm:$0xff] %vm22_vm5, %v3487_v55  ;;  %30 = vst.msk [vmem:[#allocation2 + $0x38] sm:$0xff] %vm22_vm5, %v3487_v55  ;;  %v4579_v1 = vpop.f32.mrf.mxu1  ;;  %v4587_v30 = vpop.f32.mrf.mxu0 }
  0xee   :  { %31 = vst.msk [vmem:[#allocation2 + $0x40] sm:$0xff] %vm22_vm5, %v3487_v55  ;;  %32 = vst.msk [vmem:[#allocation2 + $0x48] sm:$0xff] %vm22_vm5, %v3487_v55  ;;  %v2201_v61 = vadd.f32 %v2138_v57, %v2137_v5  ;;  %v863_v50 = vmax.f32 %v4575_v39, %v4579_v1  ;;  %v2170_v26 = vmul.f32 %v4280_v36, %v4579_v1 }
  0xef   :  { %33 = vst.msk [vmem:[#allocation2 + $0x50] sm:$0xff] %vm22_vm5, %v3487_v55  ;;  %34 = vst.msk [vmem:[#allocation2 + $0x58] sm:$0xff] %vm22_vm5, %v3487_v55  ;;  %816 = vmax.xlane.f32.xlu0 %v815_v19  ;;  %v4591_v17 = vpop.f32.mrf.mxu0  ;;  %v2169_v57 = vmul.f32 %v4276_v6, %v4575_v39 }
  0xf0   :  { %35 = vst.msk [vmem:[#allocation2 + $0x60] sm:$0xff] %vm22_vm5, %v3487_v55  ;;  %36 = vst.msk [vmem:[#allocation2 + $0x68] sm:$0xff] %vm22_vm5, %v3487_v55 }
  0xf1   :  { %37 = vst.msk [vmem:[#allocation2 + $0x70] sm:$0xff] %vm22_vm5, %v3487_v55  ;;  %38 = vst.msk [vmem:[#allocation2 + $0x78] sm:$0xff] %vm22_vm5, %v3487_v55  ;;  %2202 = vadd.xlane.f32.xlu1 %v2201_v61  ;;  %v4599_v21 = vpop.f32.mrf.mxu0  ;;  %v2249_v36 = vadd.f32 %v2170_v26, %v2169_v57  ;;  %v2140_v26 = vmul.f32 %v3774_v22, %v4591_v17 }
  0xf2   :  { %39 = vst.msk [vmem:[#allocation2 + $0x80] sm:$0xff] %vm22_vm5, %v3487_v55  ;;  %40 = vst.msk [vmem:[#allocation2 + $0x88] sm:$0xff] %vm22_vm5, %v3487_v55 }
  0xf3   :  { %41 = vst.msk [vmem:[#allocation2 + $0x90] sm:$0xff] %vm22_vm5, %v3487_v55  ;;  %42 = vst.msk [vmem:[#allocation2 + $0x98] sm:$0xff] %vm22_vm5, %v3487_v55  ;;  %864 = vmax.xlane.f32.xlu0 %v863_v50  ;;  %v4609_v5 = vpop.f32.mrf.mxu0 }
  0xf4   :  { %43 = vst.msk [vmem:[#allocation2 + $0xa0] sm:$0xff] %vm22_vm5, %v3487_v55  ;;  %44 = vst.msk [vmem:[#allocation2 + $0xa8] sm:$0xff] %vm22_vm5, %v3487_v55  ;;  %v821_v57 = vmax.f32 %v4599_v21, %v4609_v5 }
  0xf5   :  { %45 = vst.msk [vmem:[#allocation2 + $0xb0] sm:$0xff] %vm22_vm5, %v3487_v55  ;;  %46 = vst.msk [vmem:[#allocation2 + $0xb8] sm:$0xff] %vm22_vm5, %v3487_v55  ;;  %v4615_v15 = vpop.f32.mrf.mxu0 }
  0xf6   :  { %47 = vst.msk [vmem:[#allocation2 + $0xc0] sm:$0xff] %vm22_vm5, %v3487_v55  ;;  %48 = vst.msk [vmem:[#allocation2 + $0xc8] sm:$0xff] %vm22_vm5, %v3487_v55 }
  0xf7   :  { %49 = vst.msk [vmem:[#allocation2 + $0xd0] sm:$0xff] %vm22_vm5, %v3487_v55  ;;  %50 = vst.msk [vmem:[#allocation2 + $0xd8] sm:$0xff] %vm22_vm5, %v3487_v55  ;;  %2250 = vadd.xlane.f32.xlu0 %v2249_v36  ;;  %v4619_v4 = vpop.f32.mrf.mxu0 }
  0xf8   :  { %51 = vst.msk [vmem:[#allocation2 + $0xe0] sm:$0xff] %vm22_vm5, %v3487_v55  ;;  %52 = vst.msk [vmem:[#allocation2 + $0xe8] sm:$0xff] %vm22_vm5, %v3487_v55 }
  0xf9   :  { %53 = vst.msk [vmem:[#allocation2 + $0xf0] sm:$0xff] %vm22_vm5, %v3487_v55  ;;  %54 = vst.msk [vmem:[#allocation2 + $0xf8] sm:$0xff] %vm22_vm5, %v3487_v55  ;;  %v4589_v55 = vpop.f32.mrf.mxu1 }
  0xfa   :  { %6379 = vst [vmem:[#allocation65_spill] sm:$0xff] %v4579_v1  ;;  %6380 = vst [vmem:[#allocation66_spill] sm:$0xff] %v4587_v30  ;;  %v2171_v51 = vmul.f32 %v4286_v29, %v4589_v55 }
  0xfb   :  { %6381 = vst [vmem:[#allocation67_spill] sm:$0xff] %v4589_v55  ;;  %6382 = vst [vmem:[#allocation68_spill] sm:$0xff] %v4591_v17  ;;  %v4593_v9 = vpop.f32.mrf.mxu1 }
  0xfc   :  { %6383 = vst [vmem:[#allocation69_spill] sm:$0xff] %v4593_v9  ;;  %6384 = vst [vmem:[#allocation70_spill] sm:$0xff] %v4599_v21  ;;  %v866_v19 = vmax.f32 %v4589_v55, %v4593_v9  ;;  %v2172_v61 = vmul.f32 %v4296_v62, %v4593_v9  ;;  %v818_v62 = vmax.f32 %v4587_v30, %v4591_v17 }
  0xfd   :  { %v4601_v24 = vpop.f32.mrf.mxu1  ;;  %6386 = vst [vmem:[#allocation72_spill] sm:$0xff] %v4609_v5  ;;  %6388 = vst [vmem:[#allocation74_spill] sm:$0xff] %v4615_v15 }
  0xfe   :  { %6385 = vst [vmem:[#allocation71_spill] sm:$0xff] %v4601_v24  ;;  %867 = vmax.xlane.f32.xlu1 %v866_v19  ;;  %v2252_v18 = vadd.f32 %v2172_v61, %v2171_v51  ;;  %6389 = vst [vmem:[#allocation75_spill] sm:$0xff] %v4619_v4  ;;  %v4627_v19 = vpop.f32.mrf.mxu0  ;;  %819 = vmax.xlane.f32.xlu0 %v818_v62  ;;  %v2139_v51 = vmul.f32 %v3778_v23, %v4587_v30 }
  0xff   :  { %v4611_v56 = vpop.f32.mrf.mxu1  ;;  %v824_v62 = vmax.f32 %v4615_v15, %v4619_v4  ;;  %v2141_v30 = vmul.f32 %v3814_v33, %v4599_v21 }
 0x100   :  { %6387 = vst [vmem:[#allocation73_spill] sm:$0xff] %v4611_v56  ;;  %v4635_v61 = vpop.f32.mrf.mxu0  ;;  %v2204_v36 = vadd.f32 %v2140_v26, %v2139_v51  ;;  %v869_v23 = vmax.f32 %v4601_v24, %v4611_v56 }
 0x101   :  { %v4617_v50 = vpop.f32.mrf.mxu1 }
 0x102   :  { %2253 = vadd.xlane.f32.xlu1 %v2252_v18  ;;  %v4639_v1 = vpop.f32.mrf.mxu0  ;;  %2205 = vadd.xlane.f32.xlu0 %v2204_v36 }
 0x103   :  { %v4621_v6 = vpop.f32.mrf.mxu1 }
 0x104   :  { %v4645_v17 = vpop.f32.mrf.mxu0  ;;  %v872_v36 = vmax.f32 %v4617_v50, %v4621_v6 }
 0x105   :  { %v4629_v29 = vpop.f32.mrf.mxu1  ;;  %6391 = vst [vmem:[#allocation77_spill] sm:$0xff] %v4645_v17 }
 0x106   :  { %822 = vmax.xlane.f32.xlu1 %v821_v57  ;;  %v2142_v57 = vmul.f32 %v3810_v32, %v4609_v5  ;;  %v4653_v26 = vpop.f32.mrf.mxu0  ;;  %870 = vmax.xlane.f32.xlu0 %v869_v23  ;;  %v2143_v5 = vmul.f32 %v3830_v38, %v4615_v15  ;;  %v2174_v23 = vmul.f32 %v4316_v49, %v4611_v56 }
 0x107   :  { %v4637_v18 = vpop.f32.mrf.mxu1  ;;  %v830_v38 = vmax.f32 %v4639_v1, %v4645_v17  ;;  %v2146_v56 = vmul.f32 %v3846_v42, %v4635_v61 }
 0x108   :  { %v4663_v14 = vpop.f32.mrf.mxu0  ;;  %v2207_v32 = vadd.f32 %v2142_v57, %v2141_v30 }
 0x109   :  { %v4641_v22 = vpop.f32.mrf.mxu1 }
 0x10a   :  { %6390 = vst [vmem:[#allocation76_spill] sm:$0xff] %v4641_v22  ;;  %825 = vmax.xlane.f32.xlu1 %v824_v62  ;;  %v2144_v62 = vmul.f32 %v3820_v34, %v4619_v4  ;;  %v4671_v9 = vpop.f32.mrf.mxu0  ;;  %2208 = vadd.xlane.f32.xlu0 %v2207_v32  ;;  %v2173_v34 = vmul.f32 %v4312_v59, %v4601_v24 }
 0x10b   :  { %v4647_v39 = vpop.f32.mrf.mxu1  ;;  %v827_v59 = vmax.f32 %v4627_v19, %v4635_v61  ;;  %v2148_v32 = vmul.f32 %v3856_v44, %v4645_v17  ;;  %v2145_v17 = vmul.f32 %v3850_v43, %v4627_v19 }
 0x10c   :  { %6392 = vst [vmem:[#allocation78_spill] sm:$0xff] %v4647_v39  ;;  %v2210_v33 = vadd.f32 %v2144_v62, %v2143_v5  ;;  %v4677_v4 = vpop.f32.mrf.mxu0  ;;  %v2255_v30 = vadd.f32 %v2174_v23, %v2173_v34  ;;  %v878_v5 = vmax.f32 %v4641_v22, %v4647_v39  ;;  %v2362_v62 = vld [vmem:[#allocation5 + $0x8] sm:$0xff]  ;;  %v2361_v34 = vld [vmem:[#allocation5] sm:$0xff]  ;;  %v2363_v39 = vld [vmem:[#allocation5 + $0x10] sm:$0xff] }
 0x10d   :  { %v4655_v51 = vpop.f32.mrf.mxu1  ;;  %6395 = vst [vmem:[#allocation81_spill] sm:$0xff] %v4677_v4  ;;  %v2395_v15 = vpop.xlane.xlu0 %2394  ;;  %v2213_v42 = vadd.f32 %v2146_v56, %v2145_v17  ;;  %v833_v17 = vmax.f32 %v4653_v26, %v4663_v14 }
 0x10e   :  { %6393 = vst [vmem:[#allocation79_spill] sm:$0xff] %v4655_v51  ;;  %873 = vmax.xlane.f32.xlu1 %v872_v36  ;;  %v4681_v57 = vpop.f32.mrf.mxu0  ;;  %2256 = vadd.xlane.f32.xlu0 %v2255_v30  ;;  %v2398_v30 = vpop.xlane.xlu1 %2397  ;;  %v2489_v22 = vadd.f32 %v2395_v15, %v2361_v34 }
 0x10f   :  { %v4665_v45 = vpop.f32.mrf.mxu1  ;;  %v2490_v24 = vadd.f32 %v2398_v30, %v2362_v62 }
 0x110   :  { %6394 = vst [vmem:[#allocation80_spill] sm:$0xff] %v4665_v45  ;;  %v4687_v36 = vpop.f32.mrf.mxu0  ;;  %2521 = vst.msk [vmem:[#allocation5] sm:$0xff] %vm22_vm5, %v2489_v22 }
 0x111   :  { %v4673_v55 = vpop.f32.mrf.mxu1  ;;  %2522 = vst.msk [vmem:[#allocation5 + $0x8] sm:$0xff] %vm22_vm5, %v2490_v24  ;;  %v2401_v62 = vpop.xlane.xlu0 %2400  ;;  %v2366_v24 = vld [vmem:[#allocation5 + $0x28] sm:$0xff] }
 0x112   :  { %2211 = vadd.xlane.f32.xlu1 %v2210_v33  ;;  %828 = vmax.xlane.f32.xlu0 %v827_v59  ;;  %v4697_v33 = vpop.f32.mrf.mxu0  ;;  %v2147_v59 = vmul.f32 %v3866_v48, %v4639_v1  ;;  %v2364_v48 = vld [vmem:[#allocation5 + $0x18] sm:$0xff]  ;;  %v2404_v30 = vpop.xlane.xlu1 %2403  ;;  %v2491_v15 = vadd.f32 %v2401_v62, %v2363_v39 }
 0x113   :  { %v4679_v21 = vpop.f32.mrf.mxu1 }
 0x114   :  { %v2216_v44 = vadd.f32 %v2148_v32, %v2147_v59  ;;  %v836_v32 = vmax.f32 %v4671_v9, %v4677_v4  ;;  %v2365_v59 = vld [vmem:[#allocation5 + $0x20] sm:$0xff]  ;;  %2523 = vst.msk [vmem:[#allocation5 + $0x10] sm:$0xff] %vm22_vm5, %v2491_v15  ;;  %v2367_v15 = vld [vmem:[#allocation5 + $0x30] sm:$0xff] }
 0x115   :  { %v4685_v49 = vpop.f32.mrf.mxu1  ;;  %v2407_v56 = vpop.xlane.xlu0 %2406 }
 0x116   :  { %6396 = vst [vmem:[#allocation82_spill] sm:$0xff] %v4685_v49  ;;  %831 = vmax.xlane.f32.xlu1 %v830_v38  ;;  %v875_v38 = vmax.f32 %v4629_v29, %v4637_v18  ;;  %v2410_v39 = vpop.xlane.xlu1 %2409  ;;  %v2493_v22 = vadd.f32 %v2407_v56, %v2365_v59  ;;  %v2151_v59 = vmul.f32 %v3902_v58, %v4671_v9 }
 0x117   :  { %v4695_v23 = vpop.f32.mrf.mxu1 }
 0x118   :  { %6397 = vst [vmem:[#allocation83_spill] sm:$0xff] %v4695_v23  ;;  %876 = vmax.xlane.f32.xlu0 %v875_v38  ;;  %v2492_v38 = vadd.f32 %v2404_v30, %v2364_v48  ;;  %v2152_v48 = vmul.f32 %v3892_v54, %v4677_v4  ;;  %v2494_v30 = vadd.f32 %v2410_v39, %v2366_v24  ;;  %2525 = vst.msk [vmem:[#allocation5 + $0x20] sm:$0xff] %vm22_vm5, %v2493_v22 }
 0x119   :  { %v4707_v35 = vpop.f32.mrf.mxu1  ;;  %v2413_v54 = vpop.xlane.xlu0 %2412  ;;  %v2149_v39 = vmul.f32 %v3886_v53, %v4653_v26 }
 0x11a   :  { %879 = vmax.xlane.f32.xlu1 %v878_v5  ;;  %v4709_v5 = vpop.f32.mrf.mxu0  ;;  %2524 = vst.msk [vmem:[#allocation5 + $0x18] sm:$0xff] %vm22_vm5, %v2492_v38  ;;  %v881_v38 = vmax.f32 %v4655_v51, %v4665_v45  ;;  %2526 = vst.msk [vmem:[#allocation5 + $0x28] sm:$0xff] %vm22_vm5, %v2494_v30  ;;  %v2416_v56 = vpop.xlane.xlu1 %2415  ;;  %v2495_v4 = vadd.f32 %v2413_v54, %v2367_v15  ;;  %v2222_v24 = vadd.f32 %v2152_v48, %v2151_v59  ;;  %v2369_v51 = vld [vmem:[#allocation5 + $0x40] sm:$0xff]  ;;  %v2371_v54 = vld [vmem:[#allocation5 + $0x50] sm:$0xff] }
 0x11b   :  { %v4715_v43 = vpop.f32.mrf.mxu1  ;;  %v842_v53 = vmax.f32 %v4697_v33, %v4709_v5 }
 0x11c   :  { %2214 = vadd.xlane.f32.xlu0 %v2213_v42  ;;  %v4717_v34 = vpop.f32.mrf.mxu0  ;;  %2527 = vst.msk [vmem:[#allocation5 + $0x30] sm:$0xff] %vm22_vm5, %v2495_v4  ;;  %v2372_v4 = vld [vmem:[#allocation5 + $0x58] sm:$0xff] }
 0x11d   :  { %v4727_v42 = vpop.f32.mrf.mxu1  ;;  %v2419_v30 = vpop.xlane.xlu0 %2418 }
 0x11e   :  { %2217 = vadd.xlane.f32.xlu1 %v2216_v44  ;;  %v884_v44 = vmax.f32 %v4673_v55, %v4679_v21  ;;  %6398 = vst [vmem:[#allocation84_spill] sm:$0xff] %v4727_v42  ;;  %v4729_v62 = vpop.f32.mrf.mxu0 }
 0x11f   :  { %v4741_v22 = vpop.f32.mrf.mxu1 }
 0x120   :  { %834 = vmax.xlane.f32.xlu0 %v833_v17  ;;  %v2150_v17 = vmul.f32 %v3882_v52, %v4663_v14  ;;  %6399 = vst [vmem:[#allocation85_spill] sm:$0xff] %v4741_v22  ;;  %v2370_v52 = vld [vmem:[#allocation5 + $0x48] sm:$0xff] }
 0x121   :  { %v4749_v48 = vpop.f32.mrf.mxu1 }
 0x122   :  { %837 = vmax.xlane.f32.xlu1 %v836_v32  ;;  %v2368_v32 = vld [vmem:[#allocation5 + $0x38] sm:$0xff]  ;;  %v2219_v58 = vadd.f32 %v2150_v17, %v2149_v39  ;;  %v2156_v39 = vmul.f32 %v4139_v3, %v4709_v5 }
 0x123   :  { %v2496_v45 = vadd.f32 %v2416_v56, %v2368_v32 }
 0x124   :  { %882 = vmax.xlane.f32.xlu0 %v881_v38  ;;  %v2497_v38 = vadd.f32 %v2419_v30, %v2369_v51 }
 0x125   :  { %2528 = vst.msk [vmem:[#allocation5 + $0x38] sm:$0xff] %vm22_vm5, %v2496_v45  ;;  %v839_v45 = vmax.f32 %v4681_v57, %v4687_v36 }
 0x126   :  { %885 = vmax.xlane.f32.xlu1 %v884_v44  ;;  %v4743_v44 = vpop.f32.mrf.mxu0  ;;  %2529 = vst.msk [vmem:[#allocation5 + $0x40] sm:$0xff] %vm22_vm5, %v2497_v38  ;;  %v2374_v38 = vld [vmem:[#allocation5 + $0x68] sm:$0xff] }
 0x128   :  { %2220 = vadd.xlane.f32.xlu0 %v2219_v58  ;;  %v4751_v59 = vpop.f32.mrf.mxu0 }
 0x12a   :  { %2223 = vadd.xlane.f32.xlu1 %v2222_v24  ;;  %v890_v24 = vmax.f32 %v4707_v35, %v4715_v43  ;;  %v4763_v58 = vpop.f32.mrf.mxu0 }
 0x12c   :  { %840 = vmax.xlane.f32.xlu0 %v839_v45 }
 0x12e   :  { %843 = vmax.xlane.f32.xlu1 %v842_v53  ;;  %v887_v53 = vmax.f32 %v4685_v49, %v4695_v23  ;;  %v2375_v49 = vld [vmem:[#allocation5 + $0x70] sm:$0xff] }
 0x130   :  { %888 = vmax.xlane.f32.xlu0 %v887_v53 }
 0x132   :  { %891 = vmax.xlane.f32.xlu1 %v890_v24  ;;  %v4777_v24 = vpop.f32.mrf.mxu0 }
 0x14a   :  { %v2422_v15 = vpop.xlane.xlu1 %2421 }
 0x14b   :  { %v2498_v32 = vadd.f32 %v2422_v15, %v2370_v52  ;;  %v2425_v51 = vpop.xlane.xlu0 %2424  ;;  %v4761_v52 = vpop.f32.mrf.mxu1  ;;  %v2373_v15 = vld [vmem:[#allocation5 + $0x60] sm:$0xff] }
 0x14c   :  { %v2499_v56 = vadd.f32 %v2425_v51, %v2371_v54  ;;  %v2154_v54 = vmul.f32 %v3927_v63, %v4687_v36  ;;  %v2376_v63 = vld [vmem:[#allocation5 + $0x78] sm:$0xff] }
 0x14d   :  { %2530 = vst.msk [vmem:[#allocation5 + $0x48] sm:$0xff] %vm22_vm5, %v2498_v32  ;;  %v2155_v32 = vmul.f32 %v4149_v8, %v4697_v33 }
 0x14e   :  { %v2428_v17 = vpop.xlane.xlu1 %2427  ;;  %2531 = vst.msk [vmem:[#allocation5 + $0x50] sm:$0xff] %vm22_vm5, %v2499_v56  ;;  %v4775_v56 = vpop.f32.mrf.mxu1 }
 0x14f   :  { %v2500_v30 = vadd.f32 %v2428_v17, %v2372_v4  ;;  %v2431_v3 = vpop.xlane.xlu0 %2430  ;;  %v2228_v4 = vadd.f32 %v2156_v39, %v2155_v32  ;;  %v2153_v17 = vmul.f32 %v4127_v2, %v4681_v57  ;;  %6400 = vst [vmem:[#allocation86_spill] sm:$0xff] %v4775_v56  ;;  %v848_v2 = vmax.f32 %v4743_v44, %v4751_v59  ;;  %v4785_v32 = vpop.f32.mrf.mxu0 }
 0x150   :  { %v2501_v51 = vadd.f32 %v2431_v3, %v2373_v15  ;;  %v4783_v39 = vpop.f32.mrf.mxu1  ;;  %v2377_v3 = vld [vmem:[#allocation5 + $0x80] sm:$0xff] }
 0x151   :  { %2532 = vst.msk [vmem:[#allocation5 + $0x58] sm:$0xff] %vm22_vm5, %v2500_v30  ;;  %2229 = vadd.xlane.f32.xlu1 %v2228_v4  ;;  %v2225_v8 = vadd.f32 %v2154_v54, %v2153_v17  ;;  %6401 = vst [vmem:[#allocation87_spill] sm:$0xff] %v4783_v39  ;;  %v2160_v54 = vmul.f32 %v4178_v25, %v4751_v59  ;;  %v2159_v25 = vmul.f32 %v4185_v31, %v4743_v44  ;;  %v2381_v31 = vld [vmem:[#allocation5 + $0xa0] sm:$0xff] }
 0x152   :  { %v2434_v45 = vpop.xlane.xlu1 %2433  ;;  %2533 = vst.msk [vmem:[#allocation5 + $0x60] sm:$0xff] %vm22_vm5, %v2501_v51  ;;  %v896_v51 = vmax.f32 %v4749_v48, %v4761_v52 }
 0x153   :  { %v2502_v23 = vadd.f32 %v2434_v45, %v2374_v38  ;;  %v2437_v30 = vpop.xlane.xlu0 %2436  ;;  %2226 = vadd.xlane.f32.xlu0 %v2225_v8  ;;  %v845_v45 = vmax.f32 %v4717_v34, %v4729_v62  ;;  %v4797_v8 = vpop.f32.mrf.mxu0 }
 0x154   :  { %v2503_v53 = vadd.f32 %v2437_v30, %v2375_v49 }
 0x155   :  { %2534 = vst.msk [vmem:[#allocation5 + $0x68] sm:$0xff] %vm22_vm5, %v2502_v23  ;;  %849 = vmax.xlane.f32.xlu1 %v848_v2  ;;  %v2378_v23 = vld [vmem:[#allocation5 + $0x88] sm:$0xff]  ;;  %v893_v2 = vmax.f32 %v4727_v42, %v4741_v22  ;;  %v4811_v22 = vpop.f32.mrf.mxu0 }
 0x156   :  { %v2440_v15 = vpop.xlane.xlu1 %2439  ;;  %2535 = vst.msk [vmem:[#allocation5 + $0x70] sm:$0xff] %vm22_vm5, %v2503_v53  ;;  %v2158_v53 = vmul.f32 %v4165_v16, %v4729_v62  ;;  %v2234_v16 = vadd.f32 %v2160_v54, %v2159_v25 }
 0x157   :  { %v2504_v38 = vadd.f32 %v2440_v15, %v2376_v63  ;;  %v2443_v49 = vpop.xlane.xlu0 %2442  ;;  %846 = vmax.xlane.f32.xlu0 %v845_v45  ;;  %v4795_v63 = vpop.f32.mrf.mxu1  ;;  %v2379_v15 = vld [vmem:[#allocation5 + $0x90] sm:$0xff]  ;;  %v2157_v45 = vmul.f32 %v4172_v0, %v4717_v34  ;;  %v854_v0 = vmax.f32 %v4785_v32, %v4797_v8 }
 0x158   :  { %v2505_v17 = vadd.f32 %v2443_v49, %v2377_v3  ;;  %v4819_v25 = vpop.f32.mrf.mxu0 }
 0x159   :  { %2536 = vst.msk [vmem:[#allocation5 + $0x78] sm:$0xff] %vm22_vm5, %v2504_v38  ;;  %897 = vmax.xlane.f32.xlu1 %v896_v51  ;;  %v2380_v38 = vld [vmem:[#allocation5 + $0x98] sm:$0xff]  ;;  %v2382_v51 = vld [vmem:[#allocation5 + $0xa8] sm:$0xff] }
 0x15a   :  { %v2446_v4 = vpop.xlane.xlu1 %2445  ;;  %2537 = vst.msk [vmem:[#allocation5 + $0x80] sm:$0xff] %vm22_vm5, %v2505_v17  ;;  %v2231_v17 = vadd.f32 %v2158_v53, %v2157_v45  ;;  %v2164_v45 = vmul.f32 %v4213_v47, %v4797_v8  ;;  %v2163_v47 = vmul.f32 %v4224_v60, %v4785_v32  ;;  %v2387_v60 = vld [vmem:[#allocation5 + $0xd0] sm:$0xff] }
 0x15b   :  { %v2506_v30 = vadd.f32 %v2446_v4, %v2378_v23  ;;  %894 = vmax.xlane.f32.xlu0 %v893_v2  ;;  %v4809_v4 = vpop.f32.mrf.mxu1 }
 0x15c   :  { %v2449_v3 = vpop.xlane.xlu0 %2448 }
 0x15d   :  { %2538 = vst.msk [vmem:[#allocation5 + $0x88] sm:$0xff] %vm22_vm5, %v2506_v30  ;;  %v2507_v49 = vadd.f32 %v2449_v3, %v2379_v15  ;;  %2235 = vadd.xlane.f32.xlu1 %v2234_v16  ;;  %v4817_v54 = vpop.f32.mrf.mxu1  ;;  %v2383_v3 = vld [vmem:[#allocation5 + $0xb0] sm:$0xff] }
 0x15e   :  { %v2452_v23 = vpop.xlane.xlu1 %2451 }
 0x15f   :  { %v2508_v42 = vadd.f32 %v2452_v23, %v2380_v38  ;;  %2539 = vst.msk [vmem:[#allocation5 + $0x90] sm:$0xff] %vm22_vm5, %v2507_v49  ;;  %2232 = vadd.xlane.f32.xlu0 %v2231_v17  ;;  %v851_v23 = vmax.f32 %v4763_v58, %v4777_v24  ;;  %v902_v49 = vmax.f32 %v4795_v63, %v4809_v4  ;;  %v4831_v17 = vpop.f32.mrf.mxu0 }
 0x160   :  { %v2455_v30 = vpop.xlane.xlu0 %2454 }
 0x161   :  { %2540 = vst.msk [vmem:[#allocation5 + $0x98] sm:$0xff] %vm22_vm5, %v2508_v42  ;;  %v2509_v2 = vadd.f32 %v2455_v30, %v2381_v31  ;;  %855 = vmax.xlane.f32.xlu1 %v854_v0  ;;  %v2384_v42 = vld [vmem:[#allocation5 + $0xb8] sm:$0xff]  ;;  %v2162_v0 = vmul.f32 %v4201_v41, %v4777_v24  ;;  %v2240_v41 = vadd.f32 %v2164_v45, %v2163_v47 }
 0x162   :  { %v2458_v15 = vpop.xlane.xlu1 %2457  ;;  %v857_v45 = vmax.f32 %v4811_v22, %v4819_v25 }
 0x163   :  { %v2510_v38 = vadd.f32 %v2458_v15, %v2382_v51  ;;  %2541 = vst.msk [vmem:[#allocation5 + $0xa0] sm:$0xff] %vm22_vm5, %v2509_v2  ;;  %852 = vmax.xlane.f32.xlu0 %v851_v23  ;;  %v4829_v51 = vpop.f32.mrf.mxu1  ;;  %v2385_v15 = vld [vmem:[#allocation5 + $0xc0] sm:$0xff]  ;;  %v899_v2 = vmax.f32 %v4775_v56, %v4783_v39  ;;  %v2161_v23 = vmul.f32 %v4207_v46, %v4763_v58  ;;  %v4845_v39 = vpop.f32.mrf.mxu0 }
 0x164   :  { %v2461_v53 = vpop.xlane.xlu0 %2460  ;;  %6403 = vst [vmem:[#allocation89_spill] sm:$0xff] %v4845_v39 }
 0x165   :  { %2542 = vst.msk [vmem:[#allocation5 + $0xa8] sm:$0xff] %vm22_vm5, %v2510_v38  ;;  %v2511_v31 = vadd.f32 %v2461_v53, %v2383_v3  ;;  %903 = vmax.xlane.f32.xlu1 %v902_v49  ;;  %v2386_v38 = vld [vmem:[#allocation5 + $0xc8] sm:$0xff]  ;;  %v860_v49 = vmax.f32 %v4831_v17, %v4845_v39 }
 0x166   :  { %v2464_v16 = vpop.xlane.xlu1 %2463 }
 0x167   :  { %v2512_v30 = vadd.f32 %v2464_v16, %v2384_v42  ;;  %2543 = vst.msk [vmem:[#allocation5 + $0xb0] sm:$0xff] %vm22_vm5, %v2511_v31  ;;  %900 = vmax.xlane.f32.xlu0 %v899_v2  ;;  %v4843_v16 = vpop.f32.mrf.mxu1  ;;  %v2388_v31 = vld [vmem:[#allocation5 + $0xd8] sm:$0xff] }
 0x168   :  { %v2467_v3 = vpop.xlane.xlu0 %2466  ;;  %6402 = vst [vmem:[#allocation88_spill] sm:$0xff] %v4843_v16 }
 0x169   :  { %2544 = vst.msk [vmem:[#allocation5 + $0xb8] sm:$0xff] %vm22_vm5, %v2512_v30  ;;  %v2513_v53 = vadd.f32 %v2467_v3, %v2385_v15  ;;  %2241 = vadd.xlane.f32.xlu1 %v2240_v41  ;;  %v2237_v30 = vadd.f32 %v2162_v0, %v2161_v23  ;;  %v4853_v47 = vpop.f32.mrf.mxu1  ;;  %v2389_v3 = vld [vmem:[#allocation5 + $0xe0] sm:$0xff]  ;;  %v2390_v0 = vld [vmem:[#allocation5 + $0xe8] sm:$0xff]  ;;  %v905_v23 = vmax.f32 %v4817_v54, %v4829_v51 }
 0x16a   :  { %v2470_v42 = vpop.xlane.xlu1 %2469  ;;  %6404 = vst [vmem:[#allocation90_spill] sm:$0xff] %v4853_v47 }
 0x16b   :  { %v2514_v56 = vadd.f32 %v2470_v42, %v2386_v38  ;;  %2545 = vst.msk [vmem:[#allocation5 + $0xc0] sm:$0xff] %vm22_vm5, %v2513_v53  ;;  %2238 = vadd.xlane.f32.xlu0 %v2237_v30  ;;  %v908_v42 = vmax.f32 %v4843_v16, %v4853_v47  ;;  %v2168_v53 = vmul.f32 %v4250_v13, %v4845_v39  ;;  %v2391_v30 = vld [vmem:[#allocation5 + $0xf0] sm:$0xff]  ;;  %v6489_v16 = vld [vmem:[#allocation74_spill] sm:$0xff] }
 0x16c   :  { %v2473_v46 = vpop.xlane.xlu0 %2472  ;;  %v2165_v13 = vmul.f32 %v4244_v12, %v4811_v22 }
 0x16d   :  { %2546 = vst.msk [vmem:[#allocation5 + $0xc8] sm:$0xff] %vm22_vm5, %v2514_v56  ;;  %v2515_v2 = vadd.f32 %v2473_v46, %v2387_v60  ;;  %861 = vmax.xlane.f32.xlu1 %v860_v49  ;;  %v2166_v46 = vmul.f32 %v4240_v7, %v4819_v25  ;;  %v2167_v49 = vmul.f32 %v4260_v40, %v4831_v17  ;;  %v4873_v40 = vld [vmem:[#allocation2] sm:$0xff] }
 0x16e   :  { %v2476_v15 = vpop.xlane.xlu1 %2475  ;;  %6405 = vst [vmem:[#allocation91_spill] sm:$0xff] %v4873_v40 }
 0x16f   :  { %v2516_v38 = vadd.f32 %v2476_v15, %v2388_v31  ;;  %2547 = vst.msk [vmem:[#allocation5 + $0xd0] sm:$0xff] %vm22_vm5, %v2515_v2  ;;  %858 = vmax.xlane.f32.xlu0 %v857_v45  ;;  %v2392_v15 = vld [vmem:[#allocation5 + $0xf8] sm:$0xff]  ;;  %v2243_v7 = vadd.f32 %v2166_v46, %v2165_v13 }
 0x170   :  { %v2479_v56 = vpop.xlane.xlu0 %2478 }
 0x171   :  { %2548 = vst.msk [vmem:[#allocation5 + $0xd8] sm:$0xff] %vm22_vm5, %v2516_v38  ;;  %v2517_v60 = vadd.f32 %v2479_v56, %v2389_v3  ;;  %909 = vmax.xlane.f32.xlu1 %v908_v42  ;;  %v2246_v38 = vadd.f32 %v2168_v53, %v2167_v49  ;;  %v2105_v56 = vld [vmem:[#allocation4] sm:$0xff] }
 0x172   :  { %v2482_v41 = vpop.xlane.xlu1 %2481  ;;  %v4878_v53 = vld [vmem:[#allocation2 + $0x80] sm:$0xff] }
 0x173   :  { %v2518_v31 = vadd.f32 %v2482_v41, %v2390_v0  ;;  %2549 = vst.msk [vmem:[#allocation5 + $0xe0] sm:$0xff] %vm22_vm5, %v2517_v60  ;;  %906 = vmax.xlane.f32.xlu0 %v905_v23  ;;  %6407 = vst [vmem:[#allocation93_spill] sm:$0xff] %v4878_v53  ;;  %v4934_v23 = vld [vmem:[#allocation2 + $0x98] sm:$0xff] }
 0x174   :  { %v2485_v2 = vpop.xlane.xlu0 %2484  ;;  %6418 = vst [vmem:[#allocation104_spill] sm:$0xff] %v4934_v23 }
 0x175   :  { %2550 = vst.msk [vmem:[#allocation5 + $0xe8] sm:$0xff] %vm22_vm5, %v2518_v31  ;;  %v2519_v3 = vadd.f32 %v2485_v2, %v2391_v30  ;;  %2247 = vadd.xlane.f32.xlu1 %v2246_v38  ;;  %v4885_v30 = vld [vmem:[#allocation2 + $0x88] sm:$0xff] }
 0x176   :  { %v2488_v45 = vpop.xlane.xlu1 %2487  ;;  %6408 = vst [vmem:[#allocation94_spill] sm:$0xff] %v4885_v30  ;;  %v2106_v2 = vld [vmem:[#allocation4 + $0x8] sm:$0xff] }
 0x177   :  { %v2520_v0 = vadd.f32 %v2488_v45, %v2392_v15  ;;  %2551 = vst.msk [vmem:[#allocation5 + $0xf0] sm:$0xff] %vm22_vm5, %v2519_v3  ;;  %2244 = vadd.xlane.f32.xlu0 %v2243_v7  ;;  %v2121_v15 = vld [vmem:[#allocation4 + $0x80] sm:$0xff]  ;;  %v2122_v45 = vld [vmem:[#allocation4 + $0x88] sm:$0xff] }
 0x178   :  { %v817_v42 = vpop.xlane.xlu0 %816 }
 0x179   :  { %2552 = vst.msk [vmem:[#allocation5 + $0xf8] sm:$0xff] %vm22_vm5, %v2520_v0  ;;  %v4876_v41 = vmax.f32 %v4873_v40, %v817_v42  ;;  %v4904_v42 = vld [vmem:[#allocation2 + $0x8] sm:$0xff] }
 0x17a   :  { %v2203_v12 = vpop.xlane.xlu1 %2202  ;;  %6411 = vst [vmem:[#allocation97_spill] sm:$0xff] %v4904_v42  ;;  %v6490_v40 = vld [vmem:[#allocation75_spill] sm:$0xff] }
 0x17b   :  { %6406 = vst [vmem:[#allocation92_spill] sm:$0xff] %v4876_v41  ;;  %1680 = vst.msk [vmem:[#allocation2] sm:$0xff] %vm22_vm5, %v4876_v41  ;;  %v2297_v60 = vadd.f32 %v2203_v12, %v2105_v56 }
 0x17c   :  { %v865_v31 = vpop.xlane.xlu0 %864 }
 0x17d   :  { %2329 = vst.msk [vmem:[#allocation4] sm:$0xff] %vm22_vm5, %v2297_v60  ;;  %v4889_v46 = vmax.f32 %v4878_v53, %v865_v31  ;;  %v4907_v60 = vld [vmem:[#allocation2 + $0x10] sm:$0xff]  ;;  %v6474_v53 = vld [vmem:[#allocation34_spill] sm:$0xff] }
 0x17e   :  { %6412 = vst [vmem:[#allocation98_spill] sm:$0xff] %v4907_v60 }
 0x17f   :  { %6409 = vst [vmem:[#allocation95_spill] sm:$0xff] %v4889_v46  ;;  %1696 = vst.msk [vmem:[#allocation2 + $0x80] sm:$0xff] %vm22_vm5, %v4889_v46 }
 0x180   :  { %v2251_v38 = vpop.xlane.xlu0 %2250 }
 0x181   :  { %v2313_v0 = vadd.f32 %v2251_v38, %v2121_v15  ;;  %v4927_v15 = vld [vmem:[#allocation2 + $0x90] sm:$0xff] }
 0x182   :  { %6416 = vst [vmem:[#allocation102_spill] sm:$0xff] %v4927_v15 }
 0x183   :  { %2345 = vst.msk [vmem:[#allocation4 + $0x80] sm:$0xff] %vm22_vm5, %v2313_v0  ;;  %v4921_v0 = vld [vmem:[#allocation2 + $0x18] sm:$0xff] }
 0x184   :  { %6415 = vst [vmem:[#allocation101_spill] sm:$0xff] %v4921_v0 }
 0x186   :  { %1121 = vperm.xlu1 %3124, %v4889_v46  }
 0x187   :  { %v868_v49 = vpop.xlane.xlu1 %867  ;;  %v820_v12 = vpop.xlane.xlu0 %819 }
 0x188   :  { %v4896_v13 = vmax.f32 %v4885_v30, %v868_v49  ;;  %v4911_v31 = vmax.f32 %v4904_v42, %v820_v12 }
 0x18a   :  { %6410 = vst [vmem:[#allocation96_spill] sm:$0xff] %v4896_v13  ;;  %1697 = vst.msk [vmem:[#allocation2 + $0x88] sm:$0xff] %vm22_vm5, %v4896_v13  ;;  %1046 = vperm.xlu1 %3124, %v4911_v31  }
 0x18b   :  { %v2254_v7 = vpop.xlane.xlu1 %2253  ;;  %6413 = vst [vmem:[#allocation99_spill] sm:$0xff] %v4911_v31  ;;  %1681 = vst.msk [vmem:[#allocation2 + $0x8] sm:$0xff] %vm22_vm5, %v4911_v31 }
 0x18c   :  { %v2314_v56 = vadd.f32 %v2254_v7, %v2122_v45  ;;  %v2206_v45 = vpop.xlane.xlu0 %2205 }
 0x18d   :  { %1041 = vperm.xlu0 %3123, %v4876_v41  }
 0x18e   :  { %2346 = vst.msk [vmem:[#allocation4 + $0x88] sm:$0xff] %vm22_vm5, %v2314_v56  ;;  %v2298_v56 = vadd.f32 %v2206_v45, %v2106_v2 }
 0x18f   :  { %v823_v49 = vpop.xlane.xlu1 %822 }
 0x190   :  { %v4918_v38 = vmax.f32 %v4907_v60, %v823_v49  ;;  %2330 = vst.msk [vmem:[#allocation4 + $0x8] sm:$0xff] %vm22_vm5, %v2298_v56  ;;  %v871_v3 = vpop.xlane.xlu0 %870  ;;  %v2107_v60 = vld [vmem:[#allocation4 + $0x10] sm:$0xff] }
 0x191   :  { %1126 = vperm.xlu0 %3123, %v4896_v13   ;;  %v4941_v2 = vmax.f32 %v4927_v15, %v871_v3  ;;  %v2123_v15 = vld [vmem:[#allocation4 + $0x90] sm:$0xff] }
 0x192   :  { %6414 = vst [vmem:[#allocation100_spill] sm:$0xff] %v4918_v38  ;;  %1682 = vst.msk [vmem:[#allocation2 + $0x10] sm:$0xff] %vm22_vm5, %v4918_v38  ;;  %1051 = vperm.xlu1 %3124, %v4918_v38   ;;  %v2108_v38 = vld [vmem:[#allocation4 + $0x18] sm:$0xff] }
 0x193   :  { %v826_v12 = vpop.xlane.xlu1 %825  ;;  %6419 = vst [vmem:[#allocation105_spill] sm:$0xff] %v4941_v2  ;;  %1698 = vst.msk [vmem:[#allocation2 + $0x90] sm:$0xff] %vm22_vm5, %v4941_v2 }
 0x194   :  { %v4931_v49 = vmax.f32 %v4921_v0, %v826_v12  ;;  %v2209_v7 = vpop.xlane.xlu0 %2208 }
 0x195   :  { %v2299_v3 = vadd.f32 %v2209_v7, %v2107_v60 }
 0x196   :  { %6417 = vst [vmem:[#allocation103_spill] sm:$0xff] %v4931_v49  ;;  %1683 = vst.msk [vmem:[#allocation2 + $0x18] sm:$0xff] %vm22_vm5, %v4931_v49  ;;  %1131 = vperm.xlu1 %3124, %v4941_v2   ;;  %v4958_v2 = vld [vmem:[#allocation2 + $0x28] sm:$0xff] }
 0x197   :  { %v874_v45 = vpop.xlane.xlu1 %873  ;;  %2331 = vst.msk [vmem:[#allocation4 + $0x10] sm:$0xff] %vm22_vm5, %v2299_v3  ;;  %6421 = vst [vmem:[#allocation107_spill] sm:$0xff] %v4958_v2 }
 0x198   :  { %v4948_v12 = vmax.f32 %v4934_v23, %v874_v45  ;;  %v2257_v45 = vpop.xlane.xlu0 %2256  ;;  %v4961_v23 = vld [vmem:[#allocation2 + $0x20] sm:$0xff] }
 0x199   :  { %v2315_v0 = vadd.f32 %v2257_v45, %v2123_v15  ;;  %6422 = vst [vmem:[#allocation108_spill] sm:$0xff] %v4961_v23  ;;  %v2110_v45 = vld [vmem:[#allocation4 + $0x28] sm:$0xff] }
 0x19a   :  { %6420 = vst [vmem:[#allocation106_spill] sm:$0xff] %v4948_v12  ;;  %1699 = vst.msk [vmem:[#allocation2 + $0x98] sm:$0xff] %vm22_vm5, %v4948_v12  ;;  %1136 = vperm.xlu0 %3123, %v4948_v12   ;;  %1056 = vperm.xlu1 %3124, %v4931_v49   ;;  %v4967_v12 = vld [vmem:[#allocation2 + $0xa8] sm:$0xff]  ;;  %v5002_v49 = vld [vmem:[#allocation2 + $0x30] sm:$0xff] }
 0x19b   :  { %v2212_v56 = vpop.xlane.xlu1 %2211  ;;  %2347 = vst.msk [vmem:[#allocation4 + $0x90] sm:$0xff] %vm22_vm5, %v2315_v0  ;;  %6424 = vst [vmem:[#allocation110_spill] sm:$0xff] %v4967_v12 }
 0x19c   :  { %v2300_v42 = vadd.f32 %v2212_v56, %v2108_v38  ;;  %v829_v7 = vpop.xlane.xlu0 %828  ;;  %v4976_v56 = vld [vmem:[#allocation2 + $0xa0] sm:$0xff]  ;;  %6430 = vst [vmem:[#allocation116_spill] sm:$0xff] %v5002_v49 }
 0x19d   :  { %6426 = vst [vmem:[#allocation112_spill] sm:$0xff] %v4976_v56 }
 0x19e   :  { %2332 = vst.msk [vmem:[#allocation4 + $0x18] sm:$0xff] %vm22_vm5, %v2300_v42  ;;  %v4974_v42 = vmax.f32 %v4961_v23, %v829_v7 }
 0x19f   :  { %v832_v31 = vpop.xlane.xlu1 %831 }
 0x1a0   :  { %v4965_v60 = vmax.f32 %v4958_v2, %v832_v31  ;;  %6425 = vst [vmem:[#allocation111_spill] sm:$0xff] %v4974_v42  ;;  %1684 = vst.msk [vmem:[#allocation2 + $0x20] sm:$0xff] %vm22_vm5, %v4974_v42  ;;  %1061 = vperm.xlu1 %3124, %v4974_v42   ;;  %v2109_v2 = vld [vmem:[#allocation4 + $0x20] sm:$0xff] }
 0x1a1   :  { %v877_v3 = vpop.xlane.xlu0 %876 }
 0x1a2   :  { %6423 = vst [vmem:[#allocation109_spill] sm:$0xff] %v4965_v60  ;;  %1685 = vst.msk [vmem:[#allocation2 + $0x28] sm:$0xff] %vm22_vm5, %v4965_v60  ;;  %v4991_v38 = vmax.f32 %v4976_v56, %v877_v3 }
 0x1a3   :  { %v880_v15 = vpop.xlane.xlu1 %879 }
 0x1a4   :  { %v4983_v31 = vmax.f32 %v4967_v12, %v880_v15  ;;  %6428 = vst [vmem:[#allocation114_spill] sm:$0xff] %v4991_v38  ;;  %1700 = vst.msk [vmem:[#allocation2 + $0xa0] sm:$0xff] %vm22_vm5, %v4991_v38  ;;  %1141 = vperm.xlu1 %3124, %v4991_v38   ;;  %v4999_v12 = vld [vmem:[#allocation2 + $0x38] sm:$0xff] }
 0x1a5   :  { %v2215_v7 = vpop.xlane.xlu0 %2214  ;;  %6429 = vst [vmem:[#allocation115_spill] sm:$0xff] %v4999_v12 }
 0x1a6   :  { %6427 = vst [vmem:[#allocation113_spill] sm:$0xff] %v4983_v31  ;;  %1701 = vst.msk [vmem:[#allocation2 + $0xa8] sm:$0xff] %vm22_vm5, %v4983_v31  ;;  %1146 = vperm.xlu0 %3123, %v4983_v31   ;;  %v2301_v3 = vadd.f32 %v2215_v7, %v2109_v2  ;;  %v5018_v7 = vld [vmem:[#allocation2 + $0xb0] sm:$0xff] }
 0x1a7   :  { %v2218_v0 = vpop.xlane.xlu1 %2217  ;;  %6434 = vst [vmem:[#allocation120_spill] sm:$0xff] %v5018_v7 }
 0x1a8   :  { %v2302_v42 = vadd.f32 %v2218_v0, %v2110_v45  ;;  %2333 = vst.msk [vmem:[#allocation4 + $0x20] sm:$0xff] %vm22_vm5, %v2301_v3  ;;  %1066 = vperm.xlu1 %3124, %v4965_v60   ;;  %v5009_v0 = vld [vmem:[#allocation2 + $0xb8] sm:$0xff]  ;;  %v5044_v60 = vld [vmem:[#allocation2 + $0x40] sm:$0xff] }
 0x1a9   :  { %v835_v15 = vpop.xlane.xlu0 %834  ;;  %6432 = vst [vmem:[#allocation118_spill] sm:$0xff] %v5009_v0  ;;  %6438 = vst [vmem:[#allocation124_spill] sm:$0xff] %v5044_v60 }
 0x1aa   :  { %2334 = vst.msk [vmem:[#allocation4 + $0x28] sm:$0xff] %vm22_vm5, %v2302_v42  ;;  %v5016_v2 = vmax.f32 %v5002_v49, %v835_v15  ;;  %v2111_v49 = vld [vmem:[#allocation4 + $0x30] sm:$0xff] }
 0x1ab   :  { %v838_v23 = vpop.xlane.xlu1 %837 }
 0x1ac   :  { %v5006_v31 = vmax.f32 %v4999_v12, %v838_v23  ;;  %6433 = vst [vmem:[#allocation119_spill] sm:$0xff] %v5016_v2  ;;  %1686 = vst.msk [vmem:[#allocation2 + $0x30] sm:$0xff] %vm22_vm5, %v5016_v2  ;;  %1071 = vperm.xlu1 %3124, %v5016_v2   ;;  %v2112_v12 = vld [vmem:[#allocation4 + $0x38] sm:$0xff] }
 0x1ad   :  { %v883_v45 = vpop.xlane.xlu0 %882 }
 0x1ae   :  { %6431 = vst [vmem:[#allocation117_spill] sm:$0xff] %v5006_v31  ;;  %1687 = vst.msk [vmem:[#allocation2 + $0x38] sm:$0xff] %vm22_vm5, %v5006_v31  ;;  %v5033_v38 = vmax.f32 %v5018_v7, %v883_v45  ;;  %v5087_v7 = vld [vmem:[#allocation2 + $0x50] sm:$0xff] }
 0x1af   :  { %v886_v42 = vpop.xlane.xlu1 %885  ;;  %6446 = vst [vmem:[#allocation132_spill] sm:$0xff] %v5087_v7 }
 0x1b0   :  { %v5025_v3 = vmax.f32 %v5009_v0, %v886_v42  ;;  %6436 = vst [vmem:[#allocation122_spill] sm:$0xff] %v5033_v38  ;;  %1702 = vst.msk [vmem:[#allocation2 + $0xb0] sm:$0xff] %vm22_vm5, %v5033_v38  ;;  %1151 = vperm.xlu1 %3124, %v5033_v38   ;;  %v5041_v0 = vld [vmem:[#allocation2 + $0x48] sm:$0xff] }
 0x1b1   :  { %v2221_v15 = vpop.xlane.xlu0 %2220  ;;  %6437 = vst [vmem:[#allocation123_spill] sm:$0xff] %v5041_v0 }
 0x1b2   :  { %6435 = vst [vmem:[#allocation121_spill] sm:$0xff] %v5025_v3  ;;  %1703 = vst.msk [vmem:[#allocation2 + $0xb8] sm:$0xff] %vm22_vm5, %v5025_v3  ;;  %1156 = vperm.xlu0 %3123, %v5025_v3   ;;  %v2303_v45 = vadd.f32 %v2221_v15, %v2111_v49  ;;  %v5061_v15 = vld [vmem:[#allocation2 + $0xc0] sm:$0xff] }
 0x1b3   :  { %v2224_v23 = vpop.xlane.xlu1 %2223  ;;  %6442 = vst [vmem:[#allocation128_spill] sm:$0xff] %v5061_v15 }
 0x1b4   :  { %v2304_v2 = vadd.f32 %v2224_v23, %v2112_v12  ;;  %2335 = vst.msk [vmem:[#allocation4 + $0x30] sm:$0xff] %vm22_vm5, %v2303_v45  ;;  %1076 = vperm.xlu1 %3124, %v5006_v31   ;;  %v5051_v12 = vld [vmem:[#allocation2 + $0xc8] sm:$0xff] }
 0x1b5   :  { %v841_v42 = vpop.xlane.xlu0 %840  ;;  %6440 = vst [vmem:[#allocation126_spill] sm:$0xff] %v5051_v12 }
 0x1b6   :  { %2336 = vst.msk [vmem:[#allocation4 + $0x38] sm:$0xff] %vm22_vm5, %v2304_v2  ;;  %v5058_v49 = vmax.f32 %v5044_v60, %v841_v42  ;;  %v2113_v60 = vld [vmem:[#allocation4 + $0x40] sm:$0xff] }
 0x1b7   :  { %v844_v56 = vpop.xlane.xlu1 %843 }
 0x1b8   :  { %v5048_v3 = vmax.f32 %v5041_v0, %v844_v56  ;;  %6441 = vst [vmem:[#allocation127_spill] sm:$0xff] %v5058_v49  ;;  %1688 = vst.msk [vmem:[#allocation2 + $0x40] sm:$0xff] %vm22_vm5, %v5058_v49  ;;  %1081 = vperm.xlu1 %3124, %v5058_v49   ;;  %v2114_v0 = vld [vmem:[#allocation4 + $0x48] sm:$0xff] }
 0x1b9   :  { %v889_v23 = vpop.xlane.xlu0 %888 }
 0x1ba   :  { %6439 = vst [vmem:[#allocation125_spill] sm:$0xff] %v5048_v3  ;;  %1689 = vst.msk [vmem:[#allocation2 + $0x48] sm:$0xff] %vm22_vm5, %v5048_v3  ;;  %1086 = vperm.xlu0 %3123, %v5048_v3   ;;  %v5076_v3 = vmax.f32 %v5061_v15, %v889_v23  ;;  %v5093_v15 = vld [vmem:[#allocation2 + $0xd8] sm:$0xff] }
 0x1bb   :  { %v892_v2 = vpop.xlane.xlu1 %891  ;;  %6448 = vst [vmem:[#allocation134_spill] sm:$0xff] %v5093_v15 }
 0x1bc   :  { %v5068_v45 = vmax.f32 %v5051_v12, %v892_v2  ;;  %6444 = vst [vmem:[#allocation130_spill] sm:$0xff] %v5076_v3  ;;  %1704 = vst.msk [vmem:[#allocation2 + $0xc0] sm:$0xff] %vm22_vm5, %v5076_v3  ;;  %1161 = vperm.xlu1 %3124, %v5076_v3   ;;  %v5084_v12 = vld [vmem:[#allocation2 + $0x58] sm:$0xff]  ;;  %v5129_v3 = vld [vmem:[#allocation2 + $0x60] sm:$0xff] }
 0x1bd   :  { %6445 = vst [vmem:[#allocation131_spill] sm:$0xff] %v5084_v12  ;;  %6454 = vst [vmem:[#allocation140_spill] sm:$0xff] %v5129_v3 }
 0x1be   :  { %6443 = vst [vmem:[#allocation129_spill] sm:$0xff] %v5068_v45  ;;  %1705 = vst.msk [vmem:[#allocation2 + $0xc8] sm:$0xff] %vm22_vm5, %v5068_v45  ;;  %1166 = vperm.xlu0 %3123, %v5068_v45  }
 0x1da   :  { %v2230_v56 = vpop.xlane.xlu1 %2229 }
 0x1db   :  { %v2306_v49 = vadd.f32 %v2230_v56, %v2114_v0  ;;  %v5103_v56 = vld [vmem:[#allocation2 + $0xd0] sm:$0xff]  ;;  %v2116_v0 = vld [vmem:[#allocation4 + $0x58] sm:$0xff] }
 0x1dc   :  { %v2227_v42 = vpop.xlane.xlu0 %2226  ;;  %6450 = vst [vmem:[#allocation136_spill] sm:$0xff] %v5103_v56 }
 0x1dd   :  { %2338 = vst.msk [vmem:[#allocation4 + $0x48] sm:$0xff] %vm22_vm5, %v2306_v49  ;;  %v2305_v23 = vadd.f32 %v2227_v42, %v2113_v60 }
 0x1de   :  { %v850_v38 = vpop.xlane.xlu1 %849 }
 0x1df   :  { %2337 = vst.msk [vmem:[#allocation4 + $0x40] sm:$0xff] %vm22_vm5, %v2305_v23  ;;  %v5091_v45 = vmax.f32 %v5084_v12, %v850_v38 }
 0x1e0   :  { %v847_v2 = vpop.xlane.xlu0 %846 }
 0x1e1   :  { %6447 = vst [vmem:[#allocation133_spill] sm:$0xff] %v5091_v45  ;;  %1691 = vst.msk [vmem:[#allocation2 + $0x58] sm:$0xff] %vm22_vm5, %v5091_v45  ;;  %v5100_v49 = vmax.f32 %v5087_v7, %v847_v2  ;;  %1096 = vperm.xlu0 %3123, %v5091_v45   ;;  %v2115_v7 = vld [vmem:[#allocation4 + $0x50] sm:$0xff] }
 0x1e2   :  { %v898_v60 = vpop.xlane.xlu1 %897 }
 0x1e3   :  { %6449 = vst [vmem:[#allocation135_spill] sm:$0xff] %v5100_v49  ;;  %1690 = vst.msk [vmem:[#allocation2 + $0x50] sm:$0xff] %vm22_vm5, %v5100_v49  ;;  %v5110_v42 = vmax.f32 %v5093_v15, %v898_v60  ;;  %1091 = vperm.xlu1 %3124, %v5100_v49   ;;  %v5126_v15 = vld [vmem:[#allocation2 + $0x68] sm:$0xff] }
 0x1e4   :  { %v895_v23 = vpop.xlane.xlu0 %894  ;;  %6453 = vst [vmem:[#allocation139_spill] sm:$0xff] %v5126_v15 }
 0x1e5   :  { %6451 = vst [vmem:[#allocation137_spill] sm:$0xff] %v5110_v42  ;;  %1707 = vst.msk [vmem:[#allocation2 + $0xd8] sm:$0xff] %vm22_vm5, %v5110_v42  ;;  %v5118_v45 = vmax.f32 %v5103_v56, %v895_v23  ;;  %1176 = vperm.xlu0 %3123, %v5110_v42   ;;  %v5135_v56 = vld [vmem:[#allocation2 + $0xe8] sm:$0xff] }
 0x1e6   :  { %v2236_v38 = vpop.xlane.xlu1 %2235  ;;  %6456 = vst [vmem:[#allocation142_spill] sm:$0xff] %v5135_v56 }
 0x1e7   :  { %6452 = vst [vmem:[#allocation138_spill] sm:$0xff] %v5118_v45  ;;  %1706 = vst.msk [vmem:[#allocation2 + $0xd0] sm:$0xff] %vm22_vm5, %v5118_v45  ;;  %v2308_v49 = vadd.f32 %v2236_v38, %v2116_v0  ;;  %1171 = vperm.xlu1 %3124, %v5118_v45   ;;  %v5145_v38 = vld [vmem:[#allocation2 + $0xe0] sm:$0xff]  ;;  %v2118_v0 = vld [vmem:[#allocation4 + $0x68] sm:$0xff] }
 0x1e8   :  { %v2233_v2 = vpop.xlane.xlu0 %2232  ;;  %6458 = vst [vmem:[#allocation144_spill] sm:$0xff] %v5145_v38  ;;  %v5171_v45 = vld [vmem:[#allocation2 + $0x70] sm:$0xff] }
 0x1e9   :  { %2340 = vst.msk [vmem:[#allocation4 + $0x58] sm:$0xff] %vm22_vm5, %v2308_v49  ;;  %v2307_v23 = vadd.f32 %v2233_v2, %v2115_v7  ;;  %6462 = vst [vmem:[#allocation148_spill] sm:$0xff] %v5171_v45 }
 0x1ea   :  { %v856_v12 = vpop.xlane.xlu1 %855 }
 0x1eb   :  { %2339 = vst.msk [vmem:[#allocation4 + $0x50] sm:$0xff] %vm22_vm5, %v2307_v23  ;;  %v5133_v42 = vmax.f32 %v5126_v15, %v856_v12 }
 0x1ec   :  { %v853_v60 = vpop.xlane.xlu0 %852 }
 0x1ed   :  { %6455 = vst [vmem:[#allocation141_spill] sm:$0xff] %v5133_v42  ;;  %1693 = vst.msk [vmem:[#allocation2 + $0x68] sm:$0xff] %vm22_vm5, %v5133_v42  ;;  %v5142_v49 = vmax.f32 %v5129_v3, %v853_v60  ;;  %1106 = vperm.xlu0 %3123, %v5133_v42   ;;  %v2117_v3 = vld [vmem:[#allocation4 + $0x60] sm:$0xff] }
 0x1ee   :  { %v904_v7 = vpop.xlane.xlu1 %903 }
 0x1ef   :  { %6457 = vst [vmem:[#allocation143_spill] sm:$0xff] %v5142_v49  ;;  %1692 = vst.msk [vmem:[#allocation2 + $0x60] sm:$0xff] %vm22_vm5, %v5142_v49  ;;  %v5152_v2 = vmax.f32 %v5135_v56, %v904_v7  ;;  %1101 = vperm.xlu1 %3124, %v5142_v49   ;;  %v5168_v56 = vld [vmem:[#allocation2 + $0x78] sm:$0xff] }
 0x1f0   :  { %v901_v23 = vpop.xlane.xlu0 %900  ;;  %6461 = vst [vmem:[#allocation147_spill] sm:$0xff] %v5168_v56 }
 0x1f1   :  { %6459 = vst [vmem:[#allocation145_spill] sm:$0xff] %v5152_v2  ;;  %1709 = vst.msk [vmem:[#allocation2 + $0xe8] sm:$0xff] %vm22_vm5, %v5152_v2  ;;  %v5160_v42 = vmax.f32 %v5145_v38, %v901_v23  ;;  %1186 = vperm.xlu0 %3123, %v5152_v2   ;;  %v5177_v38 = vld [vmem:[#allocation2 + $0xf8] sm:$0xff] }
 0x1f2   :  { %v2242_v12 = vpop.xlane.xlu1 %2241  ;;  %6464 = vst [vmem:[#allocation150_spill] sm:$0xff] %v5177_v38 }
 0x1f3   :  { %6460 = vst [vmem:[#allocation146_spill] sm:$0xff] %v5160_v42  ;;  %1708 = vst.msk [vmem:[#allocation2 + $0xe0] sm:$0xff] %vm22_vm5, %v5160_v42  ;;  %v2310_v49 = vadd.f32 %v2242_v12, %v2118_v0  ;;  %1181 = vperm.xlu1 %3124, %v5160_v42   ;;  %v5186_v12 = vld [vmem:[#allocation2 + $0xf0] sm:$0xff]  ;;  %v2120_v0 = vld [vmem:[#allocation4 + $0x78] sm:$0xff] }
 0x1f4   :  { %v2239_v60 = vpop.xlane.xlu0 %2238  ;;  %6466 = vst [vmem:[#allocation152_spill] sm:$0xff] %v5186_v12 }
 0x1f5   :  { %2342 = vst.msk [vmem:[#allocation4 + $0x68] sm:$0xff] %vm22_vm5, %v2310_v49  ;;  %v2309_v23 = vadd.f32 %v2239_v60, %v2117_v3 }
 0x1f6   :  { %v862_v15 = vpop.xlane.xlu1 %861 }
 0x1f7   :  { %2341 = vst.msk [vmem:[#allocation4 + $0x60] sm:$0xff] %vm22_vm5, %v2309_v23  ;;  %v5175_v2 = vmax.f32 %v5168_v56, %v862_v15 }
 0x1f8   :  { %v859_v7 = vpop.xlane.xlu0 %858 }
 0x1f9   :  { %6463 = vst [vmem:[#allocation149_spill] sm:$0xff] %v5175_v2  ;;  %1695 = vst.msk [vmem:[#allocation2 + $0x78] sm:$0xff] %vm22_vm5, %v5175_v2  ;;  %v5184_v49 = vmax.f32 %v5171_v45, %v859_v7  ;;  %v2119_v45 = vld [vmem:[#allocation4 + $0x70] sm:$0xff] }
 0x1fa   :  { %v910_v3 = vpop.xlane.xlu1 %909 }
 0x1fb   :  { %6465 = vst [vmem:[#allocation151_spill] sm:$0xff] %v5184_v49  ;;  %1694 = vst.msk [vmem:[#allocation2 + $0x70] sm:$0xff] %vm22_vm5, %v5184_v49  ;;  %v5193_v15 = vmax.f32 %v5177_v38, %v910_v3  ;;  %1111 = vperm.xlu1 %3124, %v5184_v49   ;;  %v2177_v38 = vmul.f32 %v4348_v27, %v4629_v29  ;;  %v6470_v27 = vld [vmem:[#allocation36_spill] sm:$0xff] }
 0x1fc   :  { %v907_v23 = vpop.xlane.xlu0 %906 }
 0x1fd   :  { %6467 = vst [vmem:[#allocation153_spill] sm:$0xff] %v5193_v15  ;;  %1711 = vst.msk [vmem:[#allocation2 + $0xf8] sm:$0xff] %vm22_vm5, %v5193_v15  ;;  %v5201_v56 = vmax.f32 %v5186_v12, %v907_v23  ;;  %v2178_v23 = vmul.f32 %v4352_v28, %v4637_v18 }
 0x1fe   :  { %v2248_v60 = vpop.xlane.xlu1 %2247 }
 0x1ff   :  { %6468 = vst [vmem:[#allocation154_spill] sm:$0xff] %v5201_v56  ;;  %1710 = vst.msk [vmem:[#allocation2 + $0xf0] sm:$0xff] %vm22_vm5, %v5201_v56  ;;  %v2312_v3 = vadd.f32 %v2248_v60, %v2120_v0  ;;  %1191 = vperm.xlu1 %3124, %v5201_v56   ;;  %v2261_v31 = vadd.f32 %v2178_v23, %v2177_v38  ;;  %v2176_v60 = vmul.f32 %v4332_v11, %v4621_v6  ;;  %v6472_v56 = vld [vmem:[#allocation69_spill] sm:$0xff] }
 0x200   :  { %v2245_v49 = vpop.xlane.xlu0 %2244 }
 0x201   :  { %2344 = vst.msk [vmem:[#allocation4 + $0x78] sm:$0xff] %vm22_vm5, %v2312_v3  ;;  %v2311_v7 = vadd.f32 %v2245_v49, %v2119_v45  ;;  %v2175_v49 = vmul.f32 %v4322_v20, %v4617_v50 }
 0x203   :  { %2343 = vst.msk [vmem:[#allocation4 + $0x70] sm:$0xff] %vm22_vm5, %v2311_v7  ;;  %v6469_v7 = vld [vmem:[#allocation78_spill] sm:$0xff]  ;;  %v2258_v46 = vadd.f32 %v2176_v60, %v2175_v49 }
 0x204   :  { %v2180_v38 = vmul.f32 %v6470_v27, %v6469_v7  ;;  %v6476_v27 = vld [vmem:[#allocation64_spill] sm:$0xff] }
 0x208   :  { %v1042_v42 = vpop.permute.xlu0 %1041 }
 0x209   :  { %v1199_v12 = vsub.f32 %v4573_v10, %v1042_v42  ;;  %v1200_v0 = vsub.f32 %v4577_v37, %v1042_v42  ;;  %v1122_v37 = vpop.permute.xlu1 %1121  ;;  %v6473_v42 = vld [vmem:[#allocation76_spill] sm:$0xff] }
 0x20a   :  { %v2179_v11 = vmul.f32 %v6474_v53, %v6473_v42  ;;  %v6479_v53 = vld [vmem:[#allocation10_spill] sm:$0xff] }
 0x20b   :  { %v1263_v3 = vmul.f32 1.442695, %v1199_v12  ;;  %v1265_v45 = vmul.f32 1.442695, %v1200_v0 }
 0x20c   :  { %v1127_v28 = vpop.permute.xlu0 %1126  ;;  %v2264_v20 = vadd.f32 %v2180_v38, %v2179_v11 }
 0x20d   :  { %3165 = vpow2.f32 %v1263_v3  ;;  %v1234_v10 = vsub.f32 %v6472_v56, %v1127_v28  ;;  %v1047_v3 = vpop.permute.xlu1 %1046  ;;  %v6477_v56 = vld [vmem:[#allocation65_spill] sm:$0xff] }
 0x20e   :  { %3167 = vpow2.f32 %v1265_v45  ;;  %v6475_v45 = vld [vmem:[#allocation7_spill] sm:$0xff]  ;;  %v1232_v60 = vsub.f32 %v6477_v56, %v1122_v37 }
 0x20f   :  { %v1333_v0 = vmul.f32 1.442695, %v1234_v10  ;;  %vm717_vm3 = vcmp.eq.s32.totalorder %v6475_v45, 1  ;;  %v6482_v10 = vld [vmem:[#allocation68_spill] sm:$0xff]  ;;  %v6630_v45 = vld [vmem:[#allocation101_spill] sm:$0xff] }
 0x210   :  { %2262 = vadd.xlane.f32.xlu0 %v2261_v31  ;;  %v6471_v31 = vld [vmem:[#allocation67_spill] sm:$0xff]  ;;  %vm719_vm15 = vmand %vm642_vm2, %vm717_vm3  ;;  %v1202_v11 = vsub.f32 %v6482_v10, %v1047_v3 }
 0x211   :  { %v1233_v23 = vsub.f32 %v6471_v31, %v1127_v28  ;;  %v1231_v31 = vsub.f32 %v6476_v27, %v1122_v37  ;;  %v1052_v38 = vpop.permute.xlu1 %1051  ;;  %v1329_v27 = vmul.f32 1.442695, %v1232_v60  ;;  %vm5295_vm7 = vmand %vm644_vm1, %vm717_vm3 }
 0x212   :  { %v1269_v13 = vmul.f32 1.442695, %v1202_v11  ;;  %v6488_v11 = vld [vmem:[#allocation72_spill] sm:$0xff] }
 0x213   :  { %v1331_v12 = vmul.f32 1.442695, %v1233_v23  ;;  %v6481_v23 = vld [vmem:[#allocation8_spill] sm:$0xff] }
 0x214   :  { %vm718_vm13 = vcmp.eq.s32.totalorder %v6481_v23, 1 }
 0x215   :  { %3169 = vpow2.f32 %v1331_v12  ;;  %v1137_v47 = vpop.permute.xlu0 %1136  ;;  %vm5247_vm2 = vmand %vm677_vm0, %vm718_vm13 }
 0x216   :  { %3171 = vpow2.f32 %v1333_v0  ;;  %v1327_v0 = vmul.f32 1.442695, %v1231_v31  ;;  %v1237_v60 = vsub.f32 %v4617_v50, %v1137_v47  ;;  %vm5270_vm0 = vmand %vm675_vm8, %vm718_vm13 }
 0x217   :  { %vm5286_vm8 = vmand %vm648_vm10, %vm717_vm3 }
 0x218   :  { %3173 = vpow2.f32 %v1327_v0  ;;  %vm5306_vm10 = vmand %vm681_vm11, %vm718_vm13 }
 0x219   :  { %3175 = vpow2.f32 %v1329_v27 }
 0x21a   :  { %v3166_v12 = vpop.eup %3165 }
 0x21b   :  { %v1391_v37 = vsel %vm719_vm15, %v3166_v12, 0.0  ;;  %v1204_v12 = vsub.f32 %v6488_v11, %v1052_v38 }
 0x223   :  { %2259 = vadd.xlane.f32.xlu1 %v2258_v46  ;;  %v6480_v46 = vld [vmem:[#allocation66_spill] sm:$0xff] }
 0x224   :  { %v1201_v28 = vsub.f32 %v6480_v46, %v1047_v3  ;;  %v6483_v46 = vld [vmem:[#allocation70_spill] sm:$0xff] }
 0x225   :  { %v6485_v3 = vld [vmem:[#allocation26_spill] sm:$0xff] }
 0x226   :  { %1116 = vperm.xlu0 %3123, %v5175_v2   ;;  %v1267_v56 = vmul.f32 1.442695, %v1201_v28  ;;  %v1132_v2 = vpop.permute.xlu1 %1131  ;;  %v1238_v28 = vsub.f32 %v4621_v6, %v1137_v47  ;;  %v6491_v6 = vld [vmem:[#allocation71_spill] sm:$0xff] }
 0x227   :  { %2265 = vadd.xlane.f32.xlu1 %v2264_v20  ;;  %v3168_v20 = vpop.eup %3167  ;;  %v1235_v47 = vsub.f32 %v6491_v6, %v1132_v2 }
 0x228   :  { %v1392_v49 = vsel %vm718_vm13, %v3168_v20, 0.0  ;;  %v3170_v10 = vpop.eup %3169  ;;  %3177 = vpow2.f32 %v1267_v56  ;;  %v1273_v56 = vmul.f32 1.442695, %v1204_v12 }
 0x229   :  { %v1519_v30 = vadd.f32 %v1392_v49, %v1391_v37  ;;  %v3172_v20 = vpop.eup %3171  ;;  %3179 = vpow2.f32 %v1269_v13  ;;  %v1339_v37 = vmul.f32 1.442695, %v1237_v60  ;;  %v1341_v49 = vmul.f32 1.442695, %v1238_v28  ;;  %v6492_v13 = vld [vmem:[#allocation73_spill] sm:$0xff] }
 0x22a   :  { %1196 = vperm.xlu0 %3123, %v5193_v15   ;;  %v1203_v15 = vsub.f32 %v6483_v46, %v1052_v38  ;;  %v1057_v0 = vpop.permute.xlu1 %1056  ;;  %v1426_v50 = vsel %vm5247_vm2, %v3172_v20, 0.0  ;;  %v1236_v60 = vsub.f32 %v6492_v13, %v1132_v2  ;;  %v3174_v20 = vpop.eup %3173 }
 0x22b   :  { %1520 = vadd.xlane.f32.xlu1 %v1519_v30  ;;  %v1205_v46 = vsub.f32 %v6489_v16, %v1057_v0  ;;  %v1206_v39 = vsub.f32 %v6490_v40, %v1057_v0  ;;  %v1425_v30 = vsel %vm717_vm3, %v3170_v10, 0.0  ;;  %3181 = vpow2.f32 %v1339_v37  ;;  %v1147_v0 = vpop.permute.xlu0 %1146 }
 0x22c   :  { %v1271_v41 = vmul.f32 1.442695, %v1203_v15  ;;  %v1570_v27 = vadd.f32 %v1426_v50, %v1425_v30  ;;  %3183 = vpow2.f32 %v1341_v49  ;;  %v1335_v40 = vmul.f32 1.442695, %v1235_v47 }
 0x22d   :  { %v1275_v38 = vmul.f32 1.442695, %v1205_v46  ;;  %v1277_v28 = vmul.f32 1.442695, %v1206_v39  ;;  %v1337_v15 = vmul.f32 1.442695, %v1236_v60  ;;  %v1241_v2 = vsub.f32 %v6473_v42, %v1147_v0  ;;  %v3176_v39 = vpop.eup %3175 }
 0x22e   :  { %v1062_v10 = vpop.permute.xlu1 %1061  ;;  %v1242_v42 = vsub.f32 %v6469_v7, %v1147_v0  ;;  %v1423_v47 = vsel %vm717_vm3, %v3174_v20, 0.0 }
 0x22f   :  { %3185 = vpow2.f32 %v1275_v38  ;;  %1571 = vadd.xlane.f32.xlu1 %v1570_v27  ;;  %v1207_v31 = vsub.f32 %v4627_v19, %v1062_v10  ;;  %v1208_v11 = vsub.f32 %v4635_v61, %v1062_v10  ;;  %v1347_v50 = vmul.f32 1.442695, %v1241_v2 }
 0x230   :  { %3187 = vpow2.f32 %v1277_v28  ;;  %v1424_v38 = vsel %vm5270_vm0, %v3176_v39, 0.0 }
 0x231   :  { %3189 = vpow2.f32 %v1271_v41  ;;  %v1279_v12 = vmul.f32 1.442695, %v1207_v31  ;;  %v1281_v37 = vmul.f32 1.442695, %v1208_v11  ;;  %v1349_v11 = vmul.f32 1.442695, %v1242_v42 }
 0x232   :  { %3191 = vpow2.f32 %v1273_v56  ;;  %v1142_v19 = vpop.permute.xlu1 %1141  ;;  %v1567_v0 = vadd.f32 %v1424_v38, %v1423_v47 }
 0x233   :  { %3193 = vpow2.f32 %v1335_v40  ;;  %v1239_v16 = vsub.f32 %v4629_v29, %v1142_v19  ;;  %v1240_v30 = vsub.f32 %v4637_v18, %v1142_v19 }
 0x234   :  { %3195 = vpow2.f32 %v1337_v15  ;;  %v6502_v15 = vld [vmem:[#allocation77_spill] sm:$0xff] }
 0x235   :  { %v3178_v61 = vpop.eup %3177  ;;  %3197 = vpow2.f32 %v1279_v12  ;;  %v1343_v6 = vmul.f32 1.442695, %v1239_v16  ;;  %v1345_v7 = vmul.f32 1.442695, %v1240_v30 }
 0x236   :  { %v3180_v46 = vpop.eup %3179  ;;  %3199 = vpow2.f32 %v1281_v37  ;;  %v1067_v18 = vpop.permute.xlu1 %1066  ;;  %v1393_v16 = vsel %vm5295_vm7, %v3178_v61, 0.0 }
 0x237   :  { %v1209_v40 = vsub.f32 %v4639_v1, %v1067_v18  ;;  %v1210_v10 = vsub.f32 %v6502_v15, %v1067_v18  ;;  %3201 = vpow2.f32 %v1343_v6  ;;  %v1394_v42 = vsel %vm718_vm13, %v3180_v46, 0.0  ;;  %v1157_v61 = vpop.permute.xlu0 %1156 }
 0x238   :  { %v3182_v27 = vpop.eup %3181  ;;  %3203 = vpow2.f32 %v1347_v50  ;;  %v6506_v50 = vld [vmem:[#allocation11_spill] sm:$0xff]  ;;  %v1245_v60 = vsub.f32 %v4673_v55, %v1157_v61 }
 0x239   :  { %v3184_v13 = vpop.eup %3183  ;;  %v1283_v2 = vmul.f32 1.442695, %v1209_v40  ;;  %v1285_v39 = vmul.f32 1.442695, %v1210_v10  ;;  %3205 = vpow2.f32 %v1345_v7  ;;  %vm6507_vm1 = vcmp.ne.s32.totalorder %v6506_v50, %v6479_v53 }
 0x23a   :  { %v1072_v41 = vpop.permute.xlu1 %1071  ;;  %vm5323_vm11 = vmand %vm6507_vm1, %vm717_vm3  ;;  %v1429_v46 = vsel %vm717_vm3, %v3182_v27, 0.0  ;;  %v1430_v29 = vsel %vm5306_vm10, %v3184_v13, 0.0  ;;  %v1522_v40 = vadd.f32 %v1394_v42, %v1393_v16  ;;  %v1355_v13 = vmul.f32 1.442695, %v1245_v60 }
 0x23b   :  { %3207 = vpow2.f32 %v1283_v2  ;;  %v1211_v47 = vsub.f32 %v4653_v26, %v1072_v41  ;;  %v1212_v38 = vsub.f32 %v4663_v14, %v1072_v41  ;;  %v1246_v26 = vsub.f32 %v4679_v21, %v1157_v61  ;;  %v6515_v2 = vld [vmem:[#allocation80_spill] sm:$0xff] }
 0x23c   :  { %v3186_v31 = vpop.eup %3185  ;;  %3209 = vpow2.f32 %v1285_v39 }
 0x23d   :  { %v3188_v20 = vpop.eup %3187  ;;  %v1397_v1 = vsel %vm5286_vm8, %v3186_v31, 0.0  ;;  %3211 = vpow2.f32 %v1349_v11  ;;  %v1287_v7 = vmul.f32 1.442695, %v1211_v47  ;;  %v1289_v18 = vmul.f32 1.442695, %v1212_v38  ;;  %v6510_v31 = vld [vmem:[#allocation79_spill] sm:$0xff] }
 0x23e   :  { %v3190_v49 = vpop.eup %3189  ;;  %v1398_v19 = vsel %vm718_vm13, %v3188_v20, 0.0  ;;  %v1152_v14 = vpop.permute.xlu1 %1151  ;;  %v1576_v20 = vadd.f32 %v1430_v29, %v1429_v46  ;;  %v1357_v42 = vmul.f32 1.442695, %v1246_v26  ;;  %v6520_v38 = vld [vmem:[#allocation81_spill] sm:$0xff] }
 0x23f   :  { %v3192_v30 = vpop.eup %3191  ;;  %v1528_v56 = vadd.f32 %v1398_v19, %v1397_v1  ;;  %v1395_v15 = vsel %vm5323_vm11, %v3190_v49, 0.0  ;;  %3213 = vpow2.f32 %v1287_v7  ;;  %v1243_v11 = vsub.f32 %v6510_v31, %v1152_v14  ;;  %v6516_v49 = vld [vmem:[#allocation13_spill] sm:$0xff]  ;;  %v1087_v46 = vpop.permute.xlu0 %1086 }
 0x240   :  { %v3194_v28 = vpop.eup %3193  ;;  %v1396_v27 = vsel %vm718_vm13, %v3192_v30, 0.0  ;;  %3215 = vpow2.f32 %v1289_v18  ;;  %v1244_v39 = vsub.f32 %v6515_v2, %v1152_v14  ;;  %vm6517_vm15 = vcmp.ne.s32.totalorder %v6516_v49, %v6479_v53  ;;  %v6525_v49 = vld [vmem:[#allocation30_spill] sm:$0xff] }
 0x241   :  { %1529 = vadd.xlane.f32.xlu1 %v1528_v56  ;;  %v3196_v10 = vpop.eup %3195  ;;  %vm5355_vm2 = vmand %vm6517_vm15, %vm717_vm3  ;;  %v1351_v19 = vmul.f32 1.442695, %v1243_v11  ;;  %v1525_v16 = vadd.f32 %v1396_v27, %v1395_v15  ;;  %3217 = vpow2.f32 %v1355_v13  ;;  %v1427_v6 = vsel %vm717_vm3, %v3194_v28, 0.0 }
 0x242   :  { %v3198_v12 = vpop.eup %3197  ;;  %v1353_v30 = vmul.f32 1.442695, %v1244_v39  ;;  %v1077_v50 = vpop.permute.xlu1 %1076  ;;  %v1217_v28 = vsub.f32 %v4697_v33, %v1087_v46  ;;  %vm6526_vm7 = vcmp.ne.s32.totalorder %v6525_v49, %v6485_v3 }
 0x243   :  { %v3200_v1 = vpop.eup %3199  ;;  %3219 = vpow2.f32 %v1351_v19  ;;  %v1213_v47 = vsub.f32 %v4671_v9, %v1077_v50  ;;  %v1214_v56 = vsub.f32 %v6520_v38, %v1077_v50  ;;  %v1399_v29 = vsel %vm5355_vm2, %v3198_v12, 0.0  ;;  %vm5389_vm10 = vmand %vm6526_vm7, %vm718_vm13 }
 0x244   :  { %3221 = vpow2.f32 %v1353_v30  ;;  %v1400_v7 = vsel %vm718_vm13, %v3200_v1, 0.0  ;;  %v3202_v18 = vpop.eup %3201  ;;  %v1218_v9 = vsub.f32 %v4709_v5, %v1087_v46  ;;  %v1299_v11 = vmul.f32 1.442695, %v1217_v28  ;;  %v6533_v46 = vld [vmem:[#allocation82_spill] sm:$0xff] }
 0x245   :  { %1577 = vadd.xlane.f32.xlu1 %v1576_v20  ;;  %v1291_v60 = vmul.f32 1.442695, %v1213_v47  ;;  %v1293_v26 = vmul.f32 1.442695, %v1214_v56  ;;  %v3204_v14 = vpop.eup %3203  ;;  %3223 = vpow2.f32 %v1357_v42  ;;  %v1531_v37 = vadd.f32 %v1400_v7, %v1399_v29  ;;  %v6529_v42 = vld [vmem:[#allocation31_spill] sm:$0xff] }
 0x246   :  { %v3206_v27 = vpop.eup %3205  ;;  %v1301_v33 = vmul.f32 1.442695, %v1218_v9  ;;  %v1431_v39 = vsel %vm717_vm3, %v3202_v18, 0.0  ;;  %vm6530_vm1 = vcmp.ne.s32.totalorder %v6529_v42, %v6485_v3  ;;  %v6534_v18 = vld [vmem:[#allocation15_spill] sm:$0xff]  ;;  %v1433_v13 = vsel %vm717_vm3, %v3204_v14, 0.0 }
 0x247   :  { %3225 = vpow2.f32 %v1291_v60  ;;  %vm5400_vm11 = vmand %vm6530_vm1, %vm718_vm13  ;;  %v6547_v60 = vld [vmem:[#allocation33_spill] sm:$0xff] }
 0x248   :  { %v3208_v20 = vpop.eup %3207  ;;  %3227 = vpow2.f32 %v1293_v26  ;;  %v6538_v26 = vld [vmem:[#allocation83_spill] sm:$0xff]  ;;  %vm6548_vm7 = vcmp.ne.s32.totalorder %v6547_v60, %v6485_v3 }
 0x249   :  { %1568 = vadd.xlane.f32.xlu0 %v1567_v0  ;;  %v6511_v0 = vld [vmem:[#allocation28_spill] sm:$0xff]  ;;  %v3210_v1 = vpop.eup %3209  ;;  %3229 = vpow2.f32 %v1299_v11 }
 0x24a   :  { %vm6512_vm14 = vcmp.ne.s32.totalorder %v6511_v0, %v6485_v3  ;;  %v1167_v0 = vpop.permute.xlu0 %1166  ;;  %3231 = vpow2.f32 %v1301_v33  ;;  %v1402_v38 = vsel %vm718_vm13, %v3210_v1, 0.0 }
 0x24b   :  { %vm5345_vm9 = vmand %vm6512_vm14, %vm718_vm13  ;;  %v1249_v19 = vsub.f32 %v4707_v35, %v1167_v0  ;;  %vm6535_vm14 = vcmp.ne.s32.totalorder %v6534_v18, %v6479_v53 }
 0x24c   :  { %v1428_v61 = vsel %vm5345_vm9, %v3196_v10, 0.0  ;;  %v6521_v10 = vld [vmem:[#allocation14_spill] sm:$0xff]  ;;  %vm5414_vm9 = vmand %vm6535_vm14, %vm717_vm3 }
 0x24d   :  { %1523 = vadd.xlane.f32.xlu0 %v1522_v40  ;;  %v1082_v40 = vpop.permute.xlu1 %1081  ;;  %v1573_v15 = vadd.f32 %v1428_v61, %v1427_v6  ;;  %vm6522_vm0 = vcmp.ne.s32.totalorder %v6521_v10, %v6479_v53  ;;  %v1363_v56 = vmul.f32 1.442695, %v1249_v19 }
 0x24e   :  { %vm5376_vm8 = vmand %vm6522_vm0, %vm717_vm3  ;;  %v1215_v5 = vsub.f32 %v4681_v57, %v1082_v40  ;;  %v1216_v12 = vsub.f32 %v4687_v36, %v1082_v40  ;;  %v1250_v36 = vsub.f32 %v4715_v43, %v1167_v0  ;;  %v1432_v40 = vsel %vm5389_vm10, %v3206_v27, 0.0 }
 0x24f   :  { %v1401_v47 = vsel %vm5376_vm8, %v3208_v20, 0.0  ;;  %v6539_v20 = vld [vmem:[#allocation32_spill] sm:$0xff]  ;;  %vm5462_vm10 = vmand %vm6548_vm7, %vm718_vm13 }
 0x250   :  { %v1295_v57 = vmul.f32 1.442695, %v1215_v5  ;;  %v1297_v50 = vmul.f32 1.442695, %v1216_v12  ;;  %v1365_v61 = vmul.f32 1.442695, %v1250_v36  ;;  %v1534_v9 = vadd.f32 %v1402_v38, %v1401_v47 }
 0x251   :  { %1526 = vadd.xlane.f32.xlu0 %v1525_v16  ;;  %v3212_v16 = vpop.eup %3211  ;;  %v1162_v6 = vpop.permute.xlu1 %1161  ;;  %vm6540_vm15 = vcmp.ne.s32.totalorder %v6539_v20, %v6485_v3  ;;  %v1579_v12 = vadd.f32 %v1432_v40, %v1431_v39 }
 0x252   :  { %3233 = vpow2.f32 %v1295_v57  ;;  %v1247_v29 = vsub.f32 %v6533_v46, %v1162_v6  ;;  %v3214_v7 = vpop.eup %3213  ;;  %v1248_v28 = vsub.f32 %v6538_v26, %v1162_v6  ;;  %v1434_v11 = vsel %vm5400_vm11, %v3212_v16, 0.0  ;;  %1535 = vadd.xlane.f32.xlu1 %v1534_v9  ;;  %vm5430_vm2 = vmand %vm6540_vm15, %vm718_vm13 }
 0x253   :  { %3235 = vpow2.f32 %v1297_v50  ;;  %v1403_v14 = vsel %vm5414_vm9, %v3214_v7, 0.0  ;;  %v1582_v1 = vadd.f32 %v1434_v11, %v1433_v13  ;;  %v6543_v50 = vld [vmem:[#allocation16_spill] sm:$0xff] }
 0x254   :  { %3237 = vpow2.f32 %v1363_v56  ;;  %v1359_v10 = vmul.f32 1.442695, %v1247_v29  ;;  %v1361_v33 = vmul.f32 1.442695, %v1248_v28  ;;  %vm6544_vm0 = vcmp.ne.s32.totalorder %v6543_v50, %v6479_v53 }
 0x255   :  { %1574 = vadd.xlane.f32.xlu0 %v1573_v15  ;;  %v3216_v15 = vpop.eup %3215  ;;  %3239 = vpow2.f32 %v1365_v61  ;;  %vm5449_vm8 = vmand %vm6544_vm0, %vm717_vm3 }
 0x256   :  { %v3218_v5 = vpop.eup %3217  ;;  %3241 = vpow2.f32 %v1359_v10  ;;  %v1404_v0 = vsel %vm718_vm13, %v3216_v15, 0.0  ;;  %1583 = vadd.xlane.f32.xlu1 %v1582_v1  ;;  %v6551_v15 = vld [vmem:[#allocation17_spill] sm:$0xff] }
 0x257   :  { %3243 = vpow2.f32 %v1361_v33  ;;  %v1537_v16 = vadd.f32 %v1404_v0, %v1403_v14  ;;  %v1437_v7 = vsel %vm717_vm3, %v3218_v5, 0.0  ;;  %vm6552_vm1 = vcmp.ne.s32.totalorder %v6551_v15, %v6479_v53  ;;  %v6556_v0 = vld [vmem:[#allocation85_spill] sm:$0xff] }
 0x258   :  { %vm5472_vm11 = vmand %vm6552_vm1, %vm717_vm3 }
 0x259   :  { %1532 = vadd.xlane.f32.xlu0 %v1531_v37  ;;  %v3220_v37 = vpop.eup %3219 }
 0x25a   :  { %v3222_v41 = vpop.eup %3221  ;;  %v1435_v36 = vsel %vm717_vm3, %v3220_v37, 0.0 }
 0x25b   :  { %v1436_v42 = vsel %vm5430_vm2, %v3222_v41, 0.0  ;;  %v3224_v30 = vpop.eup %3223 }
 0x25c   :  { %v1097_v49 = vpop.permute.xlu0 %1096  ;;  %v3226_v56 = vpop.eup %3225  ;;  %v1585_v29 = vadd.f32 %v1436_v42, %v1435_v36  ;;  %v6557_v36 = vld [vmem:[#allocation18_spill] sm:$0xff] }
 0x25d   :  { %v1221_v57 = vsub.f32 %v4743_v44, %v1097_v49  ;;  %v1222_v19 = vsub.f32 %v4751_v59, %v1097_v49  ;;  %1580 = vadd.xlane.f32.xlu0 %v1579_v12  ;;  %v3228_v18 = vpop.eup %3227  ;;  %v1405_v33 = vsel %vm5449_vm8, %v3226_v56, 0.0  ;;  %v6555_v12 = vld [vmem:[#allocation84_spill] sm:$0xff]  ;;  %vm6558_vm14 = vcmp.ne.s32.totalorder %v6557_v36, %v6479_v53 }
 0x25e   :  { %v1092_v39 = vpop.permute.xlu1 %1091  ;;  %v3230_v40 = vpop.eup %3229  ;;  %v1406_v5 = vsel %vm718_vm13, %v3228_v18, 0.0  ;;  %vm5490_vm9 = vmand %vm6558_vm14, %vm717_vm3 }
 0x25f   :  { %v1307_v59 = vmul.f32 1.442695, %v1221_v57  ;;  %v1309_v6 = vmul.f32 1.442695, %v1222_v19  ;;  %v1219_v47 = vsub.f32 %v4717_v34, %v1092_v39  ;;  %v1220_v38 = vsub.f32 %v4729_v62, %v1092_v39  ;;  %v3232_v20 = vpop.eup %3231 }
 0x260   :  { %v1177_v61 = vpop.permute.xlu0 %1176  ;;  %v3234_v1 = vpop.eup %3233  ;;  %v1540_v41 = vadd.f32 %v1406_v5, %v1405_v33  ;;  %v1438_v57 = vsel %vm5462_vm10, %v3224_v30, 0.0  ;;  %v6561_v30 = vld [vmem:[#allocation35_spill] sm:$0xff]  ;;  %v1409_v28 = vsel %vm5490_vm9, %v3230_v40, 0.0  ;;  %v1410_v15 = vsel %vm718_vm13, %v3232_v20, 0.0 }
 0x261   :  { %3245 = vpow2.f32 %v1307_v59  ;;  %v1303_v34 = vmul.f32 1.442695, %v1219_v47  ;;  %v1305_v9 = vmul.f32 1.442695, %v1220_v38  ;;  %v1253_v62 = vsub.f32 %v4749_v48, %v1177_v61  ;;  %1538 = vadd.xlane.f32.xlu0 %v1537_v16  ;;  %v3236_v19 = vpop.eup %3235  ;;  %v6565_v38 = vld [vmem:[#allocation37_spill] sm:$0xff]  ;;  %v6578_v59 = vld [vmem:[#allocation87_spill] sm:$0xff] }
 0x262   :  { %3247 = vpow2.f32 %v1309_v6  ;;  %v1254_v13 = vsub.f32 %v4761_v52, %v1177_v61  ;;  %v1172_v11 = vpop.permute.xlu1 %1171  ;;  %v1407_v50 = vsel %vm5472_vm11, %v3234_v1, 0.0  ;;  %v3238_v44 = vpop.eup %3237  ;;  %vm6562_vm15 = vcmp.ne.s32.totalorder %v6561_v30, %v6485_v3  ;;  %1541 = vadd.xlane.f32.xlu1 %v1540_v41 }
 0x263   :  { %3249 = vpow2.f32 %v1303_v34  ;;  %v1371_v27 = vmul.f32 1.442695, %v1253_v62  ;;  %v1251_v14 = vsub.f32 %v6555_v12, %v1172_v11  ;;  %v1252_v37 = vsub.f32 %v6556_v0, %v1172_v11  ;;  %vm5501_vm2 = vmand %vm6562_vm15, %vm718_vm13  ;;  %v3240_v47 = vpop.eup %3239 }
 0x264   :  { %3251 = vpow2.f32 %v1305_v9  ;;  %v1373_v49 = vmul.f32 1.442695, %v1254_v13  ;;  %v1408_v6 = vsel %vm718_vm13, %v3236_v19, 0.0  ;;  %vm6566_vm0 = vcmp.ne.s32.totalorder %v6565_v38, %v6485_v3 }
 0x265   :  { %3253 = vpow2.f32 %v1371_v27  ;;  %v1367_v16 = vmul.f32 1.442695, %v1251_v14  ;;  %v1369_v42 = vmul.f32 1.442695, %v1252_v37  ;;  %1586 = vadd.xlane.f32.xlu0 %v1585_v29  ;;  %vm5512_vm8 = vmand %vm6566_vm0, %vm718_vm13  ;;  %v1543_v61 = vadd.f32 %v1408_v6, %v1407_v50  ;;  %v3242_v29 = vpop.eup %3241  ;;  %v6569_v37 = vld [vmem:[#allocation20_spill] sm:$0xff] }
 0x266   :  { %3255 = vpow2.f32 %v1373_v49  ;;  %v1588_v18 = vadd.f32 %v1438_v57, %v1437_v7  ;;  %v3244_v34 = vpop.eup %3243  ;;  %v1439_v10 = vsel %vm717_vm3, %v3242_v29, 0.0  ;;  %v1441_v40 = vsel %vm717_vm3, %v3238_v44, 0.0  ;;  %v6577_v44 = vld [vmem:[#allocation86_spill] sm:$0xff] }
 0x267   :  { %3257 = vpow2.f32 %v1367_v16  ;;  %v1440_v7 = vsel %vm5501_vm2, %v3244_v34, 0.0  ;;  %v1546_v20 = vadd.f32 %v1410_v15, %v1409_v28  ;;  %vm6570_vm7 = vcmp.ne.s32.totalorder %v6569_v37, %v6479_v53 }
 0x268   :  { %3259 = vpow2.f32 %v1369_v42  ;;  %v1107_v60 = vpop.permute.xlu0 %1106  ;;  %1589 = vadd.xlane.f32.xlu1 %v1588_v18  ;;  %v1591_v14 = vadd.f32 %v1440_v7, %v1439_v10  ;;  %vm5537_vm10 = vmand %vm6570_vm7, %vm717_vm3 }
 0x269   :  { %v1225_v9 = vsub.f32 %v4785_v32, %v1107_v60  ;;  %v1226_v62 = vsub.f32 %v4797_v8, %v1107_v60  ;;  %1544 = vadd.xlane.f32.xlu0 %v1543_v61  ;;  %v1442_v32 = vsel %vm5512_vm8, %v3240_v47, 0.0 }
 0x26a   :  { %v1102_v13 = vpop.permute.xlu1 %1101  ;;  %v1594_v16 = vadd.f32 %v1442_v32, %v1441_v40 }
 0x26b   :  { %v1315_v11 = vmul.f32 1.442695, %v1225_v9  ;;  %v1317_v8 = vmul.f32 1.442695, %v1226_v62  ;;  %v1223_v33 = vsub.f32 %v4763_v58, %v1102_v13  ;;  %v1224_v5 = vsub.f32 %v4777_v24, %v1102_v13  ;;  %v6573_v24 = vld [vmem:[#allocation19_spill] sm:$0xff]  ;;  %v6583_v13 = vld [vmem:[#allocation41_spill] sm:$0xff] }
 0x26c   :  { %v1187_v27 = vpop.permute.xlu0 %1186  ;;  %vm6574_vm1 = vcmp.ne.s32.totalorder %v6573_v24, %v6479_v53  ;;  %1547 = vadd.xlane.f32.xlu1 %v1546_v20  ;;  %v6579_v9 = vld [vmem:[#allocation43_spill] sm:$0xff]  ;;  %vm6584_vm15 = vcmp.ne.s32.totalorder %v6583_v13, %v6485_v3 }
 0x26d   :  { %3261 = vpow2.f32 %v1315_v11  ;;  %v1311_v49 = vmul.f32 1.442695, %v1223_v33  ;;  %v1313_v41 = vmul.f32 1.442695, %v1224_v5  ;;  %v1257_v57 = vsub.f32 %v4795_v63, %v1187_v27  ;;  %vm5547_vm11 = vmand %vm6574_vm1, %vm717_vm3  ;;  %1592 = vadd.xlane.f32.xlu0 %v1591_v14 }
 0x26e   :  { %v3246_v58 = vpop.eup %3245  ;;  %3263 = vpow2.f32 %v1317_v8  ;;  %v1258_v36 = vsub.f32 %v4809_v4, %v1187_v27  ;;  %v1182_v39 = vpop.permute.xlu1 %1181  ;;  %vm6580_vm14 = vcmp.ne.s32.totalorder %v6579_v9, %v6485_v3  ;;  %vm5576_vm2 = vmand %vm6584_vm15, %vm718_vm13 }
 0x26f   :  { %v3248_v42 = vpop.eup %3247  ;;  %3265 = vpow2.f32 %v1311_v49  ;;  %v1379_v50 = vmul.f32 1.442695, %v1257_v57  ;;  %v1255_v30 = vsub.f32 %v6577_v44, %v1182_v39  ;;  %v1256_v6 = vsub.f32 %v6578_v59, %v1182_v39  ;;  %vm5565_vm9 = vmand %vm6580_vm14, %vm718_vm13 }
 0x270   :  { %v3250_v47 = vpop.eup %3249  ;;  %3267 = vpow2.f32 %v1313_v41  ;;  %v1381_v38 = vmul.f32 1.442695, %v1258_v36  ;;  %v1413_v56 = vsel %vm5537_vm10, %v3246_v58, 0.0  ;;  %v1414_v61 = vsel %vm718_vm13, %v3248_v42, 0.0  ;;  %1595 = vadd.xlane.f32.xlu1 %v1594_v16  ;;  %v6587_v41 = vld [vmem:[#allocation22_spill] sm:$0xff]  ;;  %vm5619_vm1 = vmand %vm701_vm4, %vm718_vm13 }
 0x271   :  { %v3252_v29 = vpop.eup %3251  ;;  %3269 = vpow2.f32 %v1379_v50  ;;  %v1375_v18 = vmul.f32 1.442695, %v1255_v30  ;;  %v1377_v60 = vmul.f32 1.442695, %v1256_v6  ;;  %v1411_v28 = vsel %vm5547_vm11, %v3250_v47, 0.0  ;;  %vm780_vm15 = vmand %vm703_vm12, %vm718_vm13 }
 0x272   :  { %v3254_v34 = vpop.eup %3253  ;;  %3271 = vpow2.f32 %v1381_v38  ;;  %v1412_v15 = vsel %vm718_vm13, %v3252_v29, 0.0  ;;  %v1552_v11 = vadd.f32 %v1414_v61, %v1413_v56  ;;  %vm6588_vm0 = vcmp.ne.s32.totalorder %v6587_v41, %v6479_v53 }
 0x273   :  { %v3256_v10 = vpop.eup %3255  ;;  %3273 = vpow2.f32 %v1375_v18  ;;  %v1549_v40 = vadd.f32 %v1412_v15, %v1411_v28  ;;  %v1445_v5 = vsel %vm717_vm3, %v3254_v34, 0.0  ;;  %vm5595_vm8 = vmand %vm6588_vm0, %vm717_vm3  ;;  %v6598_v15 = vld [vmem:[#allocation47_spill] sm:$0xff] }
 0x274   :  { %v3258_v32 = vpop.eup %3257  ;;  %3275 = vpow2.f32 %v1377_v60  ;;  %v1446_v20 = vsel %vm5565_vm9, %v3256_v10, 0.0  ;;  %1553 = vadd.xlane.f32.xlu1 %v1552_v11  ;;  %vm6599_vm11 = vcmp.ne.s32.totalorder %v6598_v15, %v6485_v3  ;;  %vm782_vm0 = vmand %vm705_vm6, %vm718_vm13  ;;  %v6626_v3 = vld [vmem:[#allocation40_spill] sm:$0xff] }
 0x275   :  { %v3260_v8 = vpop.eup %3259  ;;  %1550 = vadd.xlane.f32.xlu0 %v1549_v40  ;;  %v1443_v33 = vsel %vm717_vm3, %v3258_v32, 0.0  ;;  %v1600_v58 = vadd.f32 %v1446_v20, %v1445_v5  ;;  %vm776_vm4 = vmand %vm6599_vm11, %vm718_vm13  ;;  %v6600_v20 = vld [vmem:[#allocation23_spill] sm:$0xff] }
 0x276   :  { %v1112_v27 = vpop.permute.xlu1 %1111  ;;  %v1444_v14 = vsel %vm5576_vm2, %v3260_v8, 0.0  ;;  %vm6601_vm14 = vcmp.ne.s32.totalorder %v6600_v20, %v6479_v53 }
 0x277   :  { %v1227_v37 = vsub.f32 %v4811_v22, %v1112_v27  ;;  %v1228_v1 = vsub.f32 %v4819_v25, %v1112_v27  ;;  %v1597_v49 = vadd.f32 %v1444_v14, %v1443_v33  ;;  %v6591_v22 = vld [vmem:[#allocation21_spill] sm:$0xff]  ;;  %vm747_vm9 = vmand %vm6601_vm14, %vm717_vm3 }
 0x278   :  { %vm6592_vm7 = vcmp.ne.s32.totalorder %v6591_v22, %v6479_v53  ;;  %1601 = vadd.xlane.f32.xlu1 %v1600_v58 }
 0x279   :  { %v1319_v24 = vmul.f32 1.442695, %v1227_v37  ;;  %v1321_v19 = vmul.f32 1.442695, %v1228_v1  ;;  %1598 = vadd.xlane.f32.xlu0 %v1597_v49  ;;  %vm5604_vm10 = vmand %vm6592_vm7, %vm717_vm3 }
 0x27a   :  { %v3262_v36 = vpop.eup %3261  ;;  %v1192_v39 = vpop.permute.xlu1 %1191 }
 0x27b   :  { %v3264_v16 = vpop.eup %3263  ;;  %3277 = vpow2.f32 %v1319_v24  ;;  %v1259_v42 = vsub.f32 %v4817_v54, %v1192_v39  ;;  %v1260_v50 = vsub.f32 %v4829_v51, %v1192_v39  ;;  %v1417_v30 = vsel %vm5595_vm8, %v3262_v36, 0.0  ;;  %v6603_v36 = vld [vmem:[#allocation39_spill] sm:$0xff]  ;;  %v6604_v39 = vld [vmem:[#allocation38_spill] sm:$0xff] }
 0x27c   :  { %v3266_v6 = vpop.eup %3265  ;;  %3279 = vpow2.f32 %v1321_v19  ;;  %v1418_v47 = vsel %vm718_vm13, %v3264_v16, 0.0  ;;  %v2182_v22 = vmul.f32 %v6603_v36, %v6515_v2  ;;  %v2181_v16 = vmul.f32 %v6604_v39, %v6510_v31  ;;  %v6608_v2 = vld [vmem:[#allocation50_spill] sm:$0xff]  ;;  %v6622_v39 = vld [vmem:[#allocation24_spill] sm:$0xff] }
 0x27d   :  { %v3268_v38 = vpop.eup %3267  ;;  %v1383_v29 = vmul.f32 1.442695, %v1259_v42  ;;  %v1385_v18 = vmul.f32 1.442695, %v1260_v50  ;;  %v1558_v60 = vadd.f32 %v1418_v47, %v1417_v30  ;;  %v1415_v28 = vsel %vm5604_vm10, %v3266_v6, 0.0  ;;  %v6605_v42 = vld [vmem:[#allocation45_spill] sm:$0xff] }
 0x27e   :  { %v3270_v34 = vpop.eup %3269  ;;  %v1416_v9 = vsel %vm718_vm13, %v3268_v38, 0.0  ;;  %v2186_v50 = vmul.f32 %v6605_v42, %v6538_v26  ;;  %v2267_v30 = vadd.f32 %v2182_v22, %v2181_v16  ;;  %v6606_v6 = vld [vmem:[#allocation44_spill] sm:$0xff]  ;;  %v6607_v38 = vld [vmem:[#allocation51_spill] sm:$0xff]  ;;  %vm6623_vm12 = vcmp.ne.s32.totalorder %v6622_v39, %v6479_v53 }
 0x27f   :  { %v3272_v62 = vpop.eup %3271  ;;  %3281 = vpow2.f32 %v1383_v29  ;;  %1559 = vadd.xlane.f32.xlu1 %v1558_v60  ;;  %v1555_v10 = vadd.f32 %v1416_v9, %v1415_v28  ;;  %v1449_v13 = vsel %vm717_vm3, %v3270_v34, 0.0  ;;  %v2185_v47 = vmul.f32 %v6606_v6, %v6533_v46  ;;  %v2125_v29 = vld [vmem:[#allocation4 + $0xa0] sm:$0xff]  ;;  %v6609_v28 = vld [vmem:[#allocation57_spill] sm:$0xff]  ;;  %v6610_v46 = vld [vmem:[#allocation56_spill] sm:$0xff] }
 0x280   :  { %v3274_v7 = vpop.eup %3273  ;;  %3283 = vpow2.f32 %v1385_v18  ;;  %v1450_v40 = vsel %vm5619_vm1, %v3272_v62, 0.0  ;;  %v2190_v56 = vmul.f32 %v6607_v38, %v6556_v0  ;;  %v2189_v18 = vmul.f32 %v6608_v2, %v6555_v12  ;;  %v6611_v0 = vld [vmem:[#allocation61_spill] sm:$0xff]  ;;  %v2126_v22 = vld [vmem:[#allocation4 + $0xa8] sm:$0xff]  ;;  %vm749_vm2 = vmand %vm6623_vm12, %vm717_vm3 }
 0x281   :  { %v3276_v32 = vpop.eup %3275  ;;  %1556 = vadd.xlane.f32.xlu0 %v1555_v10  ;;  %v1606_v11 = vadd.f32 %v1450_v40, %v1449_v13  ;;  %v1447_v8 = vsel %vm717_vm3, %v3274_v7, 0.0  ;;  %v2273_v61 = vadd.f32 %v2186_v50, %v2185_v47  ;;  %v2194_v34 = vmul.f32 %v6609_v28, %v6578_v59  ;;  %v6612_v10 = vld [vmem:[#allocation60_spill] sm:$0xff]  ;;  %v6613_v40 = vld [vmem:[#allocation89_spill] sm:$0xff] }
 0x282   :  { %v1448_v33 = vsel %vm776_vm4, %v3276_v32, 0.0  ;;  %v2279_v26 = vadd.f32 %v2190_v56, %v2189_v18  ;;  %v2193_v9 = vmul.f32 %v6610_v46, %v6577_v44  ;;  %v2198_v62 = vmul.f32 %v6611_v0, %v4829_v51  ;;  %v6617_v51 = vld [vmem:[#allocation88_spill] sm:$0xff]  ;;  %v6627_v0 = vld [vmem:[#allocation93_spill] sm:$0xff] }
 0x283   :  { %1607 = vadd.xlane.f32.xlu1 %v1606_v11  ;;  %v1603_v5 = vadd.f32 %v1448_v33, %v1447_v8  ;;  %v2197_v12 = vmul.f32 %v6612_v10, %v4817_v54  ;;  %v6614_v33 = vld [vmem:[#allocation91_spill] sm:$0xff] }
 0x284   :  { %v2285_v15 = vadd.f32 %v2194_v34, %v2193_v9  ;;  %v2183_v9 = vmul.f32 %v6626_v3, %v4673_v55 }
 0x285   :  { %1604 = vadd.xlane.f32.xlu0 %v1603_v5  ;;  %v2291_v32 = vadd.f32 %v2198_v62, %v2197_v12  ;;  %v6615_v5 = vld [vmem:[#allocation92_spill] sm:$0xff]  ;;  %v6628_v62 = vld [vmem:[#allocation95_spill] sm:$0xff] }
 0x286   :  { %v6616_v44 = vsub.f32 %v6614_v33, %v6615_v5  ;;  %v1472_v12 = vld [vmem:[#allocation3 + $0x88] sm:$0xff] }
 0x288   :  { %v3278_v27 = vpop.eup %3277  ;;  %v975_v20 = vmul.f32 1.442695, %v6616_v44  ;;  %v6637_v44 = vld [vmem:[#allocation46_spill] sm:$0xff] }
 0x289   :  { %v3280_v14 = vpop.eup %3279  ;;  %v1419_v37 = vsel %vm747_vm9, %v3278_v27, 0.0 }
 0x28a   :  { %v1420_v1 = vsel %vm718_vm13, %v3280_v14, 0.0 }
 0x28b   :  { %v1561_v41 = vadd.f32 %v1420_v1, %v1419_v37  ;;  %v6618_v37 = vld [vmem:[#allocation90_spill] sm:$0xff] }
 0x28c   :  { %v3282_v57 = vpop.eup %3281 }
 0x28d   :  { %v3284_v58 = vpop.eup %3283  ;;  %1562 = vadd.xlane.f32.xlu0 %v1561_v41  ;;  %v1451_v24 = vsel %vm717_vm3, %v3282_v57, 0.0  ;;  %v6619_v41 = vld [vmem:[#allocation94_spill] sm:$0xff]  ;;  %v6620_v57 = vld [vmem:[#allocation96_spill] sm:$0xff] }
 0x28e   :  { %v1452_v19 = vsel %vm780_vm15, %v3284_v58, 0.0  ;;  %v6621_v58 = vsub.f32 %v6619_v41, %v6620_v57  ;;  %v5722_v41 = vld [vmem:[#allocation5] sm:$0xff] }
 0x28f   :  { %v1609_v25 = vadd.f32 %v1452_v19, %v1451_v24  ;;  %v6641_v57 = vld [vmem:[#allocation54_spill] sm:$0xff] }
 0x290   :  { %v1009_v24 = vmul.f32 1.442695, %v6621_v58  ;;  %v2192_v58 = vmul.f32 %v6641_v57, %v4761_v52  ;;  %v6644_v52 = vld [vmem:[#allocation100_spill] sm:$0xff]  ;;  %v1456_v57 = vld [vmem:[#allocation3 + $0x8] sm:$0xff] }
 0x291   :  { %1610 = vadd.xlane.f32.xlu0 %v1609_v25 }
 0x295   :  { %2268 = vadd.xlane.f32.xlu0 %v2267_v30 }
 0x299   :  { %2274 = vadd.xlane.f32.xlu0 %v2273_v61  ;;  %v2263_v60 = vpop.xlane.xlu0 %2262  ;;  %v1455_v61 = vld [vmem:[#allocation3] sm:$0xff] }
 0x29a   :  { %v2317_v31 = vadd.f32 %v2263_v60, %v2125_v29 }
 0x29c   :  { %2349 = vst.msk [vmem:[#allocation4 + $0xa0] sm:$0xff] %vm22_vm5, %v2317_v31  ;;  %v6625_v31 = vld [vmem:[#allocation42_spill] sm:$0xff] }
 0x29d   :  { %2280 = vadd.xlane.f32.xlu0 %v2279_v26  ;;  %v2184_v28 = vmul.f32 %v6625_v31, %v4679_v21  ;;  %v6633_v21 = vld [vmem:[#allocation48_spill] sm:$0xff]  ;;  %v6649_v31 = vld [vmem:[#allocation105_spill] sm:$0xff] }
 0x2a1   :  { %2286 = vadd.xlane.f32.xlu0 %v2285_v15  ;;  %v1117_v13 = vpop.permute.xlu0 %1116  ;;  %v6629_v15 = vsub.f32 %v6627_v0, %v6628_v62  ;;  %v6652_v0 = vld [vmem:[#allocation62_spill] sm:$0xff] }
 0x2a2   :  { %v1229_v7 = vsub.f32 %v4831_v17, %v1117_v13  ;;  %v1230_v59 = vsub.f32 %v6613_v40, %v1117_v13  ;;  %v2124_v17 = vld [vmem:[#allocation4 + $0x98] sm:$0xff]  ;;  %v6631_v13 = vld [vmem:[#allocation103_spill] sm:$0xff]  ;;  %v2199_v62 = vmul.f32 %v6652_v0, %v6617_v51 }
 0x2a3   :  { %v1007_v10 = vmul.f32 1.442695, %v6629_v15  ;;  %v5760_v15 = vld [vmem:[#allocation5 + $0x88] sm:$0xff] }
 0x2a4   :  { %v1323_v11 = vmul.f32 1.442695, %v1229_v7  ;;  %v1325_v8 = vmul.f32 1.442695, %v1230_v59  ;;  %v6632_v7 = vsub.f32 %v6630_v45, %v6631_v13  ;;  %v2188_v59 = vmul.f32 %v6633_v21, %v4715_v43  ;;  %v6653_v45 = vld [vmem:[#allocation108_spill] sm:$0xff] }
 0x2a5   :  { %2292 = vadd.xlane.f32.xlu0 %v2291_v32  ;;  %v1197_v27 = vpop.permute.xlu0 %1196  ;;  %v2270_v32 = vadd.f32 %v2184_v28, %v2183_v9 }
 0x2a6   :  { %3285 = vpow2.f32 %v1323_v11  ;;  %v1261_v14 = vsub.f32 %v6617_v51, %v1197_v27  ;;  %v1262_v54 = vsub.f32 %v6618_v37, %v1197_v27  ;;  %v981_v40 = vmul.f32 1.442695, %v6632_v7  ;;  %v6634_v11 = vld [vmem:[#allocation97_spill] sm:$0xff]  ;;  %v5717_v27 = vld [vmem:[#allocation5 + $0x8] sm:$0xff]  ;;  %v1471_v51 = vld [vmem:[#allocation3 + $0x80] sm:$0xff] }
 0x2a7   :  { %3287 = vpow2.f32 %v1325_v8  ;;  %v6635_v8 = vld [vmem:[#allocation99_spill] sm:$0xff] }
 0x2a8   :  { %v1387_v1 = vmul.f32 1.442695, %v1261_v14  ;;  %v1389_v49 = vmul.f32 1.442695, %v1262_v54  ;;  %3289 = vpow2.f32 %v975_v20  ;;  %v6636_v33 = vsub.f32 %v6634_v11, %v6635_v8  ;;  %v6638_v14 = vld [vmem:[#allocation104_spill] sm:$0xff]  ;;  %v6639_v54 = vld [vmem:[#allocation106_spill] sm:$0xff] }
 0x2a9   :  { %v2187_v20 = vmul.f32 %v6637_v44, %v4707_v35  ;;  %v5727_v35 = vld [vmem:[#allocation5 + $0x10] sm:$0xff] }
 0x2aa   :  { %3291 = vpow2.f32 %v1387_v1  ;;  %v977_v55 = vmul.f32 1.442695, %v6636_v33  ;;  %v6640_v1 = vsub.f32 %v6638_v14, %v6639_v54  ;;  %v1458_v33 = vld [vmem:[#allocation3 + $0x18] sm:$0xff]  ;;  %v6659_v14 = vld [vmem:[#allocation112_spill] sm:$0xff]  ;;  %v6660_v54 = vld [vmem:[#allocation114_spill] sm:$0xff] }
 0x2ab   :  { %3293 = vpow2.f32 %v1389_v49 }
 0x2ac   :  { %v2260_v19 = vpop.xlane.xlu1 %2259  ;;  %3295 = vpow2.f32 %v1009_v24  ;;  %v1013_v49 = vmul.f32 1.442695, %v6640_v1  ;;  %v2276_v24 = vadd.f32 %v2188_v59, %v2187_v20  ;;  %v6656_v59 = vld [vmem:[#allocation107_spill] sm:$0xff]  ;;  %v6661_v1 = vsub.f32 %v6659_v14, %v6660_v54 }
 0x2ad   :  { %v2316_v36 = vadd.f32 %v2260_v19, %v2124_v17  ;;  %3297 = vpow2.f32 %v1007_v10  ;;  %v2845_v19 = vmax.f32 %v5717_v27, 1.0 }
 0x2ae   :  { %3299 = vpow2.f32 %v981_v40 }
 0x2af   :  { %2348 = vst.msk [vmem:[#allocation4 + $0x98] sm:$0xff] %vm22_vm5, %v2316_v36  ;;  %3301 = vpow2.f32 %v977_v55  ;;  %v2844_v36 = vmax.f32 %v5722_v41, 1.0  ;;  %v2861_v55 = vmax.f32 %v5760_v15, 1.0 }
 0x2b0   :  { %v2266_v25 = vpop.xlane.xlu1 %2265  ;;  %3303 = vpow2.f32 %v1013_v49  ;;  %v1015_v49 = vmul.f32 1.442695, %v6661_v1 }
 0x2b1   :  { %v2318_v16 = vadd.f32 %v2266_v25, %v2126_v22  ;;  %v6642_v22 = vld [vmem:[#allocation52_spill] sm:$0xff] }
 0x2b2   :  { %v2191_v25 = vmul.f32 %v6642_v22, %v4749_v48 }
 0x2b3   :  { %v3286_v42 = vpop.eup %3285  ;;  %2350 = vst.msk [vmem:[#allocation4 + $0xa8] sm:$0xff] %vm22_vm5, %v2318_v16  ;;  %v5733_v16 = vld [vmem:[#allocation5 + $0x18] sm:$0xff] }
 0x2b4   :  { %v3288_v50 = vpop.eup %3287  ;;  %v1421_v30 = vsel %vm749_vm2, %v3286_v42, 0.0  ;;  %v1521_v34 = vpop.xlane.xlu1 %1520  ;;  %v6643_v42 = vld [vmem:[#allocation98_spill] sm:$0xff]  ;;  %v2847_v48 = vmax.f32 %v5733_v16, 1.0 }
 0x2b5   :  { %v1422_v6 = vsel %vm718_vm13, %v3288_v50, 0.0  ;;  %v3290_v47 = vpop.eup %3289  ;;  %v6645_v50 = vsub.f32 %v6643_v42, %v6644_v52  ;;  %v1474_v42 = vld [vmem:[#allocation3 + $0x98] sm:$0xff] }
 0x2b6   :  { %v1564_v56 = vadd.f32 %v1422_v6, %v1421_v30  ;;  %v1487_v18 = vmul.f32 %v3290_v47, %v1455_v61  ;;  %v2846_v6 = vmax.f32 %v5727_v35, 1.0  ;;  %v6646_v47 = vld [vmem:[#allocation59_spill] sm:$0xff]  ;;  %v5741_v61 = vld [vmem:[#allocation5 + $0x20] sm:$0xff] }
 0x2b7   :  { %v3292_v53 = vpop.eup %3291  ;;  %v979_v30 = vmul.f32 1.442695, %v6645_v50  ;;  %v2196_v38 = vmul.f32 %v6646_v47, %v4809_v4  ;;  %v2556_v47 = vld [vmem:[#allocation2] sm:$0xff] }
 0x2b8   :  { %v3294_v29 = vpop.eup %3293  ;;  %1565 = vadd.xlane.f32.xlu1 %v1564_v56  ;;  %v1453_v2 = vsel %vm717_vm3, %v3292_v53, 0.0  ;;  %v1615_v23 = vadd.f32 %v1521_v34, %v1487_v18  ;;  %v1572_v17 = vpop.xlane.xlu1 %1571  ;;  %v2282_v56 = vadd.f32 %v2192_v58, %v2191_v25  ;;  %v5744_v53 = vld [vmem:[#allocation5 + $0x28] sm:$0xff]  ;;  %v5748_v18 = vld [vmem:[#allocation5 + $0x30] sm:$0xff]  ;;  %v2848_v34 = vmax.f32 %v5741_v61, 1.0 }
 0x2b9   :  { %v1454_v60 = vsel %vm782_vm0, %v3294_v29, 0.0  ;;  %v3296_v46 = vpop.eup %3295  ;;  %v6647_v29 = vld [vmem:[#allocation58_spill] sm:$0xff]  ;;  %v2849_v9 = vmax.f32 %v5744_v53, 1.0 }
 0x2ba   :  { %v1612_v26 = vadd.f32 %v1454_v60, %v1453_v2  ;;  %1648 = vst.msk [vmem:[#allocation3] sm:$0xff] %vm22_vm5, %v1615_v23  ;;  %v1504_v5 = vmul.f32 %v3296_v46, %v1472_v12  ;;  %v2195_v2 = vmul.f32 %v6647_v29, %v4795_v63  ;;  %v6648_v60 = vld [vmem:[#allocation102_spill] sm:$0xff]  ;;  %v2850_v63 = vmax.f32 %v5748_v18, 1.0  ;;  %v3298_v10 = vpop.eup %3297  ;;  %v5762_v12 = vld [vmem:[#allocation5 + $0x38] sm:$0xff] }
 0x2bb   :  { %v6650_v28 = vsub.f32 %v6648_v60, %v6649_v31  ;;  %v3300_v40 = vpop.eup %3299  ;;  %v2851_v44 = vmax.f32 %v5762_v12, 1.0  ;;  %v6668_v31 = vld [vmem:[#allocation116_spill] sm:$0xff] }
 0x2bc   :  { %1613 = vadd.xlane.f32.xlu1 %v1612_v26  ;;  %v1632_v43 = vadd.f32 %v1572_v17, %v1504_v5  ;;  %v6651_v26 = vld [vmem:[#allocation63_spill] sm:$0xff]  ;;  %v2288_v3 = vadd.f32 %v2196_v38, %v2195_v2  ;;  %v3302_v5 = vpop.eup %3301  ;;  %v1490_v17 = vmul.f32 %v3300_v40, %v1458_v33  ;;  %v6675_v40 = vld [vmem:[#allocation122_spill] sm:$0xff] }
 0x2bd   :  { %v1011_v4 = vmul.f32 1.442695, %v6650_v28  ;;  %v2200_v23 = vmul.f32 %v6651_v26, %v6618_v37  ;;  %v6654_v37 = vld [vmem:[#allocation111_spill] sm:$0xff]  ;;  %v3304_v20 = vpop.eup %3303  ;;  %v1488_v2 = vmul.f32 %v3302_v5, %v1456_v57  ;;  %v6678_v5 = vld [vmem:[#allocation125_spill] sm:$0xff] }
 0x2be   :  { %1665 = vst.msk [vmem:[#allocation3 + $0x88] sm:$0xff] %vm22_vm5, %v1632_v43  ;;  %v6655_v13 = vsub.f32 %v6653_v45, %v6654_v37  ;;  %v1503_v43 = vmul.f32 %v3298_v10, %v1471_v51  ;;  %v6665_v38 = vld [vmem:[#allocation115_spill] sm:$0xff]  ;;  %v1457_v45 = vld [vmem:[#allocation3 + $0x10] sm:$0xff]  ;;  %v2748_v51 = vld [vmem:[#allocation4] sm:$0xff] }
 0x2bf   :  { %v2294_v21 = vadd.f32 %v2200_v23, %v2199_v62  ;;  %v6669_v28 = vld [vmem:[#allocation119_spill] sm:$0xff]  ;;  %v1506_v23 = vmul.f32 %v3304_v20, %v1474_v42  ;;  %v6680_v42 = vld [vmem:[#allocation124_spill] sm:$0xff] }
 0x2c0   :  { %2271 = vadd.xlane.f32.xlu1 %v2270_v32  ;;  %v983_v7 = vmul.f32 1.442695, %v6655_v13  ;;  %v6657_v32 = vld [vmem:[#allocation109_spill] sm:$0xff]  ;;  %v5793_v13 = vld [vmem:[#allocation5 + $0x80] sm:$0xff] }
 0x2c1   :  { %v2588_v39 = vld [vmem:[#allocation3] sm:$0xff]  ;;  %v6658_v11 = vsub.f32 %v6656_v59, %v6657_v32 }
 0x2c2   :  { %3305 = vlog2.f32 %v2588_v39 }
 0x2c3   :  { %3307 = vrcp.f32 %v2845_v19  ;;  %v985_v8 = vmul.f32 1.442695, %v6658_v11  ;;  %v6663_v19 = vld [vmem:[#allocation113_spill] sm:$0xff] }
 0x2c4   :  { %2277 = vadd.xlane.f32.xlu1 %v2276_v24  ;;  %3309 = vrcp.f32 %v2844_v36  ;;  %v6662_v24 = vld [vmem:[#allocation110_spill] sm:$0xff] }
 0x2c5   :  { %3311 = vpow2.f32 %v979_v30  ;;  %v2605_v46 = vld [vmem:[#allocation3 + $0x88] sm:$0xff]  ;;  %v6664_v36 = vsub.f32 %v6662_v24, %v6663_v19 }
 0x2c6   :  { %3313 = vrcp.f32 %v2846_v6 }
 0x2c7   :  { %3315 = vlog2.f32 %v2605_v46  ;;  %v1017_v22 = vmul.f32 1.442695, %v6664_v36 }
 0x2c8   :  { %2283 = vadd.xlane.f32.xlu1 %v2282_v56  ;;  %3317 = vrcp.f32 %v2847_v48  ;;  %v6666_v56 = vld [vmem:[#allocation117_spill] sm:$0xff] }
 0x2c9   :  { %3319 = vpow2.f32 %v1011_v4  ;;  %v6667_v48 = vsub.f32 %v6665_v38, %v6666_v56  ;;  %v6670_v4 = vsub.f32 %v6668_v31, %v6669_v28  ;;  %v2765_v28 = vld [vmem:[#allocation4 + $0x88] sm:$0xff] }
 0x2ca   :  { %3321 = vrcp.f32 %v2848_v34  ;;  %v1530_v25 = vpop.xlane.xlu1 %1529 }
 0x2cb   :  { %3323 = vrcp.f32 %v2849_v9  ;;  %v1618_v50 = vadd.f32 %v1530_v25, %v1490_v17  ;;  %v989_v29 = vmul.f32 1.442695, %v6667_v48  ;;  %v987_v34 = vmul.f32 1.442695, %v6670_v4  ;;  %v6672_v9 = vld [vmem:[#allocation121_spill] sm:$0xff] }
 0x2cc   :  { %2289 = vadd.xlane.f32.xlu1 %v2288_v3  ;;  %3325 = vrcp.f32 %v2850_v63  ;;  %v6671_v3 = vld [vmem:[#allocation118_spill] sm:$0xff]  ;;  %v2860_v17 = vmax.f32 %v5793_v13, 1.0  ;;  %v5818_v48 = vld [vmem:[#allocation5 + $0x98] sm:$0xff] }
 0x2cd   :  { %3327 = vpow2.f32 %v983_v7  ;;  %1651 = vst.msk [vmem:[#allocation3 + $0x18] sm:$0xff] %vm22_vm5, %v1618_v50  ;;  %v6673_v63 = vsub.f32 %v6671_v3, %v6672_v9  ;;  %v6674_v7 = vld [vmem:[#allocation120_spill] sm:$0xff]  ;;  %v1460_v3 = vld [vmem:[#allocation3 + $0x28] sm:$0xff] }
 0x2ce   :  { %3329 = vpow2.f32 %v985_v8  ;;  %v1578_v62 = vpop.xlane.xlu1 %1577 }
 0x2cf   :  { %v3306_v58 = vpop.eup %3305  ;;  %3331 = vrcp.f32 %v2861_v55  ;;  %v1021_v0 = vmul.f32 1.442695, %v6673_v63  ;;  %v1634_v11 = vadd.f32 %v1578_v62, %v1506_v23  ;;  %v6677_v55 = vld [vmem:[#allocation123_spill] sm:$0xff]  ;;  %v2863_v63 = vmax.f32 %v5818_v48, 1.0 }
 0x2d0   :  { %2295 = vadd.xlane.f32.xlu1 %v2294_v21  ;;  %v2621_v52 = vmul.f32 0.6931472, %v3306_v58  ;;  %v5778_v6 = vpop.eup %3307  ;;  %3333 = vrcp.f32 %v2851_v44  ;;  %v6676_v21 = vsub.f32 %v6674_v7, %v6675_v40  ;;  %v6679_v44 = vsub.f32 %v6677_v55, %v6678_v5  ;;  %v1473_v58 = vld [vmem:[#allocation3 + $0x90] sm:$0xff]  ;;  %v1475_v55 = vld [vmem:[#allocation3 + $0xa0] sm:$0xff] }
 0x2d1   :  { %v3310_v60 = vpop.eup %3309  ;;  %3335 = vpow2.f32 %v1015_v49  ;;  %1667 = vst.msk [vmem:[#allocation3 + $0x98] sm:$0xff] %vm22_vm5, %v1634_v11 }
 0x2d2   :  { %v1569_v39 = vpop.xlane.xlu0 %1568  ;;  %v2684_v26 = vadd.f32 %v2621_v52, %v2556_v47  ;;  %v3312_v46 = vpop.eup %3311  ;;  %3337 = vpow2.f32 %v1017_v22  ;;  %v1019_v59 = vmul.f32 1.442695, %v6676_v21  ;;  %v993_v20 = vmul.f32 1.442695, %v6679_v44  ;;  %v6681_v52 = vld [vmem:[#allocation127_spill] sm:$0xff] }
 0x2d3   :  { %v1631_v30 = vadd.f32 %v1569_v39, %v1503_v43  ;;  %v5791_v37 = vpop.eup %3313  ;;  %3339 = vpow2.f32 %v989_v29  ;;  %v1489_v49 = vmul.f32 %v3312_v46, %v1457_v45  ;;  %v2573_v43 = vld [vmem:[#allocation2 + $0x88] sm:$0xff]  ;;  %v5811_v39 = vld [vmem:[#allocation5 + $0x90] sm:$0xff]  ;;  %v6682_v50 = vsub.f32 %v6680_v42, %v6681_v52 }
 0x2d4   :  { %v2780_v32 = vmul.f32 %v5722_v41, %v2684_v26  ;;  %v3316_v33 = vpop.eup %3315  ;;  %3341 = vpow2.f32 %v987_v34  ;;  %v2591_v47 = vld [vmem:[#allocation3 + $0x18] sm:$0xff]  ;;  %v1459_v34 = vld [vmem:[#allocation3 + $0x20] sm:$0xff]  ;;  %v2862_v23 = vmax.f32 %v5811_v39, 1.0  ;;  %v6689_v52 = vld [vmem:[#allocation131_spill] sm:$0xff] }
 0x2d5   :  { %1664 = vst.msk [vmem:[#allocation3 + $0x80] sm:$0xff] %vm22_vm5, %v1631_v30  ;;  %v5802_v14 = vpop.eup %3317  ;;  %v2655_v1 = vmul.f32 0.6931472, %v3316_v33  ;;  %3343 = vpow2.f32 %v1021_v0  ;;  %v991_v30 = vmul.f32 1.442695, %v6682_v50  ;;  %v5828_v0 = vld [vmem:[#allocation5 + $0xa0] sm:$0xff] }
 0x2d6   :  { %v1524_v10 = vpop.xlane.xlu0 %1523  ;;  %v2812_v54 = vsub.f32 %v2748_v51, %v2780_v32  ;;  %v3320_v41 = vpop.eup %3319  ;;  %3345 = vpow2.f32 %v1019_v59  ;;  %v6683_v59 = vld [vmem:[#allocation128_spill] sm:$0xff]  ;;  %v6684_v32 = vld [vmem:[#allocation130_spill] sm:$0xff]  ;;  %v2864_v44 = vmax.f32 %v5828_v0, 1.0  ;;  %v6690_v50 = vld [vmem:[#allocation133_spill] sm:$0xff] }
 0x2d7   :  { %v1616_v8 = vadd.f32 %v1524_v10, %v1488_v2  ;;  %v5807_v24 = vpop.eup %3321  ;;  %v2701_v36 = vadd.f32 %v2655_v1, %v2573_v43  ;;  %3347 = vpow2.f32 %v993_v20  ;;  %v6685_v11 = vsub.f32 %v6683_v59, %v6684_v32 }
 0x2d8   :  { %v2877_v19 = vmul.f32 %v3310_v60, %v2812_v54  ;;  %v5809_v25 = vpop.eup %3323  ;;  %3349 = vlog2.f32 %v2591_v47  ;;  %v1505_v60 = vmul.f32 %v3320_v41, %v1473_v58  ;;  %v2607_v62 = vld [vmem:[#allocation3 + $0x98] sm:$0xff]  ;;  %v6686_v41 = vld [vmem:[#allocation126_spill] sm:$0xff] }
 0x2d9   :  { %1649 = vst.msk [vmem:[#allocation3 + $0x8] sm:$0xff] %vm22_vm5, %v1616_v8  ;;  %v5816_v56 = vpop.eup %3325  ;;  %v2797_v2 = vmul.f32 %v5760_v15, %v2701_v36  ;;  %v1023_v8 = vmul.f32 1.442695, %v6685_v11  ;;  %v1462_v11 = vld [vmem:[#allocation3 + $0x38] sm:$0xff] }
 0x2da   :  { %v1527_v57 = vpop.xlane.xlu0 %1526  ;;  %v2940_v29 = vmul.f32 -0.2, %v2877_v19  ;;  %v3328_v31 = vpop.eup %3327 }
 0x2db   :  { %v1617_v22 = vadd.f32 %v1527_v57, %v1489_v49  ;;  %v3330_v26 = vpop.eup %3329  ;;  %v2829_v46 = vsub.f32 %v2765_v28, %v2797_v2  ;;  %v1491_v40 = vmul.f32 %v3328_v31, %v1459_v34  ;;  %v1536_v54 = vpop.xlane.xlu1 %1535  ;;  %v1476_v49 = vld [vmem:[#allocation3 + $0xa8] sm:$0xff]  ;;  %v1461_v2 = vld [vmem:[#allocation3 + $0x30] sm:$0xff] }
 0x2dc   :  { %v2604_v38 = vld [vmem:[#allocation3 + $0x80] sm:$0xff]  ;;  %2972 = vst.msk [vmem:[%s6131_s4] sm:$0xff] %vm22_vm5, %v2940_v29  ;;  %v3332_v9 = vpop.eup %3331  ;;  %v1492_v33 = vmul.f32 %v3330_v26, %v1460_v3  ;;  %v6692_v31 = vld [vmem:[#allocation132_spill] sm:$0xff]  ;;  %v6693_v28 = vld [vmem:[#allocation135_spill] sm:$0xff] }
 0x2dd   :  { %1650 = vst.msk [vmem:[#allocation3 + $0x10] sm:$0xff] %vm22_vm5, %v1617_v22  ;;  %3351 = vlog2.f32 %v2604_v38  ;;  %v5830_v45 = vpop.eup %3333  ;;  %v2911_v7 = vmul.f32 %v3332_v9, %v2829_v46  ;;  %v6696_v3 = vld [vmem:[#allocation137_spill] sm:$0xff] }
 0x2de   :  { %v1575_v4 = vpop.xlane.xlu0 %1574  ;;  %3353 = vrcp.f32 %v2860_v17  ;;  %v3336_v21 = vpop.eup %3335  ;;  %v6687_v17 = vld [vmem:[#allocation129_spill] sm:$0xff]  ;;  %v1620_v19 = vadd.f32 %v1536_v54, %v1492_v33 }
 0x2df   :  { %v1633_v15 = vadd.f32 %v1575_v4, %v1505_v60  ;;  %3355 = vpow2.f32 %v991_v30  ;;  %v3338_v5 = vpop.eup %3337  ;;  %v2957_v20 = vmul.f32 -0.2, %v2911_v7  ;;  %v6688_v43 = vsub.f32 %v6686_v41, %v6687_v17  ;;  %v1584_v26 = vpop.xlane.xlu1 %1583 }
 0x2e0   :  { %v2589_v10 = vld [vmem:[#allocation3 + $0x8] sm:$0xff]  ;;  %3357 = vlog2.f32 %v2607_v62  ;;  %v3340_v36 = vpop.eup %3339  ;;  %v1507_v22 = vmul.f32 %v3336_v21, %v1475_v55  ;;  %v6691_v30 = vsub.f32 %v6689_v52, %v6690_v50  ;;  %1653 = vst.msk [vmem:[#allocation3 + $0x28] sm:$0xff] %vm22_vm5, %v1620_v19  ;;  %v1508_v38 = vmul.f32 %v3338_v5, %v1476_v49  ;;  %v6699_v55 = vld [vmem:[#allocation138_spill] sm:$0xff] }
 0x2e1   :  { %1666 = vst.msk [vmem:[#allocation3 + $0x90] sm:$0xff] %vm22_vm5, %v1633_v15  ;;  %3359 = vlog2.f32 %v2589_v10  ;;  %v1025_v57 = vmul.f32 1.442695, %v6688_v43  ;;  %2989 = vst.msk [vmem:[%s6131_s4 + $0x88] sm:$0xff] %vm22_vm5, %v2957_v20  ;;  %v3342_v42 = vpop.eup %3341  ;;  %v6694_v4 = vsub.f32 %v6692_v31, %v6693_v28  ;;  %v6695_v15 = vld [vmem:[#allocation134_spill] sm:$0xff]  ;;  %v1464_v49 = vld [vmem:[#allocation3 + $0x48] sm:$0xff]  ;;  %v1494_v50 = vmul.f32 %v3340_v36, %v1462_v11 }
 0x2e2   :  { %v1533_v51 = vpop.xlane.xlu0 %1532  ;;  %3361 = vrcp.f32 %v2862_v23  ;;  %v997_v47 = vmul.f32 1.442695, %v6691_v30  ;;  %v3344_v60 = vpop.eup %3343  ;;  %v6697_v9 = vsub.f32 %v6695_v15, %v6696_v3  ;;  %v1636_v10 = vadd.f32 %v1584_v26, %v1508_v38  ;;  %v2559_v43 = vld [vmem:[#allocation2 + $0x18] sm:$0xff]  ;;  %v1463_v31 = vld [vmem:[#allocation3 + $0x40] sm:$0xff] }
 0x2e3   :  { %v1619_v1 = vadd.f32 %v1533_v51, %v1491_v40  ;;  %3363 = vrcp.f32 %v2863_v63  ;;  %v995_v34 = vmul.f32 1.442695, %v6694_v4  ;;  %v3346_v46 = vpop.eup %3345  ;;  %v5855_v40 = vld [vmem:[#allocation5 + $0xa8] sm:$0xff]  ;;  %v1493_v21 = vmul.f32 %v3342_v42, %v1461_v2  ;;  %v6698_v51 = vld [vmem:[#allocation136_spill] sm:$0xff]  ;;  %v2751_v36 = vld [vmem:[#allocation4 + $0x18] sm:$0xff] }
 0x2e4   :  { %v2590_v58 = vld [vmem:[#allocation3 + $0x10] sm:$0xff]  ;;  %v1029_v63 = vmul.f32 1.442695, %v6697_v9  ;;  %v3348_v7 = vpop.eup %3347  ;;  %1669 = vst.msk [vmem:[#allocation3 + $0xa8] sm:$0xff] %vm22_vm5, %v1636_v10  ;;  %v6700_v5 = vsub.f32 %v6698_v51, %v6699_v55  ;;  %v2865_v17 = vmax.f32 %v5855_v40, 1.0  ;;  %v2764_v11 = vld [vmem:[#allocation4 + $0x80] sm:$0xff] }
 0x2e5   :  { %3365 = vlog2.f32 %v2590_v58  ;;  %1652 = vst.msk [vmem:[#allocation3 + $0x20] sm:$0xff] %vm22_vm5, %v1619_v1  ;;  %v3350_v59 = vpop.eup %3349  ;;  %v1478_v1 = vld [vmem:[#allocation3 + $0xb8] sm:$0xff]  ;;  %v5864_v28 = vmul.f32 %v3348_v7, %v1464_v49 }
 0x2e6   :  { %3367 = vpow2.f32 %v1023_v8  ;;  %v1581_v29 = vpop.xlane.xlu0 %1580  ;;  %v1477_v8 = vld [vmem:[#allocation3 + $0xb0] sm:$0xff]  ;;  %v2627_v20 = vmul.f32 0.6931472, %v3350_v59  ;;  %v1510_v2 = vmul.f32 %v3344_v60, %v1478_v1 }
 0x2e7   :  { %3369 = vrcp.f32 %v2864_v44  ;;  %v1635_v23 = vadd.f32 %v1581_v29, %v1507_v22  ;;  %v1027_v44 = vmul.f32 1.442695, %v6700_v5  ;;  %v2572_v22 = vld [vmem:[#allocation2 + $0x80] sm:$0xff]  ;;  %v2593_v52 = vld [vmem:[#allocation3 + $0x28] sm:$0xff]  ;;  %v1509_v30 = vmul.f32 %v3346_v46, %v1477_v8 }
 0x2e8   :  { %3371 = vpow2.f32 %v1025_v57  ;;  %v2606_v62 = vld [vmem:[#allocation3 + $0x90] sm:$0xff]  ;;  %v2687_v42 = vadd.f32 %v2627_v20, %v2559_v43  ;;  %v6701_v46 = vld [vmem:[#allocation139_spill] sm:$0xff] }
 0x2e9   :  { %3373 = vlog2.f32 %v2606_v62  ;;  %1668 = vst.msk [vmem:[#allocation3 + $0xa0] sm:$0xff] %vm22_vm5, %v1635_v23  ;;  %v2557_v8 = vld [vmem:[#allocation2 + $0x8] sm:$0xff] }
 0x2ea   :  { %3375 = vpow2.f32 %v997_v47  ;;  %v1539_v32 = vpop.xlane.xlu0 %1538  ;;  %v3352_v33 = vpop.eup %3351  ;;  %v2783_v26 = vmul.f32 %v5733_v16, %v2687_v42  ;;  %v6705_v20 = vld [vmem:[#allocation143_spill] sm:$0xff] }
 0x2eb   :  { %3377 = vpow2.f32 %v995_v34  ;;  %v1621_v54 = vadd.f32 %v1539_v32, %v1493_v21  ;;  %v3354_v41 = vpop.eup %3353  ;;  %v2653_v57 = vmul.f32 0.6931472, %v3352_v33  ;;  %v2575_v34 = vld [vmem:[#allocation2 + $0x98] sm:$0xff]  ;;  %v1542_v15 = vpop.xlane.xlu1 %1541  ;;  %v2609_v51 = vld [vmem:[#allocation3 + $0xa8] sm:$0xff] }
 0x2ec   :  { %3379 = vpow2.f32 %v1029_v63  ;;  %v2592_v58 = vld [vmem:[#allocation3 + $0x20] sm:$0xff]  ;;  %v3356_v19 = vpop.eup %3355  ;;  %v6702_v63 = vld [vmem:[#allocation141_spill] sm:$0xff]  ;;  %v1622_v59 = vadd.f32 %v1542_v15, %v1494_v50  ;;  %v2815_v33 = vsub.f32 %v2751_v36, %v2783_v26 }
 0x2ed   :  { %3381 = vlog2.f32 %v2592_v58  ;;  %1654 = vst.msk [vmem:[#allocation3 + $0x30] sm:$0xff] %vm22_vm5, %v1621_v54  ;;  %v3358_v47 = vpop.eup %3357  ;;  %v2700_v38 = vadd.f32 %v2653_v57, %v2572_v22  ;;  %v6703_v62 = vsub.f32 %v6701_v46, %v6702_v63  ;;  %v1495_v55 = vmul.f32 %v3356_v19, %v1463_v31  ;;  %v1479_v19 = vld [vmem:[#allocation3 + $0xc0] sm:$0xff] }
 0x2ee   :  { %3383 = vlog2.f32 %v2593_v52  ;;  %v1587_v29 = vpop.xlane.xlu0 %1586  ;;  %v3360_v4 = vpop.eup %3359  ;;  %v2659_v23 = vmul.f32 0.6931472, %v3358_v47  ;;  %1655 = vst.msk [vmem:[#allocation3 + $0x38] sm:$0xff] %vm22_vm5, %v1622_v59  ;;  %v2883_v58 = vmul.f32 %v5802_v14, %v2815_v33  ;;  %v2558_v47 = vld [vmem:[#allocation2 + $0x10] sm:$0xff]  ;;  %v1480_v33 = vld [vmem:[#allocation3 + $0xc8] sm:$0xff] }
 0x2ef   :  { %3385 = vpow2.f32 %v1027_v44  ;;  %v1637_v3 = vadd.f32 %v1587_v29, %v1509_v30  ;;  %v5867_v9 = vpop.eup %3361  ;;  %v1001_v10 = vmul.f32 1.442695, %v6703_v62  ;;  %v2796_v60 = vmul.f32 %v5793_v13, %v2700_v38  ;;  %v6704_v44 = vld [vmem:[#allocation140_spill] sm:$0xff]  ;;  %v2767_v38 = vld [vmem:[#allocation4 + $0x98] sm:$0xff]  ;;  %v5885_v62 = vld [vmem:[#allocation5 + $0x40] sm:$0xff] }
 0x2f0   :  { %v2623_v21 = vmul.f32 0.6931472, %v3360_v4  ;;  %v2608_v7 = vld [vmem:[#allocation3 + $0xa0] sm:$0xff]  ;;  %v3364_v32 = vpop.eup %3363  ;;  %v2703_v16 = vadd.f32 %v2659_v23, %v2575_v34  ;;  %v6706_v54 = vsub.f32 %v6704_v44, %v6705_v20  ;;  %v2749_v23 = vld [vmem:[#allocation4 + $0x8] sm:$0xff]  ;;  %v2943_v15 = vmul.f32 -0.2, %v2883_v58 }
 0x2f1   :  { %3387 = vlog2.f32 %v2608_v7  ;;  %1670 = vst.msk [vmem:[#allocation3 + $0xb0] sm:$0xff] %vm22_vm5, %v1637_v3  ;;  %v2828_v49 = vsub.f32 %v2764_v11, %v2796_v60  ;;  %v1590_v52 = vpop.xlane.xlu1 %1589  ;;  %v6711_v44 = vld [vmem:[#allocation146_spill] sm:$0xff] }
 0x2f2   :  { %v3366_v5 = vpop.eup %3365  ;;  %v999_v1 = vmul.f32 1.442695, %v6706_v54  ;;  %v2685_v13 = vadd.f32 %v2623_v21, %v2557_v8  ;;  %3389 = vlog2.f32 %v2609_v51  ;;  %v1545_v43 = vpop.xlane.xlu0 %1544  ;;  %v2799_v22 = vmul.f32 %v5818_v48, %v2703_v16  ;;  %2975 = vst.msk [vmem:[%s6131_s4 + $0x18] sm:$0xff] %vm22_vm5, %v2943_v15  ;;  %v2574_v51 = vld [vmem:[#allocation2 + $0x90] sm:$0xff] }
 0x2f3   :  { %v3368_v57 = vpop.eup %3367  ;;  %v2625_v42 = vmul.f32 0.6931472, %v3366_v5  ;;  %v1623_v50 = vadd.f32 %v1545_v43, %v1495_v55  ;;  %3391 = vpow2.f32 %v1001_v10  ;;  %v2909_v29 = vmul.f32 %v3354_v41, %v2828_v49  ;;  %v2750_v55 = vld [vmem:[#allocation4 + $0x10] sm:$0xff] }
 0x2f4   :  { %v5880_v30 = vpop.eup %3369  ;;  %v2781_v31 = vmul.f32 %v5717_v27, %v2685_v13  ;;  %v2594_v4 = vld [vmem:[#allocation3 + $0x30] sm:$0xff]  ;;  %v1638_v34 = vadd.f32 %v1590_v52, %v1510_v2  ;;  %v2831_v14 = vsub.f32 %v2767_v38, %v2799_v22  ;;  %v1511_v63 = vmul.f32 %v3368_v57, %v1479_v19  ;;  %v6707_v27 = vld [vmem:[#allocation142_spill] sm:$0xff]  ;;  %v6708_v2 = vld [vmem:[#allocation145_spill] sm:$0xff] }
 0x2f5   :  { %v3372_v26 = vpop.eup %3371  ;;  %v2686_v3 = vadd.f32 %v2625_v42, %v2558_v47  ;;  %3393 = vlog2.f32 %v2594_v4  ;;  %1656 = vst.msk [vmem:[#allocation3 + $0x40] sm:$0xff] %vm22_vm5, %v1623_v50  ;;  %v2956_v36 = vmul.f32 -0.2, %v2909_v29  ;;  %v6709_v10 = vsub.f32 %v6707_v27, %v6708_v2  ;;  %v1548_v11 = vpop.xlane.xlu1 %1547  ;;  %v6710_v5 = vld [vmem:[#allocation144_spill] sm:$0xff]  ;;  %v2595_v58 = vld [vmem:[#allocation3 + $0x38] sm:$0xff]  ;;  %v5909_v19 = vld [vmem:[#allocation5 + $0x48] sm:$0xff] }
 0x2f6   :  { %v3374_v48 = vpop.eup %3373  ;;  %3395 = vpow2.f32 %v999_v1  ;;  %v2813_v46 = vsub.f32 %v2749_v23, %v2781_v31  ;;  %1671 = vst.msk [vmem:[#allocation3 + $0xb8] sm:$0xff] %vm22_vm5, %v1638_v34  ;;  %v2915_v21 = vmul.f32 %v3364_v32, %v2831_v14  ;;  %v1593_v8 = vpop.xlane.xlu0 %1592  ;;  %v6712_v20 = vsub.f32 %v6710_v5, %v6711_v44  ;;  %v1465_v22 = vld [vmem:[#allocation3 + $0x50] sm:$0xff]  ;;  %v1466_v31 = vld [vmem:[#allocation3 + $0x58] sm:$0xff]  ;;  %v2560_v23 = vld [vmem:[#allocation2 + $0x20] sm:$0xff] }
 0x2f7   :  { %v3376_v41 = vpop.eup %3375  ;;  %v1033_v60 = vmul.f32 1.442695, %v6709_v10  ;;  %v2782_v7 = vmul.f32 %v5727_v35, %v2686_v3  ;;  %v2657_v59 = vmul.f32 0.6931472, %v3374_v48  ;;  %2988 = vst.msk [vmem:[%s6131_s4 + $0x80] sm:$0xff] %vm22_vm5, %v2956_v36  ;;  %v1624_v35 = vadd.f32 %v1548_v11, %v5864_v28  ;;  %v2766_v34 = vld [vmem:[#allocation4 + $0x90] sm:$0xff] }
 0x2f8   :  { %v3378_v16 = vpop.eup %3377  ;;  %v1031_v54 = vmul.f32 1.442695, %v6712_v20  ;;  %v2879_v32 = vmul.f32 %v5778_v6, %v2813_v46  ;;  %v1639_v1 = vadd.f32 %v1593_v8, %v1511_v63  ;;  %3397 = vrcp.f32 %v2865_v17  ;;  %v2561_v48 = vld [vmem:[#allocation2 + $0x28] sm:$0xff]  ;;  %v1482_v46 = vld [vmem:[#allocation3 + $0xd8] sm:$0xff]  ;;  %v2752_v5 = vld [vmem:[#allocation4 + $0x20] sm:$0xff] }
 0x2f9   :  { %v3380_v49 = vpop.eup %3379  ;;  %v2959_v13 = vmul.f32 -0.2, %v2915_v21  ;;  %v2814_v43 = vsub.f32 %v2750_v55, %v2782_v7  ;;  %v2702_v57 = vadd.f32 %v2657_v59, %v2574_v51  ;;  %v2852_v52 = vmax.f32 %v5885_v62, 1.0  ;;  %1657 = vst.msk [vmem:[#allocation3 + $0x48] sm:$0xff] %vm22_vm5, %v1624_v35  ;;  %v1596_v29 = vpop.xlane.xlu1 %1595  ;;  %v2577_v51 = vld [vmem:[#allocation2 + $0xa8] sm:$0xff]  ;;  %v2576_v55 = vld [vmem:[#allocation2 + $0xa0] sm:$0xff] }
 0x2fa   :  { %v3382_v42 = vpop.eup %3381  ;;  %v2941_v50 = vmul.f32 -0.2, %v2879_v32  ;;  %3399 = vlog2.f32 %v2595_v58  ;;  %1672 = vst.msk [vmem:[#allocation3 + $0xc0] sm:$0xff] %vm22_vm5, %v1639_v1  ;;  %v1512_v6 = vmul.f32 %v3372_v26, %v1480_v33  ;;  %v1497_v3 = vmul.f32 %v3378_v16, %v1465_v22  ;;  %v1481_v16 = vld [vmem:[#allocation3 + $0xd0] sm:$0xff]  ;;  %v2753_v35 = vld [vmem:[#allocation4 + $0x28] sm:$0xff] }
 0x2fb   :  { %v3384_v28 = vpop.eup %3383  ;;  %3401 = vpow2.f32 %v1033_v60  ;;  %2991 = vst.msk [vmem:[%s6131_s4 + $0x98] sm:$0xff] %vm22_vm5, %v2959_v13  ;;  %v2881_v17 = vmul.f32 %v5791_v37, %v2814_v43  ;;  %v2798_v47 = vmul.f32 %v5811_v39, %v2702_v57  ;;  %v2629_v38 = vmul.f32 0.6931472, %v3382_v42  ;;  %v6713_v1 = vld [vmem:[#allocation148_spill] sm:$0xff]  ;;  %v6714_v13 = vld [vmem:[#allocation151_spill] sm:$0xff] }
 0x2fc   :  { %v3386_v4 = vpop.eup %3385  ;;  %3403 = vpow2.f32 %v1031_v54  ;;  %2973 = vst.msk [vmem:[%s6131_s4 + $0x8] sm:$0xff] %vm22_vm5, %v2941_v50  ;;  %v2631_v26 = vmul.f32 0.6931472, %v3384_v28  ;;  %v2596_v15 = vld [vmem:[#allocation3 + $0x40] sm:$0xff]  ;;  %v1640_v14 = vadd.f32 %v1596_v29, %v1512_v6  ;;  %v2853_v27 = vmax.f32 %v5909_v19, 1.0  ;;  %v6716_v28 = vld [vmem:[#allocation152_spill] sm:$0xff] }
 0x2fd   :  { %v2942_v37 = vmul.f32 -0.2, %v2881_v17  ;;  %v2830_v36 = vsub.f32 %v2766_v34, %v2798_v47  ;;  %v2688_v39 = vadd.f32 %v2629_v38, %v2560_v23  ;;  %3405 = vlog2.f32 %v2596_v15  ;;  %v1554_v8 = vpop.xlane.xlu1 %1553  ;;  %v6717_v17 = vld [vmem:[#allocation154_spill] sm:$0xff] }
 0x2fe   :  { %v3388_v63 = vpop.eup %3387  ;;  %3407 = vrcp.f32 %v2852_v52  ;;  %v2689_v2 = vadd.f32 %v2631_v26, %v2561_v48  ;;  %1673 = vst.msk [vmem:[#allocation3 + $0xc8] sm:$0xff] %vm22_vm5, %v1640_v14  ;;  %v1498_v10 = vmul.f32 %v3376_v41, %v1466_v31  ;;  %v1551_v60 = vpop.xlane.xlu0 %1550  ;;  %v1514_v54 = vmul.f32 %v3380_v49, %v1482_v46  ;;  %v2562_v26 = vld [vmem:[#allocation2 + $0x30] sm:$0xff]  ;;  %v2768_v15 = vld [vmem:[#allocation4 + $0xa0] sm:$0xff] }
 0x2ff   :  { %v3390_v21 = vpop.eup %3389  ;;  %2974 = vst.msk [vmem:[%s6131_s4 + $0x10] sm:$0xff] %vm22_vm5, %v2942_v37  ;;  %v2913_v7 = vmul.f32 %v5867_v9, %v2830_v36  ;;  %v2784_v59 = vmul.f32 %v5741_v61, %v2688_v39  ;;  %v2661_v11 = vmul.f32 0.6931472, %v3388_v63  ;;  %v1625_v33 = vadd.f32 %v1551_v60, %v1497_v3  ;;  %v1468_v37 = vld [vmem:[#allocation3 + $0x68] sm:$0xff] }
 0x300   :  { %v2785_v41 = vmul.f32 %v5744_v53, %v2689_v2  ;;  %v2663_v44 = vmul.f32 0.6931472, %v3390_v21  ;;  %v1626_v20 = vadd.f32 %v1554_v8, %v1498_v10  ;;  %v3392_v32 = vpop.eup %3391  ;;  %v6715_v43 = vsub.f32 %v6713_v1, %v6714_v13  ;;  %v2597_v22 = vld [vmem:[#allocation3 + $0x48] sm:$0xff]  ;;  %v1467_v2 = vld [vmem:[#allocation3 + $0x60] sm:$0xff] }
 0x301   :  { %v2958_v57 = vmul.f32 -0.2, %v2913_v7  ;;  %v2816_v61 = vsub.f32 %v2752_v5, %v2784_v59  ;;  %v2704_v58 = vadd.f32 %v2661_v11, %v2576_v55  ;;  %1658 = vst.msk [vmem:[#allocation3 + $0x50] sm:$0xff] %vm22_vm5, %v1625_v33  ;;  %3409 = vlog2.f32 %v2597_v22  ;;  %v1602_v23 = vpop.xlane.xlu1 %1601  ;;  %v2769_v36 = vld [vmem:[#allocation4 + $0xa8] sm:$0xff]  ;;  %v2754_v11 = vld [vmem:[#allocation4 + $0x30] sm:$0xff] }
 0x302   :  { %v1003_v9 = vmul.f32 1.442695, %v6715_v43  ;;  %v3394_v42 = vpop.eup %3393  ;;  %v2817_v52 = vsub.f32 %v2753_v35, %v2785_v41  ;;  %v2705_v50 = vadd.f32 %v2663_v44, %v2577_v51  ;;  %1659 = vst.msk [vmem:[#allocation3 + $0x58] sm:$0xff] %vm22_vm5, %v1626_v20  ;;  %v1513_v53 = vmul.f32 %v3386_v4, %v1481_v16  ;;  %v1599_v49 = vpop.xlane.xlu0 %1598  ;;  %v1484_v55 = vld [vmem:[#allocation3 + $0xe8] sm:$0xff]  ;;  %v5960_v41 = vld [vmem:[#allocation5 + $0x58] sm:$0xff]  ;;  %v1483_v43 = vld [vmem:[#allocation3 + $0xe0] sm:$0xff] }
 0x303   :  { %v3396_v6 = vpop.eup %3395  ;;  %v6718_v47 = vsub.f32 %v6716_v28, %v6717_v17  ;;  %2990 = vst.msk [vmem:[%s6131_s4 + $0x90] sm:$0xff] %vm22_vm5, %v2958_v57  ;;  %v2885_v29 = vmul.f32 %v5807_v24, %v2816_v61  ;;  %v2800_v31 = vmul.f32 %v5828_v0, %v2704_v58  ;;  %v2633_v34 = vmul.f32 0.6931472, %v3394_v42  ;;  %v2610_v61 = vld [vmem:[#allocation3 + $0xb0] sm:$0xff] }
 0x304   :  { %v2887_v4 = vmul.f32 %v5809_v25, %v2817_v52  ;;  %v2801_v14 = vmul.f32 %v5855_v40, %v2705_v50  ;;  %v1642_v3 = vadd.f32 %v1602_v23, %v1514_v54  ;;  %v1641_v48 = vadd.f32 %v1599_v49, %v1513_v53  ;;  %v5948_v25 = vld [vmem:[#allocation5 + $0x50] sm:$0xff]  ;;  %v2564_v53 = vld [vmem:[#allocation2 + $0x40] sm:$0xff] }
 0x305   :  { %v1035_v38 = vmul.f32 1.442695, %v6718_v47  ;;  %3411 = vpow2.f32 %v1003_v9  ;;  %v2944_v39 = vmul.f32 -0.2, %v2885_v29  ;;  %v2832_v46 = vsub.f32 %v2768_v15, %v2800_v31  ;;  %v3398_v24 = vpop.eup %3397  ;;  %v2756_v15 = vld [vmem:[#allocation4 + $0x40] sm:$0xff] }
 0x306   :  { %v2690_v63 = vadd.f32 %v2633_v34, %v2562_v26  ;;  %v2945_v10 = vmul.f32 -0.2, %v2887_v4  ;;  %v2833_v0 = vsub.f32 %v2769_v36, %v2801_v14  ;;  %1675 = vst.msk [vmem:[#allocation3 + $0xd8] sm:$0xff] %vm22_vm5, %v1642_v3  ;;  %1674 = vst.msk [vmem:[#allocation3 + $0xd0] sm:$0xff] %vm22_vm5, %v1641_v48  ;;  %3413 = vrcp.f32 %v2853_v27  ;;  %v2565_v3 = vld [vmem:[#allocation2 + $0x48] sm:$0xff] }
 0x307   :  { %v3400_v60 = vpop.eup %3399  ;;  %2976 = vst.msk [vmem:[%s6131_s4 + $0x20] sm:$0xff] %vm22_vm5, %v2944_v39  ;;  %v2917_v40 = vmul.f32 %v5880_v30, %v2832_v46  ;;  %v1500_v7 = vmul.f32 %v3392_v32, %v1468_v37  ;;  %3415 = vpow2.f32 %v1035_v38  ;;  %v1499_v51 = vmul.f32 %v3396_v6, %v1467_v2  ;;  %v2563_v30 = vld [vmem:[#allocation2 + $0x38] sm:$0xff] }
 0x308   :  { %v2786_v21 = vmul.f32 %v5748_v18, %v2690_v63  ;;  %v3402_v59 = vpop.eup %3401  ;;  %2977 = vst.msk [vmem:[%s6131_s4 + $0x28] sm:$0xff] %vm22_vm5, %v2945_v10  ;;  %v2919_v27 = vmul.f32 %v3398_v24, %v2833_v0  ;;  %v2635_v8 = vmul.f32 0.6931472, %v3400_v60  ;;  %v2598_v33 = vld [vmem:[#allocation3 + $0x50] sm:$0xff]  ;;  %v1560_v16 = vpop.xlane.xlu1 %1559  ;;  %v2855_v52 = vmax.f32 %v5960_v41, 1.0  ;;  %v5984_v63 = vld [vmem:[#allocation5 + $0x60] sm:$0xff] }
 0x309   :  { %v3404_v5 = vpop.eup %3403  ;;  %v2960_v18 = vmul.f32 -0.2, %v2917_v40  ;;  %v2599_v20 = vld [vmem:[#allocation3 + $0x58] sm:$0xff]  ;;  %3417 = vlog2.f32 %v2598_v33  ;;  %v1628_v54 = vadd.f32 %v1560_v16, %v1500_v7  ;;  %v1516_v42 = vmul.f32 %v3402_v59, %v1484_v55  ;;  %v5986_v10 = vld [vmem:[#allocation5 + $0x68] sm:$0xff] }
 0x30a   :  { %v2818_v44 = vsub.f32 %v2754_v11, %v2786_v21  ;;  %v3406_v32 = vpop.eup %3405  ;;  %v2961_v35 = vmul.f32 -0.2, %v2919_v27  ;;  %v2691_v1 = vadd.f32 %v2635_v8, %v2563_v30  ;;  %3419 = vlog2.f32 %v2599_v20  ;;  %v1557_v13 = vpop.xlane.xlu0 %1556  ;;  %v2757_v21 = vld [vmem:[#allocation4 + $0x48] sm:$0xff]  ;;  %v5994_v8 = vld [vmem:[#allocation5 + $0xb0] sm:$0xff] }
 0x30b   :  { %v3408_v9 = vpop.eup %3407  ;;  %2992 = vst.msk [vmem:[%s6131_s4 + $0xa0] sm:$0xff] %vm22_vm5, %v2960_v18  ;;  %v2637_v58 = vmul.f32 0.6931472, %v3406_v32  ;;  %1661 = vst.msk [vmem:[#allocation3 + $0x68] sm:$0xff] %vm22_vm5, %v1628_v54  ;;  %v1627_v22 = vadd.f32 %v1557_v13, %v1499_v51  ;;  %v2854_v50 = vmax.f32 %v5948_v25, 1.0  ;;  %v1515_v38 = vmul.f32 %v3404_v5, %v1483_v43  ;;  %v1485_v51 = vld [vmem:[#allocation3 + $0xf0] sm:$0xff] }
 0x30c   :  { %v2889_v57 = vmul.f32 %v5816_v56, %v2818_v44  ;;  %2993 = vst.msk [vmem:[%s6131_s4 + $0xa8] sm:$0xff] %vm22_vm5, %v2961_v35  ;;  %v2787_v49 = vmul.f32 %v5762_v12, %v2691_v1  ;;  %v1608_v6 = vpop.xlane.xlu1 %1607  ;;  %v2755_v56 = vld [vmem:[#allocation4 + $0x38] sm:$0xff]  ;;  %3421 = vlog2.f32 %v2610_v61  ;;  %v2612_v12 = vld [vmem:[#allocation3 + $0xc0] sm:$0xff]  ;;  %v2856_v27 = vmax.f32 %v5984_v63, 1.0  ;;  %v2566_v18 = vld [vmem:[#allocation2 + $0x50] sm:$0xff] }
 0x30d   :  { %v2692_v17 = vadd.f32 %v2637_v58, %v2564_v53  ;;  %1660 = vst.msk [vmem:[#allocation3 + $0x60] sm:$0xff] %vm22_vm5, %v1627_v22  ;;  %v1644_v47 = vadd.f32 %v1608_v6, %v1516_v42  ;;  %3423 = vrcp.f32 %v2854_v50  ;;  %v2614_v0 = vld [vmem:[#allocation3 + $0xd0] sm:$0xff]  ;;  %v2857_v5 = vmax.f32 %v5986_v10, 1.0  ;;  %v6002_v32 = vld [vmem:[#allocation5 + $0xc0] sm:$0xff]  ;;  %v2567_v35 = vld [vmem:[#allocation2 + $0x58] sm:$0xff] }
 0x30e   :  { %v2946_v28 = vmul.f32 -0.2, %v2889_v57  ;;  %v2819_v29 = vsub.f32 %v2755_v56, %v2787_v49  ;;  %v1605_v31 = vpop.xlane.xlu0 %1604  ;;  %v3410_v34 = vpop.eup %3409  ;;  %3425 = vrcp.f32 %v2855_v52  ;;  %v2866_v54 = vmax.f32 %v5994_v8, 1.0  ;;  %v2758_v50 = vld [vmem:[#allocation4 + $0x50] sm:$0xff] }
 0x30f   :  { %v2788_v23 = vmul.f32 %v5885_v62, %v2692_v17  ;;  %1677 = vst.msk [vmem:[#allocation3 + $0xe8] sm:$0xff] %vm22_vm5, %v1644_v47  ;;  %v1643_v26 = vadd.f32 %v1605_v31, %v1515_v38  ;;  %v2639_v14 = vmul.f32 0.6931472, %v3410_v34  ;;  %3427 = vlog2.f32 %v2612_v12  ;;  %v1469_v62 = vld [vmem:[#allocation3 + $0x70] sm:$0xff] }
 0x310   :  { %2978 = vst.msk [vmem:[%s6131_s4 + $0x30] sm:$0xff] %vm22_vm5, %v2946_v28  ;;  %v2891_v4 = vmul.f32 %v5830_v45, %v2819_v29  ;;  %v2868_v52 = vmax.f32 %v6002_v32, 1.0  ;;  %v2127_v49 = vld [vmem:[#allocation4 + $0xb0] sm:$0xff]  ;;  %v2759_v28 = vld [vmem:[#allocation4 + $0x58] sm:$0xff] }
 0x311   :  { %v2820_v48 = vsub.f32 %v2756_v15, %v2788_v23  ;;  %1676 = vst.msk [vmem:[#allocation3 + $0xe0] sm:$0xff] %vm22_vm5, %v1643_v26  ;;  %v2693_v39 = vadd.f32 %v2639_v14, %v2565_v3  ;;  %v6012_v56 = vld [vmem:[#allocation5 + $0xd0] sm:$0xff] }
 0x312   :  { %v3412_v37 = vpop.eup %3411  ;;  %v2947_v36 = vmul.f32 -0.2, %v2891_v4  ;;  %v2601_v46 = vld [vmem:[#allocation3 + $0x68] sm:$0xff]  ;;  %v2129_v4 = vld [vmem:[#allocation4 + $0xc0] sm:$0xff]  ;;  %v6016_v14 = vld [vmem:[#allocation5 + $0x70] sm:$0xff] }
 0x313   :  { %v2893_v2 = vmul.f32 %v3408_v9, %v2820_v48  ;;  %3429 = vlog2.f32 %v2601_v46  ;;  %v3414_v24 = vpop.eup %3413  ;;  %v2789_v45 = vmul.f32 %v5909_v19, %v2693_v39  ;;  %v1501_v59 = vmul.f32 %v3412_v37, %v1469_v62  ;;  %v2578_v3 = vld [vmem:[#allocation2 + $0xb0] sm:$0xff]  ;;  %v2569_v39 = vld [vmem:[#allocation2 + $0x68] sm:$0xff] }
 0x314   :  { %2979 = vst.msk [vmem:[%s6131_s4 + $0x38] sm:$0xff] %vm22_vm5, %v2947_v36  ;;  %v2600_v60 = vld [vmem:[#allocation3 + $0x60] sm:$0xff]  ;;  %v3416_v40 = vpop.eup %3415 }
 0x315   :  { %v2948_v7 = vmul.f32 -0.2, %v2893_v2  ;;  %3431 = vlog2.f32 %v2600_v60  ;;  %v2821_v33 = vsub.f32 %v2757_v21, %v2789_v45  ;;  %v1517_v43 = vmul.f32 %v3416_v40, %v1485_v51  ;;  %v6019_v45 = vld [vmem:[#allocation5 + $0xe0] sm:$0xff] }
 0x316   :  { %v3418_v11 = vpop.eup %3417  ;;  %v1563_v16 = vpop.xlane.xlu0 %1562  ;;  %3433 = vlog2.f32 %v2614_v0 }
 0x317   :  { %v3420_v55 = vpop.eup %3419  ;;  %2980 = vst.msk [vmem:[%s6131_s4 + $0x40] sm:$0xff] %vm22_vm5, %v2948_v7  ;;  %v2641_v19 = vmul.f32 0.6931472, %v3418_v11  ;;  %v1629_v30 = vadd.f32 %v1563_v16, %v1501_v59  ;;  %v2895_v44 = vmul.f32 %v3414_v24, %v2821_v33  ;;  %3435 = vrcp.f32 %v2856_v27  ;;  %v2568_v59 = vld [vmem:[#allocation2 + $0x60] sm:$0xff]  ;;  %v2131_v27 = vld [vmem:[#allocation4 + $0xd0] sm:$0xff] }
 0x318   :  { %v2643_v20 = vmul.f32 0.6931472, %v3420_v55  ;;  %v2616_v13 = vld [vmem:[#allocation3 + $0xe0] sm:$0xff]  ;;  %3437 = vrcp.f32 %v2857_v5  ;;  %v2858_v7 = vmax.f32 %v6016_v14, 1.0  ;;  %v2872_v55 = vmax.f32 %v6019_v45, 1.0  ;;  %v6033_v5 = vld [vmem:[#allocation5 + $0xf0] sm:$0xff] }
 0x319   :  { %v2694_v1 = vadd.f32 %v2641_v19, %v2566_v18  ;;  %1662 = vst.msk [vmem:[#allocation3 + $0x70] sm:$0xff] %vm22_vm5, %v1629_v30  ;;  %v2949_v9 = vmul.f32 -0.2, %v2895_v44  ;;  %v3422_v58 = vpop.eup %3421  ;;  %3439 = vlog2.f32 %v2616_v13  ;;  %v2580_v33 = vld [vmem:[#allocation2 + $0xc0] sm:$0xff]  ;;  %v2761_v19 = vld [vmem:[#allocation4 + $0x68] sm:$0xff] }
 0x31a   :  { %v2695_v57 = vadd.f32 %v2643_v20, %v2567_v35  ;;  %v1611_v61 = vpop.xlane.xlu0 %1610  ;;  %v3424_v6 = vpop.eup %3423  ;;  %3441 = vrcp.f32 %v2866_v54  ;;  %v2665_v47 = vmul.f32 0.6931472, %v3422_v58 }
 0x31b   :  { %v2790_v22 = vmul.f32 %v5948_v25, %v2694_v1  ;;  %v1645_v42 = vadd.f32 %v1611_v61, %v1517_v43  ;;  %2981 = vst.msk [vmem:[%s6131_s4 + $0x48] sm:$0xff] %vm22_vm5, %v2949_v9  ;;  %v3426_v25 = vpop.eup %3425  ;;  %3443 = vrcp.f32 %v2868_v52  ;;  %v2760_v43 = vld [vmem:[#allocation4 + $0x60] sm:$0xff]  ;;  %v2874_v61 = vmax.f32 %v6033_v5, 1.0 }
 0x31c   :  { %v2791_v53 = vmul.f32 %v5960_v41, %v2695_v57  ;;  %v3428_v31 = vpop.eup %3427  ;;  %v2870_v41 = vmax.f32 %v6012_v56, 1.0  ;;  %v2706_v2 = vadd.f32 %v2665_v47, %v2578_v3  ;;  %v6720_v47 = vld [vmem:[#allocation149_spill] sm:$0xff] }
 0x31d   :  { %v2822_v17 = vsub.f32 %v2758_v50, %v2790_v22  ;;  %1678 = vst.msk [vmem:[#allocation3 + $0xf0] sm:$0xff] %vm22_vm5, %v1645_v42  ;;  %v2669_v46 = vmul.f32 0.6931472, %v3428_v31  ;;  %v2582_v50 = vld [vmem:[#allocation2 + $0xd0] sm:$0xff] }
 0x31e   :  { %v2823_v38 = vsub.f32 %v2759_v28, %v2791_v53  ;;  %v2269_v29 = vpop.xlane.xlu0 %2268  ;;  %v2802_v30 = vmul.f32 %v5994_v8, %v2706_v2  ;;  %v2133_v8 = vld [vmem:[#allocation4 + $0xe0] sm:$0xff] }
 0x31f   :  { %v2897_v34 = vmul.f32 %v3424_v6, %v2822_v17  ;;  %v2319_v23 = vadd.f32 %v2269_v29, %v2127_v49  ;;  %v2708_v18 = vadd.f32 %v2669_v46, %v2580_v33  ;;  %v6722_v2 = vld [vmem:[#allocation150_spill] sm:$0xff] }
 0x320   :  { %v3430_v12 = vpop.eup %3429  ;;  %v2899_v26 = vmul.f32 %v3426_v25, %v2823_v38  ;;  %v2602_v15 = vld [vmem:[#allocation3 + $0x70] sm:$0xff]  ;;  %v6719_v25 = vld [vmem:[#allocation147_spill] sm:$0xff] }
 0x321   :  { %v2950_v48 = vmul.f32 -0.2, %v2897_v34  ;;  %v2647_v37 = vmul.f32 0.6931472, %v3430_v12  ;;  %3445 = vlog2.f32 %v2602_v15  ;;  %2351 = vst.msk [vmem:[#allocation4 + $0xb0] sm:$0xff] %vm22_vm5, %v2319_v23  ;;  %v2804_v53 = vmul.f32 %v6002_v32, %v2708_v18  ;;  %v2135_v12 = vld [vmem:[#allocation4 + $0xf0] sm:$0xff] }
 0x322   :  { %v3432_v36 = vpop.eup %3431  ;;  %v2951_v62 = vmul.f32 -0.2, %v2899_v26  ;;  %v2275_v24 = vpop.xlane.xlu0 %2274  ;;  %3447 = vrcp.f32 %v2870_v41  ;;  %v6721_v38 = vsub.f32 %v6719_v25, %v6720_v47  ;;  %v2617_v47 = vld [vmem:[#allocation3 + $0xe8] sm:$0xff] }
 0x323   :  { %2982 = vst.msk [vmem:[%s6131_s4 + $0x50] sm:$0xff] %vm22_vm5, %v2950_v48  ;;  %v2697_v0 = vadd.f32 %v2647_v37, %v2569_v39  ;;  %v2645_v60 = vmul.f32 0.6931472, %v3432_v36  ;;  %v2321_v40 = vadd.f32 %v2275_v24, %v2129_v4  ;;  %v3434_v21 = vpop.eup %3433  ;;  %v2584_v48 = vld [vmem:[#allocation2 + $0xe0] sm:$0xff]  ;;  %v6723_v24 = vld [vmem:[#allocation153_spill] sm:$0xff] }
 0x324   :  { %2983 = vst.msk [vmem:[%s6131_s4 + $0x58] sm:$0xff] %vm22_vm5, %v2951_v62  ;;  %v2618_v11 = vld [vmem:[#allocation3 + $0xf0] sm:$0xff]  ;;  %v3436_v20 = vpop.eup %3435  ;;  %v2673_v54 = vmul.f32 0.6931472, %v3434_v21  ;;  %v1005_v29 = vmul.f32 1.442695, %v6721_v38 }
 0x325   :  { %v2793_v16 = vmul.f32 %v5986_v10, %v2697_v0  ;;  %v2696_v51 = vadd.f32 %v2645_v60, %v2568_v59  ;;  %3449 = vlog2.f32 %v2618_v11  ;;  %2353 = vst.msk [vmem:[#allocation4 + $0xc0] sm:$0xff] %vm22_vm5, %v2321_v40  ;;  %v3438_v10 = vpop.eup %3437  ;;  %v2570_v62 = vld [vmem:[#allocation2 + $0x70] sm:$0xff]  ;;  %v6724_v0 = vsub.f32 %v6722_v2, %v6723_v24  ;;  %v2579_v2 = vld [vmem:[#allocation2 + $0xb8] sm:$0xff] }
 0x326   :  { %v2281_v44 = vpop.xlane.xlu0 %2280  ;;  %3451 = vrcp.f32 %v2858_v7  ;;  %v3440_v57 = vpop.eup %3439  ;;  %v2710_v17 = vadd.f32 %v2673_v54, %v2582_v50  ;;  %v1470_v50 = vld [vmem:[#allocation3 + $0x78] sm:$0xff] }
 0x327   :  { %v2825_v35 = vsub.f32 %v2761_v19, %v2793_v16  ;;  %v2792_v1 = vmul.f32 %v5984_v63, %v2696_v51  ;;  %v2323_v13 = vadd.f32 %v2281_v44, %v2131_v27  ;;  %v3442_v52 = vpop.eup %3441  ;;  %3453 = vrcp.f32 %v2872_v55  ;;  %v2586_v55 = vld [vmem:[#allocation2 + $0xf0] sm:$0xff] }
 0x328   :  { %v2770_v9 = vld [vmem:[#allocation4 + $0xb0] sm:$0xff]  ;;  %v2677_v31 = vmul.f32 0.6931472, %v3440_v57  ;;  %v3444_v41 = vpop.eup %3443  ;;  %3455 = vrcp.f32 %v2874_v61  ;;  %v2806_v39 = vmul.f32 %v6012_v56, %v2710_v17  ;;  %v1037_v60 = vmul.f32 1.442695, %v6724_v0  ;;  %v1486_v17 = vld [vmem:[#allocation3 + $0xf8] sm:$0xff] }
 0x329   :  { %v2903_v58 = vmul.f32 %v3438_v10, %v2825_v35  ;;  %v2824_v22 = vsub.f32 %v2760_v43, %v2792_v1  ;;  %v2834_v42 = vsub.f32 %v2770_v9, %v2802_v30  ;;  %2355 = vst.msk [vmem:[#allocation4 + $0xd0] sm:$0xff] %vm22_vm5, %v2323_v13  ;;  %3457 = vpow2.f32 %v1005_v29  ;;  %v2762_v19 = vld [vmem:[#allocation4 + $0x70] sm:$0xff]  ;;  %v2741_v29 = vld [vmem:[#allocation5 + $0xc8] sm:$0xff] }
 0x32a   :  { %v2287_v63 = vpop.xlane.xlu0 %2286  ;;  %v2712_v21 = vadd.f32 %v2677_v31, %v2584_v48  ;;  %3459 = vpow2.f32 %v1037_v60 }
 0x32b   :  { %v2953_v49 = vmul.f32 -0.2, %v2903_v58  ;;  %v2901_v6 = vmul.f32 %v3436_v20, %v2824_v22  ;;  %v2921_v28 = vmul.f32 %v3442_v52, %v2834_v42  ;;  %v2325_v23 = vadd.f32 %v2287_v63, %v2133_v8  ;;  %v2613_v42 = vld [vmem:[#allocation3 + $0xc8] sm:$0xff] }
 0x32c   :  { %v2772_v34 = vld [vmem:[#allocation4 + $0xc0] sm:$0xff]  ;;  %v2808_v30 = vmul.f32 %v6019_v45, %v2712_v21 }
 0x32d   :  { %2985 = vst.msk [vmem:[%s6131_s4 + $0x68] sm:$0xff] %vm22_vm5, %v2953_v49  ;;  %v2952_v32 = vmul.f32 -0.2, %v2901_v6  ;;  %v2962_v26 = vmul.f32 -0.2, %v2921_v28  ;;  %v2836_v15 = vsub.f32 %v2772_v34, %v2804_v53  ;;  %2357 = vst.msk [vmem:[#allocation4 + $0xe0] sm:$0xff] %vm22_vm5, %v2325_v23 }
 0x32e   :  { %v3446_v4 = vpop.eup %3445  ;;  %v2293_v3 = vpop.xlane.xlu0 %2292  ;;  %v2615_v53 = vld [vmem:[#allocation3 + $0xd8] sm:$0xff] }
 0x32f   :  { %2984 = vst.msk [vmem:[%s6131_s4 + $0x60] sm:$0xff] %vm22_vm5, %v2952_v32  ;;  %v2649_v37 = vmul.f32 0.6931472, %v3446_v4  ;;  %2994 = vst.msk [vmem:[%s6131_s4 + $0xb0] sm:$0xff] %vm22_vm5, %v2962_v26  ;;  %v2925_v36 = vmul.f32 %v3444_v41, %v2836_v15  ;;  %v2327_v46 = vadd.f32 %v2293_v3, %v2135_v12  ;;  %v3448_v7 = vpop.eup %3447  ;;  %v2739_v6 = vld [vmem:[#allocation5 + $0xb8] sm:$0xff]  ;;  %v2869_v41 = vmax.f32 %v2741_v29, 1.0 }
 0x330   :  { %v2774_v40 = vld [vmem:[#allocation4 + $0xd0] sm:$0xff]  ;;  %v2867_v38 = vmax.f32 %v2739_v6, 1.0  ;;  %v2128_v32 = vld [vmem:[#allocation4 + $0xb8] sm:$0xff] }
 0x331   :  { %v2698_v59 = vadd.f32 %v2649_v37, %v2570_v62  ;;  %v2964_v11 = vmul.f32 -0.2, %v2925_v36  ;;  %v2838_v27 = vsub.f32 %v2774_v40, %v2806_v39  ;;  %2359 = vst.msk [vmem:[#allocation4 + $0xf0] sm:$0xff] %vm22_vm5, %v2327_v46  ;;  %v2743_v26 = vld [vmem:[#allocation5 + $0xd8] sm:$0xff]  ;;  %v2130_v39 = vld [vmem:[#allocation4 + $0xc8] sm:$0xff] }
 0x332   :  { %v3450_v33 = vpop.eup %3449  ;;  %v2871_v37 = vmax.f32 %v2743_v26, 1.0  ;;  %v6086_v46 = vld [vmem:[#allocation5 + $0x78] sm:$0xff]  ;;  %v6089_v62 = vld [vmem:[#allocation5 + $0xe8] sm:$0xff] }
 0x333   :  { %v2794_v16 = vmul.f32 %v6016_v14, %v2698_v59  ;;  %v2681_v51 = vmul.f32 0.6931472, %v3450_v33  ;;  %2996 = vst.msk [vmem:[%s6131_s4 + $0xc0] sm:$0xff] %vm22_vm5, %v2964_v11  ;;  %v2929_v56 = vmul.f32 %v3448_v7, %v2838_v27  ;;  %v3452_v18 = vpop.eup %3451  ;;  %v2611_v14 = vld [vmem:[#allocation3 + $0xb8] sm:$0xff]  ;;  %v2859_v7 = vmax.f32 %v6086_v46, 1.0 }
 0x334   :  { %v2776_v54 = vld [vmem:[#allocation4 + $0xe0] sm:$0xff]  ;;  %v3454_v13 = vpop.eup %3453  ;;  %3461 = vlog2.f32 %v2611_v14  ;;  %v2132_v11 = vld [vmem:[#allocation4 + $0xd8] sm:$0xff]  ;;  %v2873_v27 = vmax.f32 %v6089_v62, 1.0 }
 0x335   :  { %v2826_v44 = vsub.f32 %v2762_v19, %v2794_v16  ;;  %v2966_v20 = vmul.f32 -0.2, %v2929_v56  ;;  %v2714_v35 = vadd.f32 %v2681_v51, %v2586_v55  ;;  %v2840_v1 = vsub.f32 %v2776_v54, %v2808_v30  ;;  %v3456_v58 = vpop.eup %3455  ;;  %v6094_v33 = vld [vmem:[#allocation5 + $0xf8] sm:$0xff]  ;;  %v2581_v16 = vld [vmem:[#allocation2 + $0xc8] sm:$0xff] }
 0x336   :  { %3463 = vlog2.f32 %v2613_v42  ;;  %v2875_v54 = vmax.f32 %v6094_v33, 1.0 }
 0x337   :  { %v2905_v10 = vmul.f32 %v3452_v18, %v2826_v44  ;;  %2998 = vst.msk [vmem:[%s6131_s4 + $0xd0] sm:$0xff] %vm22_vm5, %v2966_v20  ;;  %v2810_v43 = vmul.f32 %v6033_v5, %v2714_v35  ;;  %v2933_v9 = vmul.f32 %v3454_v13, %v2840_v1  ;;  %v3458_v5 = vpop.eup %3457  ;;  %3465 = vlog2.f32 %v2615_v53  ;;  %v2134_v20 = vld [vmem:[#allocation4 + $0xe8] sm:$0xff]  ;;  %v2583_v35 = vld [vmem:[#allocation2 + $0xd8] sm:$0xff] }
 0x338   :  { %v2778_v57 = vld [vmem:[#allocation4 + $0xf0] sm:$0xff]  ;;  %v1502_v63 = vmul.f32 %v3458_v5, %v1470_v50  ;;  %v3460_v49 = vpop.eup %3459  ;;  %3467 = vlog2.f32 %v2617_v47 }
 0x339   :  { %v2954_v61 = vmul.f32 -0.2, %v2905_v10  ;;  %v2842_v45 = vsub.f32 %v2778_v57, %v2810_v43  ;;  %v2968_v22 = vmul.f32 -0.2, %v2933_v9  ;;  %v1518_v31 = vmul.f32 %v3460_v49, %v1486_v17  ;;  %v2571_v17 = vld [vmem:[#allocation2 + $0x78] sm:$0xff] }
 0x33a   :  { %3469 = vrcp.f32 %v2867_v38 }
 0x33b   :  { %2986 = vst.msk [vmem:[%s6131_s4 + $0x70] sm:$0xff] %vm22_vm5, %v2954_v61  ;;  %v2937_v8 = vmul.f32 %v3456_v58, %v2842_v45  ;;  %3000 = vst.msk [vmem:[%s6131_s4 + $0xe0] sm:$0xff] %vm22_vm5, %v2968_v22  ;;  %3471 = vrcp.f32 %v2869_v41  ;;  %v2136_v58 = vld [vmem:[#allocation4 + $0xf8] sm:$0xff] }
 0x33d   :  { %v2970_v52 = vmul.f32 -0.2, %v2937_v8 }
 0x33f   :  { %3002 = vst.msk [vmem:[%s6131_s4 + $0xf0] sm:$0xff] %vm22_vm5, %v2970_v52  ;;  %v2585_v52 = vld [vmem:[#allocation2 + $0xe8] sm:$0xff] }
 0x341   :  { %v1566_v28 = vpop.xlane.xlu1 %1565  ;;  %v3462_v12 = vpop.eup %3461 }
 0x342   :  { %v1630_v25 = vadd.f32 %v1566_v28, %v1502_v63  ;;  %v2667_v4 = vmul.f32 0.6931472, %v3462_v12 }
 0x343   :  { %v3464_v48 = vpop.eup %3463 }
 0x344   :  { %1663 = vst.msk [vmem:[#allocation3 + $0x78] sm:$0xff] %vm22_vm5, %v1630_v25  ;;  %v3466_v0 = vpop.eup %3465  ;;  %v2671_v60 = vmul.f32 0.6931472, %v3464_v48  ;;  %v2707_v40 = vadd.f32 %v2667_v4, %v2579_v2 }
 0x345   :  { %v1614_v34 = vpop.xlane.xlu1 %1613  ;;  %v2675_v51 = vmul.f32 0.6931472, %v3466_v0  ;;  %v3468_v18 = vpop.eup %3467 }
 0x346   :  { %v1646_v23 = vadd.f32 %v1614_v34, %v1518_v31  ;;  %v2803_v55 = vmul.f32 %v2739_v6, %v2707_v40  ;;  %v2709_v19 = vadd.f32 %v2671_v60, %v2581_v16  ;;  %v2679_v43 = vmul.f32 0.6931472, %v3468_v18 }
 0x347   :  { %v3470_v13 = vpop.eup %3469  ;;  %v2711_v14 = vadd.f32 %v2675_v51, %v2583_v35 }
 0x348   :  { %1679 = vst.msk [vmem:[#allocation3 + $0xf8] sm:$0xff] %vm22_vm5, %v1646_v23  ;;  %v2805_v57 = vmul.f32 %v2741_v29, %v2709_v19  ;;  %v3472_v22 = vpop.eup %3471  ;;  %v2713_v6 = vadd.f32 %v2679_v43, %v2585_v52 }
 0x349   :  { %v2272_v15 = vpop.xlane.xlu1 %2271  ;;  %v2807_v50 = vmul.f32 %v2743_v26, %v2711_v14  ;;  %v2587_v26 = vld [vmem:[#allocation2 + $0xf8] sm:$0xff] }
 0x34a   :  { %v2320_v3 = vadd.f32 %v2272_v15, %v2128_v32  ;;  %v2809_v32 = vmul.f32 %v6089_v62, %v2713_v6  ;;  %v2763_v15 = vld [vmem:[#allocation4 + $0x78] sm:$0xff] }
 0x34b   :  { %v2603_v36 = vld [vmem:[#allocation3 + $0x78] sm:$0xff] }
 0x34c   :  { %3473 = vlog2.f32 %v2603_v36  ;;  %2352 = vst.msk [vmem:[#allocation4 + $0xb8] sm:$0xff] %vm22_vm5, %v2320_v3 }
 0x34d   :  { %v2278_v24 = vpop.xlane.xlu1 %2277  ;;  %3475 = vrcp.f32 %v2871_v37 }
 0x34e   :  { %v2322_v21 = vadd.f32 %v2278_v24, %v2130_v39 }
 0x34f   :  { %v2619_v59 = vld [vmem:[#allocation3 + $0xf8] sm:$0xff] }
 0x350   :  { %3477 = vlog2.f32 %v2619_v59  ;;  %2354 = vst.msk [vmem:[#allocation4 + $0xc8] sm:$0xff] %vm22_vm5, %v2322_v21 }
 0x351   :  { %v2284_v56 = vpop.xlane.xlu1 %2283  ;;  %3479 = vrcp.f32 %v2859_v7 }
 0x352   :  { %v2324_v30 = vadd.f32 %v2284_v56, %v2132_v11  ;;  %3481 = vrcp.f32 %v2873_v27 }
 0x353   :  { %v2771_v44 = vld [vmem:[#allocation4 + $0xb8] sm:$0xff]  ;;  %3483 = vrcp.f32 %v2875_v54 }
 0x354   :  { %v2835_v1 = vsub.f32 %v2771_v44, %v2803_v55  ;;  %2356 = vst.msk [vmem:[#allocation4 + $0xd8] sm:$0xff] %vm22_vm5, %v2324_v30 }
 0x355   :  { %v2290_v10 = vpop.xlane.xlu1 %2289 }
 0x356   :  { %v2923_v9 = vmul.f32 %v3470_v13, %v2835_v1  ;;  %v2326_v61 = vadd.f32 %v2290_v10, %v2134_v20 }
 0x357   :  { %v2773_v45 = vld [vmem:[#allocation4 + $0xc8] sm:$0xff] }
 0x358   :  { %v2963_v42 = vmul.f32 -0.2, %v2923_v9  ;;  %v2837_v8 = vsub.f32 %v2773_v45, %v2805_v57  ;;  %2358 = vst.msk [vmem:[#allocation4 + $0xe8] sm:$0xff] %vm22_vm5, %v2326_v61 }
 0x359   :  { %v3474_v5 = vpop.eup %3473  ;;  %v2296_v53 = vpop.xlane.xlu1 %2295 }
 0x35a   :  { %v2651_v63 = vmul.f32 0.6931472, %v3474_v5  ;;  %2995 = vst.msk [vmem:[%s6131_s4 + $0xb8] sm:$0xff] %vm22_vm5, %v2963_v42  ;;  %v2927_v49 = vmul.f32 %v3472_v22, %v2837_v8  ;;  %v2328_v28 = vadd.f32 %v2296_v53, %v2136_v58  ;;  %v3476_v47 = vpop.eup %3475 }
 0x35b   :  { %v2775_v25 = vld [vmem:[#allocation4 + $0xd8] sm:$0xff] }
 0x35c   :  { %v2699_v38 = vadd.f32 %v2651_v63, %v2571_v17  ;;  %v2965_v29 = vmul.f32 -0.2, %v2927_v49  ;;  %v2839_v31 = vsub.f32 %v2775_v25, %v2807_v50  ;;  %2360 = vst.msk [vmem:[#allocation4 + $0xf8] sm:$0xff] %vm22_vm5, %v2328_v28 }
 0x35d   :  { %v3478_v34 = vpop.eup %3477 }
 0x35e   :  { %v2795_v23 = vmul.f32 %v6086_v46, %v2699_v38  ;;  %v2683_v12 = vmul.f32 0.6931472, %v3478_v34  ;;  %2997 = vst.msk [vmem:[%s6131_s4 + $0xc8] sm:$0xff] %vm22_vm5, %v2965_v29  ;;  %v2931_v41 = vmul.f32 %v3476_v47, %v2839_v31  ;;  %v3480_v3 = vpop.eup %3479 }
 0x35f   :  { %v2777_v4 = vld [vmem:[#allocation4 + $0xe8] sm:$0xff]  ;;  %v3482_v2 = vpop.eup %3481 }
 0x360   :  { %v2827_v48 = vsub.f32 %v2763_v15, %v2795_v23  ;;  %v2967_v37 = vmul.f32 -0.2, %v2931_v41  ;;  %v2841_v36 = vsub.f32 %v2777_v4, %v2809_v32  ;;  %v2715_v39 = vadd.f32 %v2683_v12, %v2587_v26  ;;  %v3484_v7 = vpop.eup %3483 }
 0x362   :  { %v2907_v24 = vmul.f32 %v3480_v3, %v2827_v48  ;;  %2999 = vst.msk [vmem:[%s6131_s4 + $0xd8] sm:$0xff] %vm22_vm5, %v2967_v37  ;;  %v2935_v46 = vmul.f32 %v3482_v2, %v2841_v36  ;;  %v2811_v0 = vmul.f32 %v6094_v33, %v2715_v39 }
 0x363   :  { %v2779_v60 = vld [vmem:[#allocation4 + $0xf8] sm:$0xff] }
 0x364   :  { %v2955_v62 = vmul.f32 -0.2, %v2907_v24  ;;  %v2969_v40 = vmul.f32 -0.2, %v2935_v46  ;;  %v2843_v21 = vsub.f32 %v2779_v60, %v2811_v0 }
 0x366   :  { %2987 = vst.msk [vmem:[%s6131_s4 + $0x78] sm:$0xff] %vm22_vm5, %v2955_v62  ;;  %3001 = vst.msk [vmem:[%s6131_s4 + $0xe8] sm:$0xff] %vm22_vm5, %v2969_v40  ;;  %v2939_v59 = vmul.f32 %v3484_v7, %v2843_v21 }
 0x368   :  { %v2971_v11 = vmul.f32 -0.2, %v2939_v59 }
 0x36a   :  { %3003 = vst.msk [vmem:[%s6131_s4 + $0xf8] sm:$0xff] %vm22_vm5, %v2971_v11 }

</bundles_post_ra>
